<compile_context>
chip_gen: v6e
topology: v6e:2x2x1
jax: 0.10.0
libtpu: 0.0.40
codegen_flags: <defaults>
</compile_context>

<pallas_src>
import functools
import math

import jax
import jax.numpy as jnp
from jax.experimental import pallas as pl
from jax.experimental.pallas import tpu as pltpu


# ----------------------------- fused Pallas kernel -----------------------------

def _lemodel_fused_kernel(
    x_ref, pos_ref,                              # batch / HW-tile varying streams
    conv_w_ref, conv_b_ref,                      # input_proj (1x1 conv)
    q_ref,                                       # pre-projected, pre-scaled queries
    wk_ref, wv_ref, wo_ref,                      # cross-attention decoder layer
    fc_w_ref, fc_b_ref,                          # GroupWiseLinear head
    w1_ref, b1_ref, w2_ref, b2_ref,              # projector MLP (padded)
    out_ref, feat_ref,                           # outputs (padded)
    m_sc, l_sc, acc_sc,                          # online-softmax scratch
):
    f32 = jnp.float32
    bf16 = jnp.bfloat16
    s = pl.program_id(1)

    @pl.when(s == 0)
    def _init():
        m_sc[...] = jnp.full_like(m_sc, -jnp.inf)
        l_sc[...] = jnp.zeros_like(l_sc)
        acc_sc[...] = jnp.zeros_like(acc_sc)

    # ---- input_proj (1x1 Conv2d == channel matmul) + positional add, this tile ----
    x = x_ref[0]                                                        # (hw_t, Cin) bf16
    mem = (jnp.dot(x, conv_w_ref[...], preferred_element_type=f32)
           + conv_b_ref[...]
           + pos_ref[...].astype(f32))                                  # (hw_t, D) f32
    mem_bf = mem.astype(bf16)

    # k / v projections: bf16 MXU, f32 accumulate, then immediately back to bf16.
    k = jnp.dot(mem_bf, wk_ref[...], preferred_element_type=f32).astype(bf16)
    v = jnp.dot(mem_bf, wv_ref[...], preferred_element_type=f32).astype(bf16)

    # scores: q is already projected and pre-scaled by 1/sqrt(d) in the wrapper.
    scores = jax.lax.dot_general(
        q_ref[...], k, dimension_numbers=(((1,), (1,)), ((), ())),
        preferred_element_type=f32)                                     # (C_pad, hw_t) f32

    # ---- flash-style online softmax update (f32) ----
    m_prev = m_sc[...]
    m_new = jnp.maximum(m_prev, jnp.max(scores, axis=-1, keepdims=True))
    alpha = jnp.exp(m_prev - m_new)
    p = jnp.exp(scores - m_new)
    l_sc[...] = alpha * l_sc[...] + jnp.sum(p, axis=-1, keepdims=True)
    acc_sc[...] = alpha * acc_sc[...] + jnp.dot(
        p.astype(bf16), v, preferred_element_type=f32)                  # (C_pad, D)
    m_sc[...] = m_new

    # ---- epilogue on the last HW tile: wo, head, projector, normalize ----
    @pl.when(s == pl.num_programs(1) - 1)
    def _epilogue():
        # softmax denominator on the EUP (approx reciprocal) -> frees the VALU slot
        inv_l = pl.reciprocal(l_sc[...], approx=True)
        attn = acc_sc[...] * inv_l                                      # (C_pad, D) f32
        hs = jnp.dot(attn.astype(bf16), wo_ref[...],
                     preferred_element_type=f32)                        # (C_pad, D) f32

        # GroupWiseLinear head: out[c] = sum_d fc_w[c,d]*hs[c,d] + fc_b[c]
        out_ref[0] = jnp.sum((fc_w_ref[...] * hs)[None, :, :], axis=-1) + fc_b_ref[...]

        # projector: Linear -> ReLU -> Linear -> L2 normalize (F.normalize, eps=1e-12)
        h = jnp.dot(hs.astype(bf16), w1_ref[...],
                    preferred_element_type=f32) + b1_ref[...]
        h = jnp.maximum(h, 0.0)
        y = jnp.dot(h.astype(bf16), w2_ref[...],
                    preferred_element_type=f32) + b2_ref[...]           # (C_pad, F_pad)
        sumsq = jnp.sum(y * y, axis=-1, keepdims=True)
        feat_ref[0] = y * jax.lax.rsqrt(jnp.maximum(sumsq, 1e-24))


# ------------------------------ LEModel forward -------------------------------

def _round_up(x, m):
    return (x + m - 1) // m * m


def _vmem_limit_bytes():
    # ~48 MiB on v7x (64 MiB physical), ~96 MiB on v5e/v6e (128 MiB physical).
    try:
        cap = int(pltpu.get_tpu_info().vmem_capacity_bytes)
    except Exception:
        cap = 128 * 1024 * 1024
    return max(32 * 1024 * 1024, min(int(cap * 0.75), 100 * 1024 * 1024))


def le_model_forward(x_nchw, params, *, num_class, feat_dim, is_proj=True,
                     hw_tile=None, single_buffer_weights=True):
    f32, bf16 = jnp.float32, jnp.bfloat16
    b, cin, h, w = x_nchw.shape
    d = params["conv_w"].shape[1]
    hw = h * w

    if hw_tile is None:
        hw_tile = hw
        for t in (512, 256, 128):
            if hw % t == 0:
                hw_tile = t
                break
    assert hw % hw_tile == 0
    n_s = hw // hw_tile

    # Pad class / feature dims to the 128-lane width: dense output stores and
    # full MXU rows for the post-attention matmuls.  Padding stripped below.
    c_pad = _round_up(num_class, 128)
    f_pad = _round_up(feat_dim, 128)

    # --- synthetic backbone: src = x, pos = learned batch-invariant map (HW, D) ---
    # cast to bf16 first so the layout shuffle moves half the bytes.
    x_cl = jnp.transpose(x_nchw.astype(bf16).reshape(b, cin, hw), (0, 2, 1))   # (B, HW, Cin)
    pos = params["pos"].astype(bf16)                                           # (HW, D)
    # TODO(synk): the NCHW->channels-last shuffle could be folded into the kernel
    # via a transposed conv contraction; kept in XLA here for lowering safety.

    # --- hoisted, batch-invariant query projection (pre-scaled by 1/sqrt(d)) ---
    q_pre = jnp.dot(params["query_embed"], params["wq"],
                    preferred_element_type=f32) * (1.0 / math.sqrt(d))
    q_pre = jnp.zeros((c_pad, d), f32).at[:num_class].set(q_pre).astype(bf16)

    # --- zero-pad head / projector params to the padded class / feature dims ---
    fc_w = jnp.zeros((c_pad, d), f32).at[:num_class].set(params["fc_w"])
    fc_b = jnp.zeros((1, c_pad), f32).at[:, :num_class].set(params["fc_b"])
    w2 = jnp.zeros((d, f_pad), f32).at[:, :feat_dim].set(params["w2"]).astype(bf16)
    b2 = jnp.zeros((1, f_pad), f32).at[:, :feat_dim].set(params["b2"])

    # Grid-invariant weights never change block index -> single-buffer them.
    weight_mode = dict(pipeline_mode=pl.Buffered(1)) if single_buffer_weights else {}
    inv = lambda i, s: (0, 0)
    wspec = lambda shape: pl.BlockSpec(shape, inv, **weight_mode)

    out3, feat_pad = pl.pallas_call(
        _lemodel_fused_kernel,
        out_shape=(
            jax.ShapeDtypeStruct((b, 1, c_pad), f32),
            jax.ShapeDtypeStruct((b, c_pad, f_pad), f32),
        ),
        grid=(b, n_s),
        in_specs=[
            pl.BlockSpec((1, hw_tile, cin), lambda i, s: (i, s, 0)),   # x (bf16)
            pl.BlockSpec((hw_tile, d), lambda i, s: (s, 0)),           # pos (bf16)
            wspec((cin, d)),          # conv_w (bf16)
            wspec((1, d)),            # conv_b (f32)
            wspec((c_pad, d)),        # q_pre  (bf16, pre-scaled)
            wspec((d, d)),            # wk (bf16)
            wspec((d, d)),            # wv (bf16)
            wspec((d, d)),            # wo (bf16)
            wspec((c_pad, d)),        # fc_w (f32)
            wspec((1, c_pad)),        # fc_b (f32)
            wspec((d, d)),            # w1 (bf16)
            wspec((1, d)),            # b1 (f32)
            wspec((d, f_pad)),        # w2 (bf16)
            wspec((1, f_pad)),        # b2 (f32)
        ],
        out_specs=(
            pl.BlockSpec((1, 1, c_pad), lambda i, s: (i, 0, 0)),
            pl.BlockSpec((1, c_pad, f_pad), lambda i, s: (i, 0, 0)),
        ),
        scratch_shapes=[
            pltpu.VMEM((c_pad, 1), jnp.float32),   # running max  m
            pltpu.VMEM((c_pad, 1), jnp.float32),   # running sum  l
            pltpu.VMEM((c_pad, d), jnp.float32),   # running weighted-V acc
        ],
        compiler_params=pltpu.CompilerParams(
            dimension_semantics=("parallel", "arbitrary"),   # batch || , HW reduction
            vmem_limit_bytes=_vmem_limit_bytes(),
        ),
    )(
        x_cl, pos,
        params["conv_w"].astype(bf16), params["conv_b"].astype(f32),
        q_pre,
        params["wk"].astype(bf16), params["wv"].astype(bf16), params["wo"].astype(bf16),
        fc_w, fc_b,
        params["w1"].astype(bf16), params["b1"].astype(f32),
        w2, b2,
    )

    out = out3.reshape(b, c_pad)[:, :num_class]
    if not is_proj:
        return out
    feat = feat_pad[:, :num_class, :feat_dim]
    return out, feat


def init_params(key, cin, d, num_class, feat_dim, h, w):
    ks = jax.random.split(key, 16)

    def u(k, shape, scale):
        return jax.random.uniform(k, shape, jnp.float32, -scale, scale)

    s_conv = 1.0 / math.sqrt(cin)          # Conv2d(cin, d, 1) fan_in = cin
    s_d = 1.0 / math.sqrt(d)
    return {
        "conv_w": u(ks[0], (cin, d), s_conv),
        "conv_b": u(ks[1], (1, d), s_conv),
        "query_embed": jax.random.normal(ks[2], (num_class, d), jnp.float32),
        "wq": u(ks[3], (d, d), s_d),
        "wk": u(ks[4], (d, d), s_d),
        "wv": u(ks[5], (d, d), s_d),
        "wo": u(ks[6], (d, d), s_d),
        # GroupWiseLinear: stdv = 1/sqrt(hidden_dim), uniform(-stdv, stdv)
        "fc_w": u(ks[7], (num_class, d), s_d),
        "fc_b": u(ks[8], (1, num_class), s_d),
        # projector: Linear(d, d) -> ReLU -> Linear(d, feat_dim)
        "w1": u(ks[9], (d, d), s_d),
        "b1": u(ks[10], (1, d), s_d),
        "w2": u(ks[11], (d, feat_dim), s_d),
        "b2": u(ks[12], (1, feat_dim), s_d),
        # synthetic backbone positional embedding, batch-invariant (HW, D)
        "pos": 0.02 * jax.random.normal(ks[13], (h * w, d), jnp.float32),
    }


if __name__ == "__main__":
    B, CIN, H, W = 2, 4, 16, 16
    D, NUM_CLASS, FEAT_DIM = 32, 16, 32

    key = jax.random.PRNGKey(0)
    k_params, k_x = jax.random.split(key)
    params = init_params(k_params, CIN, D, NUM_CLASS, FEAT_DIM, H, W)
    x = jax.random.normal(k_x, (B, CIN, H, W), jnp.float32)

    def make_fwd(single_buffer_weights):
        return jax.jit(functools.partial(
            le_model_forward, num_class=NUM_CLASS, feat_dim=FEAT_DIM,
            is_proj=True, hw_tile=128,               # 2 HW tiles -> exercises online softmax
            single_buffer_weights=single_buffer_weights))

    try:
        out, feat = jax.block_until_ready(make_fwd(True)(x, params))
    except Exception:
        # pl.Buffered(1) weight residency unavailable in this build: fall back
        # to default double-buffered weight BlockSpecs (same semantics).
        out, feat = jax.block_until_ready(make_fwd(False)(x, params))

    assert out.shape == (B, NUM_CLASS)
    assert feat.shape == (B, NUM_CLASS, FEAT_DIM)
    assert bool(jnp.all(jnp.isfinite(out)))
    # feat rows should be unit-norm after the F.normalize equivalent
    norms = jnp.linalg.norm(feat, axis=-1)
    assert bool(jnp.all(jnp.abs(norms - 1.0) < 1e-3))
    print("KERNEL_OK")
</pallas_src>

<mosaic_0001>
module attributes {stable_mosaic.version = 11 : i64} {
  func.func @_lemodel_fused_kernel(%arg0: i32, %arg1: i32, %arg2: memref<1x128x4xbf16, #tpu.memory_space<vmem>>, %arg3: memref<128x32xbf16, #tpu.memory_space<vmem>>, %arg4: memref<4x32xbf16, #tpu.memory_space<vmem>>, %arg5: memref<1x32xf32, #tpu.memory_space<vmem>>, %arg6: memref<128x32xbf16, #tpu.memory_space<vmem>>, %arg7: memref<32x32xbf16, #tpu.memory_space<vmem>>, %arg8: memref<32x32xbf16, #tpu.memory_space<vmem>>, %arg9: memref<32x32xbf16, #tpu.memory_space<vmem>>, %arg10: memref<128x32xf32, #tpu.memory_space<vmem>>, %arg11: memref<1x128xf32, #tpu.memory_space<vmem>>, %arg12: memref<32x32xbf16, #tpu.memory_space<vmem>>, %arg13: memref<1x32xf32, #tpu.memory_space<vmem>>, %arg14: memref<32x128xbf16, #tpu.memory_space<vmem>>, %arg15: memref<1x128xf32, #tpu.memory_space<vmem>>, %arg16: memref<1x1x128xf32, #tpu.memory_space<vmem>>, %arg17: memref<1x128x128xf32, #tpu.memory_space<vmem>>, %arg18: memref<128x1xf32, #tpu.memory_space<vmem>>, %arg19: memref<128x1xf32, #tpu.memory_space<vmem>>, %arg20: memref<128x32xf32, #tpu.memory_space<vmem>>) attributes {dimension_semantics = [#tpu.dimension_semantics<parallel>, #tpu.dimension_semantics<arbitrary>], iteration_bounds = array<i64: 2, 2>, scalar_prefetch = 0 : i64, scratch_operands = 3 : i64, tpu.core_type = #tpu.core_type<tc>, window_params = [{transform_indices = @transform_0, window_bounds = array<i64: 1, 128, 4>}, {transform_indices = @transform_1, window_bounds = array<i64: 128, 32>}, {pipeline_mode = #tpu.pipeline_mode<synchronous>, transform_indices = @transform_2, window_bounds = array<i64: 4, 32>}, {pipeline_mode = #tpu.pipeline_mode<synchronous>, transform_indices = @transform_3, window_bounds = array<i64: 1, 32>}, {pipeline_mode = #tpu.pipeline_mode<synchronous>, transform_indices = @transform_4, window_bounds = array<i64: 128, 32>}, {pipeline_mode = #tpu.pipeline_mode<synchronous>, transform_indices = @transform_5, window_bounds = array<i64: 32, 32>}, {pipeline_mode = #tpu.pipeline_mode<synchronous>, transform_indices = @transform_6, window_bounds = array<i64: 32, 32>}, {pipeline_mode = #tpu.pipeline_mode<synchronous>, transform_indices = @transform_7, window_bounds = array<i64: 32, 32>}, {pipeline_mode = #tpu.pipeline_mode<synchronous>, transform_indices = @transform_8, window_bounds = array<i64: 128, 32>}, {pipeline_mode = #tpu.pipeline_mode<synchronous>, transform_indices = @transform_9, window_bounds = array<i64: 1, 128>}, {pipeline_mode = #tpu.pipeline_mode<synchronous>, transform_indices = @transform_10, window_bounds = array<i64: 32, 32>}, {pipeline_mode = #tpu.pipeline_mode<synchronous>, transform_indices = @transform_11, window_bounds = array<i64: 1, 32>}, {pipeline_mode = #tpu.pipeline_mode<synchronous>, transform_indices = @transform_12, window_bounds = array<i64: 32, 128>}, {pipeline_mode = #tpu.pipeline_mode<synchronous>, transform_indices = @transform_13, window_bounds = array<i64: 1, 128>}, {transform_indices = @transform_14, window_bounds = array<i64: 1, 1, 128>}, {transform_indices = @transform_15, window_bounds = array<i64: 1, 128, 128>}]} {
    %c0_i32 = arith.constant 0 : i32
    %0 = arith.cmpi eq, %arg1, %c0_i32 : i32
    %1 = arith.extui %0 : i1 to i32
    %c0_i32_0 = arith.constant 0 : i32
    %2 = arith.cmpi ne, %1, %c0_i32_0 : i32
    scf.if %2 {
      %cst_34 = arith.constant 0xFF800000 : f32
      %48 = vector.broadcast %cst_34 : f32 to vector<128x1xf32>
      %c0_35 = arith.constant 0 : index
      %c0_36 = arith.constant 0 : index
      %49 = vector.load %arg18[%c0_35, %c0_36] : memref<128x1xf32, #tpu.memory_space<vmem>>, vector<128x1xf32>
      tpu.vector_store %arg18[%c0_35, %c0_36], %48 {strides = array<i32>} : memref<128x1xf32, #tpu.memory_space<vmem>>, vector<128x1xf32>,
      %cst_37 = arith.constant 0.000000e+00 : f32
      %50 = vector.broadcast %cst_37 : f32 to vector<128x1xf32>
      %c0_38 = arith.constant 0 : index
      %c0_39 = arith.constant 0 : index
      %51 = vector.load %arg19[%c0_38, %c0_39] : memref<128x1xf32, #tpu.memory_space<vmem>>, vector<128x1xf32>
      tpu.vector_store %arg19[%c0_38, %c0_39], %50 {strides = array<i32>} : memref<128x1xf32, #tpu.memory_space<vmem>>, vector<128x1xf32>,
      %cst_40 = arith.constant 0.000000e+00 : f32
      %52 = vector.broadcast %cst_40 : f32 to vector<128x32xf32>
      %c0_41 = arith.constant 0 : index
      %c0_42 = arith.constant 0 : index
      %53 = vector.load %arg20[%c0_41, %c0_42] : memref<128x32xf32, #tpu.memory_space<vmem>>, vector<128x32xf32>
      tpu.vector_store %arg20[%c0_41, %c0_42], %52 {strides = array<i32>} : memref<128x32xf32, #tpu.memory_space<vmem>>, vector<128x32xf32>,
    } else {
    }
    %c0 = arith.constant 0 : index
    %c0_1 = arith.constant 0 : index
    %c0_2 = arith.constant 0 : index
    %3 = vector.load %arg2[%c0, %c0_1, %c0_2] : memref<1x128x4xbf16, #tpu.memory_space<vmem>>, vector<1x128x4xbf16>
    %4 = vector.shape_cast %3 : vector<1x128x4xbf16> to vector<128x4xbf16>
    %c0_3 = arith.constant 0 : index
    %c0_4 = arith.constant 0 : index
    %5 = vector.load %arg4[%c0_3, %c0_4] : memref<4x32xbf16, #tpu.memory_space<vmem>>, vector<4x32xbf16>
    %cst = arith.constant dense<0.000000e+00> : vector<128x32xf32>
    %6 = tpu.matmul %4, %5, %cst {dimension_numbers = #tpu.dot_dimension_numbers<[1], [0], [0], [1], [0, 0, 1, 1], [], []>} : vector<128x4xbf16>, vector<4x32xbf16>, vector<128x32xf32> -> vector<128x32xf32>
    %c0_5 = arith.constant 0 : index
    %c0_6 = arith.constant 0 : index
    %7 = vector.load %arg5[%c0_5, %c0_6] : memref<1x32xf32, #tpu.memory_space<vmem>>, vector<1x32xf32>
    %8 = vector.broadcast %7 : vector<1x32xf32> to vector<128x32xf32>
    %9 = arith.addf %6, %8 : vector<128x32xf32>
    %c0_7 = arith.constant 0 : index
    %c0_8 = arith.constant 0 : index
    %10 = vector.load %arg3[%c0_7, %c0_8] : memref<128x32xbf16, #tpu.memory_space<vmem>>, vector<128x32xbf16>
    %11 = arith.extf %10 : vector<128x32xbf16> to vector<128x32xf32>
    %12 = arith.addf %9, %11 : vector<128x32xf32>
    %13 = arith.truncf %12 : vector<128x32xf32> to vector<128x32xbf16>
    %c0_9 = arith.constant 0 : index
    %c0_10 = arith.constant 0 : index
    %14 = vector.load %arg7[%c0_9, %c0_10] : memref<32x32xbf16, #tpu.memory_space<vmem>>, vector<32x32xbf16>
    %cst_11 = arith.constant dense<0.000000e+00> : vector<128x32xf32>
    %15 = tpu.matmul %13, %14, %cst_11 {dimension_numbers = #tpu.dot_dimension_numbers<[1], [0], [0], [1], [0, 0, 1, 1], [], []>} : vector<128x32xbf16>, vector<32x32xbf16>, vector<128x32xf32> -> vector<128x32xf32>
    %16 = arith.truncf %15 : vector<128x32xf32> to vector<128x32xbf16>
    %c0_12 = arith.constant 0 : index
    %c0_13 = arith.constant 0 : index
    %17 = vector.load %arg8[%c0_12, %c0_13] : memref<32x32xbf16, #tpu.memory_space<vmem>>, vector<32x32xbf16>
    %cst_14 = arith.constant dense<0.000000e+00> : vector<128x32xf32>
    %18 = tpu.matmul %13, %17, %cst_14 {dimension_numbers = #tpu.dot_dimension_numbers<[1], [0], [0], [1], [0, 0, 1, 1], [], []>} : vector<128x32xbf16>, vector<32x32xbf16>, vector<128x32xf32> -> vector<128x32xf32>
    %19 = arith.truncf %18 : vector<128x32xf32> to vector<128x32xbf16>
    %c0_15 = arith.constant 0 : index
    %c0_16 = arith.constant 0 : index
    %20 = vector.load %arg6[%c0_15, %c0_16] : memref<128x32xbf16, #tpu.memory_space<vmem>>, vector<128x32xbf16>
    %cst_17 = arith.constant dense<0.000000e+00> : vector<128x128xf32>
    %21 = tpu.matmul %20, %16, %cst_17 {dimension_numbers = #tpu.dot_dimension_numbers<[1], [1], [0], [0], [0, 0, 1, 0], [], []>} : vector<128x32xbf16>, vector<128x32xbf16>, vector<128x128xf32> -> vector<128x128xf32>
    %c0_18 = arith.constant 0 : index
    %c0_19 = arith.constant 0 : index
    %22 = vector.load %arg18[%c0_18, %c0_19] : memref<128x1xf32, #tpu.memory_space<vmem>>, vector<128x1xf32>
    %cst_20 = arith.constant dense<0xFF800000> : vector<128xf32>
    %23 = vector.multi_reduction <maximumf>, %21, %cst_20 [1] : vector<128x128xf32> to vector<128xf32>
    %24 = vector.shape_cast %23 : vector<128xf32> to vector<128x1xf32>
    %25 = arith.maximumf %22, %24 : vector<128x1xf32>
    %26 = arith.subf %22, %25 : vector<128x1xf32>
    %27 = math.exp %26 : vector<128x1xf32>
    %28 = vector.broadcast %25 : vector<128x1xf32> to vector<128x128xf32>
    %29 = arith.subf %21, %28 : vector<128x128xf32>
    %30 = math.exp %29 : vector<128x128xf32>
    %c0_21 = arith.constant 0 : index
    %c0_22 = arith.constant 0 : index
    %31 = vector.load %arg19[%c0_21, %c0_22] : memref<128x1xf32, #tpu.memory_space<vmem>>, vector<128x1xf32>
    %32 = arith.mulf %27, %31 : vector<128x1xf32>
    %cst_23 = arith.constant dense<0.000000e+00> : vector<128xf32>
    %33 = vector.multi_reduction <add>, %30, %cst_23 [1] : vector<128x128xf32> to vector<128xf32>
    %34 = vector.shape_cast %33 : vector<128xf32> to vector<128x1xf32>
    %35 = arith.addf %32, %34 : vector<128x1xf32>
    %c0_24 = arith.constant 0 : index
    %c0_25 = arith.constant 0 : index
    %36 = vector.load %arg19[%c0_24, %c0_25] : memref<128x1xf32, #tpu.memory_space<vmem>>, vector<128x1xf32>
    tpu.vector_store %arg19[%c0_24, %c0_25], %35 {strides = array<i32>} : memref<128x1xf32, #tpu.memory_space<vmem>>, vector<128x1xf32>,
    %c0_26 = arith.constant 0 : index
    %c0_27 = arith.constant 0 : index
    %37 = vector.load %arg20[%c0_26, %c0_27] : memref<128x32xf32, #tpu.memory_space<vmem>>, vector<128x32xf32>
    %38 = vector.broadcast %27 : vector<128x1xf32> to vector<128x32xf32>
    %39 = arith.mulf %38, %37 : vector<128x32xf32>
    %40 = arith.truncf %30 : vector<128x128xf32> to vector<128x128xbf16>
    %cst_28 = arith.constant dense<0.000000e+00> : vector<128x32xf32>
    %41 = tpu.matmul %40, %19, %cst_28 {dimension_numbers = #tpu.dot_dimension_numbers<[1], [0], [0], [1], [0, 0, 1, 1], [], []>} : vector<128x128xbf16>, vector<128x32xbf16>, vector<128x32xf32> -> vector<128x32xf32>
    %42 = arith.addf %39, %41 : vector<128x32xf32>
    %c0_29 = arith.constant 0 : index
    %c0_30 = arith.constant 0 : index
    %43 = vector.load %arg20[%c0_29, %c0_30] : memref<128x32xf32, #tpu.memory_space<vmem>>, vector<128x32xf32>
    tpu.vector_store %arg20[%c0_29, %c0_30], %42 {strides = array<i32>} : memref<128x32xf32, #tpu.memory_space<vmem>>, vector<128x32xf32>,
    %c0_31 = arith.constant 0 : index
    %c0_32 = arith.constant 0 : index
    %44 = vector.load %arg18[%c0_31, %c0_32] : memref<128x1xf32, #tpu.memory_space<vmem>>, vector<128x1xf32>
    tpu.vector_store %arg18[%c0_31, %c0_32], %25 {strides = array<i32>} : memref<128x1xf32, #tpu.memory_space<vmem>>, vector<128x1xf32>,
    %c1_i32 = arith.constant 1 : i32
    %45 = arith.cmpi eq, %arg1, %c1_i32 : i32
    %46 = arith.extui %45 : i1 to i32
    %c0_i32_33 = arith.constant 0 : i32
    %47 = arith.cmpi ne, %46, %c0_i32_33 : i32
    scf.if %47 {
      %c0_34 = arith.constant 0 : index
      %c0_35 = arith.constant 0 : index
      %48 = vector.load %arg19[%c0_34, %c0_35] : memref<128x1xf32, #tpu.memory_space<vmem>>, vector<128x1xf32>
      %49 = tpu.reciprocal %48 {approx = true} : vector<128x1xf32> -> vector<128x1xf32>
      %c0_36 = arith.constant 0 : index
      %c0_37 = arith.constant 0 : index
      %50 = vector.load %arg20[%c0_36, %c0_37] : memref<128x32xf32, #tpu.memory_space<vmem>>, vector<128x32xf32>
      %51 = vector.broadcast %49 : vector<128x1xf32> to vector<128x32xf32>
      %52 = arith.mulf %50, %51 : vector<128x32xf32>
      %53 = arith.truncf %52 : vector<128x32xf32> to vector<128x32xbf16>
      %c0_38 = arith.constant 0 : index
      %c0_39 = arith.constant 0 : index
      %54 = vector.load %arg9[%c0_38, %c0_39] : memref<32x32xbf16, #tpu.memory_space<vmem>>, vector<32x32xbf16>
      %cst_40 = arith.constant dense<0.000000e+00> : vector<128x32xf32>
      %55 = tpu.matmul %53, %54, %cst_40 {dimension_numbers = #tpu.dot_dimension_numbers<[1], [0], [0], [1], [0, 0, 1, 1], [], []>} : vector<128x32xbf16>, vector<32x32xbf16>, vector<128x32xf32> -> vector<128x32xf32>
      %c0_41 = arith.constant 0 : index
      %c0_42 = arith.constant 0 : index
      %56 = vector.load %arg10[%c0_41, %c0_42] : memref<128x32xf32, #tpu.memory_space<vmem>>, vector<128x32xf32>
      %57 = arith.mulf %56, %55 : vector<128x32xf32>
      %58 = vector.shape_cast %57 : vector<128x32xf32> to vector<1x128x32xf32>
      %cst_43 = arith.constant dense<0.000000e+00> : vector<1x128xf32>
      %59 = vector.multi_reduction <add>, %58, %cst_43 [2] : vector<1x128x32xf32> to vector<1x128xf32>
      %c0_44 = arith.constant 0 : index
      %c0_45 = arith.constant 0 : index
      %60 = vector.load %arg11[%c0_44, %c0_45] : memref<1x128xf32, #tpu.memory_space<vmem>>, vector<1x128xf32>
      %61 = arith.addf %59, %60 : vector<1x128xf32>
      %c0_46 = arith.constant 0 : index
      %c0_47 = arith.constant 0 : index
      %c0_48 = arith.constant 0 : index
      %62 = vector.load %arg16[%c0_46, %c0_47, %c0_48] : memref<1x1x128xf32, #tpu.memory_space<vmem>>, vector<1x1x128xf32>
      %63 = vector.shape_cast %62 : vector<1x1x128xf32> to vector<1x128xf32>
      %64 = vector.shape_cast %61 : vector<1x128xf32> to vector<1x1x128xf32>
      tpu.vector_store %arg16[%c0_46, %c0_47, %c0_48], %64 {strides = array<i32>} : memref<1x1x128xf32, #tpu.memory_space<vmem>>, vector<1x1x128xf32>,
      %65 = arith.truncf %55 : vector<128x32xf32> to vector<128x32xbf16>
      %c0_49 = arith.constant 0 : index
      %c0_50 = arith.constant 0 : index
      %66 = vector.load %arg12[%c0_49, %c0_50] : memref<32x32xbf16, #tpu.memory_space<vmem>>, vector<32x32xbf16>
      %cst_51 = arith.constant dense<0.000000e+00> : vector<128x32xf32>
      %67 = tpu.matmul %65, %66, %cst_51 {dimension_numbers = #tpu.dot_dimension_numbers<[1], [0], [0], [1], [0, 0, 1, 1], [], []>} : vector<128x32xbf16>, vector<32x32xbf16>, vector<128x32xf32> -> vector<128x32xf32>
      %c0_52 = arith.constant 0 : index
      %c0_53 = arith.constant 0 : index
      %68 = vector.load %arg13[%c0_52, %c0_53] : memref<1x32xf32, #tpu.memory_space<vmem>>, vector<1x32xf32>
      %69 = vector.broadcast %68 : vector<1x32xf32> to vector<128x32xf32>
      %70 = arith.addf %67, %69 : vector<128x32xf32>
      %cst_54 = arith.constant 0.000000e+00 : f32
      %71 = vector.broadcast %cst_54 : f32 to vector<128x32xf32>
      %72 = arith.maximumf %70, %71 : vector<128x32xf32>
      %73 = arith.truncf %72 : vector<128x32xf32> to vector<128x32xbf16>
      %c0_55 = arith.constant 0 : index
      %c0_56 = arith.constant 0 : index
      %74 = vector.load %arg14[%c0_55, %c0_56] : memref<32x128xbf16, #tpu.memory_space<vmem>>, vector<32x128xbf16>
      %cst_57 = arith.constant dense<0.000000e+00> : vector<128x128xf32>
      %75 = tpu.matmul %73, %74, %cst_57 {dimension_numbers = #tpu.dot_dimension_numbers<[1], [0], [0], [1], [0, 0, 1, 1], [], []>} : vector<128x32xbf16>, vector<32x128xbf16>, vector<128x128xf32> -> vector<128x128xf32>
      %c0_58 = arith.constant 0 : index
      %c0_59 = arith.constant 0 : index
      %76 = vector.load %arg15[%c0_58, %c0_59] : memref<1x128xf32, #tpu.memory_space<vmem>>, vector<1x128xf32>
      %77 = vector.broadcast %76 : vector<1x128xf32> to vector<128x128xf32>
      %78 = arith.addf %75, %77 : vector<128x128xf32>
      %79 = arith.mulf %78, %78 : vector<128x128xf32>
      %cst_60 = arith.constant dense<0.000000e+00> : vector<128xf32>
      %80 = vector.multi_reduction <add>, %79, %cst_60 [1] : vector<128x128xf32> to vector<128xf32>
      %81 = vector.shape_cast %80 : vector<128xf32> to vector<128x1xf32>
      %cst_61 = arith.constant 1.000000e-24 : f32
      %82 = vector.broadcast %cst_61 : f32 to vector<128x1xf32>
      %83 = arith.maximumf %81, %82 : vector<128x1xf32>
      %84 = math.rsqrt %83 : vector<128x1xf32>
      %85 = vector.broadcast %84 : vector<128x1xf32> to vector<128x128xf32>
      %86 = arith.mulf %78, %85 : vector<128x128xf32>
      %c0_62 = arith.constant 0 : index
      %c0_63 = arith.constant 0 : index
      %c0_64 = arith.constant 0 : index
      %87 = vector.load %arg17[%c0_62, %c0_63, %c0_64] : memref<1x128x128xf32, #tpu.memory_space<vmem>>, vector<1x128x128xf32>
      %88 = vector.shape_cast %87 : vector<1x128x128xf32> to vector<128x128xf32>
      %89 = vector.shape_cast %86 : vector<128x128xf32> to vector<1x128x128xf32>
      tpu.vector_store %arg17[%c0_62, %c0_63, %c0_64], %89 {strides = array<i32>} : memref<1x128x128xf32, #tpu.memory_space<vmem>>, vector<1x128x128xf32>,
    } else {
    }
    return
  }
  func.func @transform_0(%arg0: i32, %arg1: i32) -> (i32, i32, i32) {
    %c0_i32 = arith.constant 0 : i32
    %c0_i32_0 = arith.constant 0 : i32
    return %arg0, %arg1, %c0_i32 : i32, i32, i32
  }
  func.func @transform_1(%arg0: i32, %arg1: i32) -> (i32, i32) {
    %c0_i32 = arith.constant 0 : i32
    %c0_i32_0 = arith.constant 0 : i32
    return %arg1, %c0_i32 : i32, i32
  }
  func.func @transform_2(%arg0: i32, %arg1: i32) -> (i32, i32) {
    %c0_i32 = arith.constant 0 : i32
    %c0_i32_0 = arith.constant 0 : i32
    %c0_i32_1 = arith.constant 0 : i32
    return %c0_i32, %c0_i32_0 : i32, i32
  }
  func.func @transform_3(%arg0: i32, %arg1: i32) -> (i32, i32) {
    %c0_i32 = arith.constant 0 : i32
    %c0_i32_0 = arith.constant 0 : i32
    %c0_i32_1 = arith.constant 0 : i32
    return %c0_i32, %c0_i32_0 : i32, i32
  }
  func.func @transform_4(%arg0: i32, %arg1: i32) -> (i32, i32) {
    %c0_i32 = arith.constant 0 : i32
    %c0_i32_0 = arith.constant 0 : i32
    %c0_i32_1 = arith.constant 0 : i32
    return %c0_i32, %c0_i32_0 : i32, i32
  }
  func.func @transform_5(%arg0: i32, %arg1: i32) -> (i32, i32) {
    %c0_i32 = arith.constant 0 : i32
    %c0_i32_0 = arith.constant 0 : i32
    %c0_i32_1 = arith.constant 0 : i32
    return %c0_i32, %c0_i32_0 : i32, i32
  }
  func.func @transform_6(%arg0: i32, %arg1: i32) -> (i32, i32) {
    %c0_i32 = arith.constant 0 : i32
    %c0_i32_0 = arith.constant 0 : i32
    %c0_i32_1 = arith.constant 0 : i32
    return %c0_i32, %c0_i32_0 : i32, i32
  }
  func.func @transform_7(%arg0: i32, %arg1: i32) -> (i32, i32) {
    %c0_i32 = arith.constant 0 : i32
    %c0_i32_0 = arith.constant 0 : i32
    %c0_i32_1 = arith.constant 0 : i32
    return %c0_i32, %c0_i32_0 : i32, i32
  }
  func.func @transform_8(%arg0: i32, %arg1: i32) -> (i32, i32) {
    %c0_i32 = arith.constant 0 : i32
    %c0_i32_0 = arith.constant 0 : i32
    %c0_i32_1 = arith.constant 0 : i32
    return %c0_i32, %c0_i32_0 : i32, i32
  }
  func.func @transform_9(%arg0: i32, %arg1: i32) -> (i32, i32) {
    %c0_i32 = arith.constant 0 : i32
    %c0_i32_0 = arith.constant 0 : i32
    %c0_i32_1 = arith.constant 0 : i32
    return %c0_i32, %c0_i32_0 : i32, i32
  }
  func.func @transform_10(%arg0: i32, %arg1: i32) -> (i32, i32) {
    %c0_i32 = arith.constant 0 : i32
    %c0_i32_0 = arith.constant 0 : i32
    %c0_i32_1 = arith.constant 0 : i32
    return %c0_i32, %c0_i32_0 : i32, i32
  }
  func.func @transform_11(%arg0: i32, %arg1: i32) -> (i32, i32) {
    %c0_i32 = arith.constant 0 : i32
    %c0_i32_0 = arith.constant 0 : i32
    %c0_i32_1 = arith.constant 0 : i32
    return %c0_i32, %c0_i32_0 : i32, i32
  }
  func.func @transform_12(%arg0: i32, %arg1: i32) -> (i32, i32) {
    %c0_i32 = arith.constant 0 : i32
    %c0_i32_0 = arith.constant 0 : i32
    %c0_i32_1 = arith.constant 0 : i32
    return %c0_i32, %c0_i32_0 : i32, i32
  }
  func.func @transform_13(%arg0: i32, %arg1: i32) -> (i32, i32) {
    %c0_i32 = arith.constant 0 : i32
    %c0_i32_0 = arith.constant 0 : i32
    %c0_i32_1 = arith.constant 0 : i32
    return %c0_i32, %c0_i32_0 : i32, i32
  }
  func.func @transform_14(%arg0: i32, %arg1: i32) -> (i32, i32, i32) {
    %c0_i32 = arith.constant 0 : i32
    %c0_i32_0 = arith.constant 0 : i32
    %c0_i32_1 = arith.constant 0 : i32
    return %arg0, %c0_i32, %c0_i32_0 : i32, i32, i32
  }
  func.func @transform_15(%arg0: i32, %arg1: i32) -> (i32, i32, i32) {
    %c0_i32 = arith.constant 0 : i32
    %c0_i32_0 = arith.constant 0 : i32
    %c0_i32_1 = arith.constant 0 : i32
    return %arg0, %c0_i32, %c0_i32_0 : i32, i32, i32
  }
}

module attributes {stable_mosaic.version = 11 : i64} {
  func.func @_lemodel_fused_kernel(%arg0: i32, %arg1: i32, %arg2: memref<1x128x4xbf16, #tpu.memory_space<vmem>>, %arg3: memref<128x32xbf16, #tpu.memory_space<vmem>>, %arg4: memref<4x32xbf16, #tpu.memory_space<vmem>>, %arg5: memref<1x32xf32, #tpu.memory_space<vmem>>, %arg6: memref<128x32xbf16, #tpu.memory_space<vmem>>, %arg7: memref<32x32xbf16, #tpu.memory_space<vmem>>, %arg8: memref<32x32xbf16, #tpu.memory_space<vmem>>, %arg9: memref<32x32xbf16, #tpu.memory_space<vmem>>, %arg10: memref<128x32xf32, #tpu.memory_space<vmem>>, %arg11: memref<1x128xf32, #tpu.memory_space<vmem>>, %arg12: memref<32x32xbf16, #tpu.memory_space<vmem>>, %arg13: memref<1x32xf32, #tpu.memory_space<vmem>>, %arg14: memref<32x128xbf16, #tpu.memory_space<vmem>>, %arg15: memref<1x128xf32, #tpu.memory_space<vmem>>, %arg16: memref<1x1x128xf32, #tpu.memory_space<vmem>>, %arg17: memref<1x128x128xf32, #tpu.memory_space<vmem>>, %arg18: memref<128x1xf32, #tpu.memory_space<vmem>>, %arg19: memref<128x1xf32, #tpu.memory_space<vmem>>, %arg20: memref<128x32xf32, #tpu.memory_space<vmem>>) attributes {dimension_semantics = [#tpu.dimension_semantics<parallel>, #tpu.dimension_semantics<arbitrary>], iteration_bounds = array<i64: 2, 2>, scalar_prefetch = 0 : i64, scratch_operands = 3 : i64, tpu.core_type = #tpu.core_type<tc>, window_params = [{transform_indices = @transform_0, window_bounds = array<i64: 1, 128, 4>}, {transform_indices = @transform_1, window_bounds = array<i64: 128, 32>}, {pipeline_mode = #tpu.pipeline_mode<synchronous>, transform_indices = @transform_2, window_bounds = array<i64: 4, 32>}, {pipeline_mode = #tpu.pipeline_mode<synchronous>, transform_indices = @transform_3, window_bounds = array<i64: 1, 32>}, {pipeline_mode = #tpu.pipeline_mode<synchronous>, transform_indices = @transform_4, window_bounds = array<i64: 128, 32>}, {pipeline_mode = #tpu.pipeline_mode<synchronous>, transform_indices = @transform_5, window_bounds = array<i64: 32, 32>}, {pipeline_mode = #tpu.pipeline_mode<synchronous>, transform_indices = @transform_6, window_bounds = array<i64: 32, 32>}, {pipeline_mode = #tpu.pipeline_mode<synchronous>, transform_indices = @transform_7, window_bounds = array<i64: 32, 32>}, {pipeline_mode = #tpu.pipeline_mode<synchronous>, transform_indices = @transform_8, window_bounds = array<i64: 128, 32>}, {pipeline_mode = #tpu.pipeline_mode<synchronous>, transform_indices = @transform_9, window_bounds = array<i64: 1, 128>}, {pipeline_mode = #tpu.pipeline_mode<synchronous>, transform_indices = @transform_10, window_bounds = array<i64: 32, 32>}, {pipeline_mode = #tpu.pipeline_mode<synchronous>, transform_indices = @transform_11, window_bounds = array<i64: 1, 32>}, {pipeline_mode = #tpu.pipeline_mode<synchronous>, transform_indices = @transform_12, window_bounds = array<i64: 32, 128>}, {pipeline_mode = #tpu.pipeline_mode<synchronous>, transform_indices = @transform_13, window_bounds = array<i64: 1, 128>}, {transform_indices = @transform_14, window_bounds = array<i64: 1, 1, 128>}, {transform_indices = @transform_15, window_bounds = array<i64: 1, 128, 128>}]} {
    %c0_i32 = arith.constant 0 : i32
    %0 = arith.cmpi eq, %arg1, %c0_i32 : i32
    %1 = arith.extui %0 : i1 to i32
    %c0_i32_0 = arith.constant 0 : i32
    %2 = arith.cmpi ne, %1, %c0_i32_0 : i32
    scf.if %2 {
      %cst_34 = arith.constant 0xFF800000 : f32
      %48 = vector.broadcast %cst_34 : f32 to vector<128x1xf32>
      %c0_35 = arith.constant 0 : index
      %c0_36 = arith.constant 0 : index
      %49 = vector.load %arg18[%c0_35, %c0_36] : memref<128x1xf32, #tpu.memory_space<vmem>>, vector<128x1xf32>
      tpu.vector_store %arg18[%c0_35, %c0_36], %48 {strides = array<i32>} : memref<128x1xf32, #tpu.memory_space<vmem>>, vector<128x1xf32>,
      %cst_37 = arith.constant 0.000000e+00 : f32
      %50 = vector.broadcast %cst_37 : f32 to vector<128x1xf32>
      %c0_38 = arith.constant 0 : index
      %c0_39 = arith.constant 0 : index
      %51 = vector.load %arg19[%c0_38, %c0_39] : memref<128x1xf32, #tpu.memory_space<vmem>>, vector<128x1xf32>
      tpu.vector_store %arg19[%c0_38, %c0_39], %50 {strides = array<i32>} : memref<128x1xf32, #tpu.memory_space<vmem>>, vector<128x1xf32>,
      %cst_40 = arith.constant 0.000000e+00 : f32
      %52 = vector.broadcast %cst_40 : f32 to vector<128x32xf32>
      %c0_41 = arith.constant 0 : index
      %c0_42 = arith.constant 0 : index
      %53 = vector.load %arg20[%c0_41, %c0_42] : memref<128x32xf32, #tpu.memory_space<vmem>>, vector<128x32xf32>
      tpu.vector_store %arg20[%c0_41, %c0_42], %52 {strides = array<i32>} : memref<128x32xf32, #tpu.memory_space<vmem>>, vector<128x32xf32>,
    } else {
    }
    %c0 = arith.constant 0 : index
    %c0_1 = arith.constant 0 : index
    %c0_2 = arith.constant 0 : index
    %3 = vector.load %arg2[%c0, %c0_1, %c0_2] : memref<1x128x4xbf16, #tpu.memory_space<vmem>>, vector<1x128x4xbf16>
    %4 = vector.shape_cast %3 : vector<1x128x4xbf16> to vector<128x4xbf16>
    %c0_3 = arith.constant 0 : index
    %c0_4 = arith.constant 0 : index
    %5 = vector.load %arg4[%c0_3, %c0_4] : memref<4x32xbf16, #tpu.memory_space<vmem>>, vector<4x32xbf16>
    %cst = arith.constant dense<0.000000e+00> : vector<128x32xf32>
    %6 = tpu.matmul %4, %5, %cst {dimension_numbers = #tpu.dot_dimension_numbers<[1], [0], [0], [1], [0, 0, 1, 1], [], []>} : vector<128x4xbf16>, vector<4x32xbf16>, vector<128x32xf32> -> vector<128x32xf32>
    %c0_5 = arith.constant 0 : index
    %c0_6 = arith.constant 0 : index
    %7 = vector.load %arg5[%c0_5, %c0_6] : memref<1x32xf32, #tpu.memory_space<vmem>>, vector<1x32xf32>
    %8 = vector.broadcast %7 : vector<1x32xf32> to vector<128x32xf32>
    %9 = arith.addf %6, %8 : vector<128x32xf32>
    %c0_7 = arith.constant 0 : index
    %c0_8 = arith.constant 0 : index
    %10 = vector.load %arg3[%c0_7, %c0_8] : memref<128x32xbf16, #tpu.memory_space<vmem>>, vector<128x32xbf16>
    %11 = arith.extf %10 : vector<128x32xbf16> to vector<128x32xf32>
    %12 = arith.addf %9, %11 : vector<128x32xf32>
    %13 = arith.truncf %12 : vector<128x32xf32> to vector<128x32xbf16>
    %c0_9 = arith.constant 0 : index
    %c0_10 = arith.constant 0 : index
    %14 = vector.load %arg7[%c0_9, %c0_10] : memref<32x32xbf16, #tpu.memory_space<vmem>>, vector<32x32xbf16>
    %cst_11 = arith.constant dense<0.000000e+00> : vector<128x32xf32>
    %15 = tpu.matmul %13, %14, %cst_11 {dimension_numbers = #tpu.dot_dimension_numbers<[1], [0], [0], [1], [0, 0, 1, 1], [], []>} : vector<128x32xbf16>, vector<32x32xbf16>, vector<128x32xf32> -> vector<128x32xf32>
    %16 = arith.truncf %15 : vector<128x32xf32> to vector<128x32xbf16>
    %c0_12 = arith.constant 0 : index
    %c0_13 = arith.constant 0 : index
    %17 = vector.load %arg8[%c0_12, %c0_13] : memref<32x32xbf16, #tpu.memory_space<vmem>>, vector<32x32xbf16>
    %cst_14 = arith.constant dense<0.000000e+00> : vector<128x32xf32>
    %18 = tpu.matmul %13, %17, %cst_14 {dimension_numbers = #tpu.dot_dimension_numbers<[1], [0], [0], [1], [0, 0, 1, 1], [], []>} : vector<128x32xbf16>, vector<32x32xbf16>, vector<128x32xf32> -> vector<128x32xf32>
    %19 = arith.truncf %18 : vector<128x32xf32> to vector<128x32xbf16>
    %c0_15 = arith.constant 0 : index
    %c0_16 = arith.constant 0 : index
    %20 = vector.load %arg6[%c0_15, %c0_16] : memref<128x32xbf16, #tpu.memory_space<vmem>>, vector<128x32xbf16>
    %cst_17 = arith.constant dense<0.000000e+00> : vector<128x128xf32>
    %21 = tpu.matmul %20, %16, %cst_17 {dimension_numbers = #tpu.dot_dimension_numbers<[1], [1], [0], [0], [0, 0, 1, 0], [], []>} : vector<128x32xbf16>, vector<128x32xbf16>, vector<128x128xf32> -> vector<128x128xf32>
    %c0_18 = arith.constant 0 : index
    %c0_19 = arith.constant 0 : index
    %22 = vector.load %arg18[%c0_18, %c0_19] : memref<128x1xf32, #tpu.memory_space<vmem>>, vector<128x1xf32>
    %cst_20 = arith.constant dense<0xFF800000> : vector<128xf32>
    %23 = vector.multi_reduction <maximumf>, %21, %cst_20 [1] : vector<128x128xf32> to vector<128xf32>
    %24 = vector.shape_cast %23 : vector<128xf32> to vector<128x1xf32>
    %25 = arith.maximumf %22, %24 : vector<128x1xf32>
    %26 = arith.subf %22, %25 : vector<128x1xf32>
    %27 = math.exp %26 : vector<128x1xf32>
    %28 = vector.broadcast %25 : vector<128x1xf32> to vector<128x128xf32>
    %29 = arith.subf %21, %28 : vector<128x128xf32>
    %30 = math.exp %29 : vector<128x128xf32>
    %c0_21 = arith.constant 0 : index
    %c0_22 = arith.constant 0 : index
    %31 = vector.load %arg19[%c0_21, %c0_22] : memref<128x1xf32, #tpu.memory_space<vmem>>, vector<128x1xf32>
    %32 = arith.mulf %27, %31 : vector<128x1xf32>
    %cst_23 = arith.constant dense<0.000000e+00> : vector<128xf32>
    %33 = vector.multi_reduction <add>, %30, %cst_23 [1] : vector<128x128xf32> to vector<128xf32>
    %34 = vector.shape_cast %33 : vector<128xf32> to vector<128x1xf32>
    %35 = arith.addf %32, %34 : vector<128x1xf32>
    %c0_24 = arith.constant 0 : index
    %c0_25 = arith.constant 0 : index
    %36 = vector.load %arg19[%c0_24, %c0_25] : memref<128x1xf32, #tpu.memory_space<vmem>>, vector<128x1xf32>
    tpu.vector_store %arg19[%c0_24, %c0_25], %35 {strides = array<i32>} : memref<128x1xf32, #tpu.memory_space<vmem>>, vector<128x1xf32>,
    %c0_26 = arith.constant 0 : index
    %c0_27 = arith.constant 0 : index
    %37 = vector.load %arg20[%c0_26, %c0_27] : memref<128x32xf32, #tpu.memory_space<vmem>>, vector<128x32xf32>
    %38 = vector.broadcast %27 : vector<128x1xf32> to vector<128x32xf32>
    %39 = arith.mulf %38, %37 : vector<128x32xf32>
    %40 = arith.truncf %30 : vector<128x128xf32> to vector<128x128xbf16>
    %cst_28 = arith.constant dense<0.000000e+00> : vector<128x32xf32>
    %41 = tpu.matmul %40, %19, %cst_28 {dimension_numbers = #tpu.dot_dimension_numbers<[1], [0], [0], [1], [0, 0, 1, 1], [], []>} : vector<128x128xbf16>, vector<128x32xbf16>, vector<128x32xf32> -> vector<128x32xf32>
    %42 = arith.addf %39, %41 : vector<128x32xf32>
    %c0_29 = arith.constant 0 : index
    %c0_30 = arith.constant 0 : index
    %43 = vector.load %arg20[%c0_29, %c0_30] : memref<128x32xf32, #tpu.memory_space<vmem>>, vector<128x32xf32>
    tpu.vector_store %arg20[%c0_29, %c0_30], %42 {strides = array<i32>} : memref<128x32xf32, #tpu.memory_space<vmem>>, vector<128x32xf32>,
    %c0_31 = arith.constant 0 : index
    %c0_32 = arith.constant 0 : index
    %44 = vector.load %arg18[%c0_31, %c0_32] : memref<128x1xf32, #tpu.memory_space<vmem>>, vector<128x1xf32>
    tpu.vector_store %arg18[%c0_31, %c0_32], %25 {strides = array<i32>} : memref<128x1xf32, #tpu.memory_space<vmem>>, vector<128x1xf32>,
    %c1_i32 = arith.constant 1 : i32
    %45 = arith.cmpi eq, %arg1, %c1_i32 : i32
    %46 = arith.extui %45 : i1 to i32
    %c0_i32_33 = arith.constant 0 : i32
    %47 = arith.cmpi ne, %46, %c0_i32_33 : i32
    scf.if %47 {
      %c0_34 = arith.constant 0 : index
      %c0_35 = arith.constant 0 : index
      %48 = vector.load %arg19[%c0_34, %c0_35] : memref<128x1xf32, #tpu.memory_space<vmem>>, vector<128x1xf32>
      %49 = tpu.reciprocal %48 {approx = true} : vector<128x1xf32> -> vector<128x1xf32>
      %c0_36 = arith.constant 0 : index
      %c0_37 = arith.constant 0 : index
      %50 = vector.load %arg20[%c0_36, %c0_37] : memref<128x32xf32, #tpu.memory_space<vmem>>, vector<128x32xf32>
      %51 = vector.broadcast %49 : vector<128x1xf32> to vector<128x32xf32>
      %52 = arith.mulf %50, %51 : vector<128x32xf32>
      %53 = arith.truncf %52 : vector<128x32xf32> to vector<128x32xbf16>
      %c0_38 = arith.constant 0 : index
      %c0_39 = arith.constant 0 : index
      %54 = vector.load %arg9[%c0_38, %c0_39] : memref<32x32xbf16, #tpu.memory_space<vmem>>, vector<32x32xbf16>
      %cst_40 = arith.constant dense<0.000000e+00> : vector<128x32xf32>
      %55 = tpu.matmul %53, %54, %cst_40 {dimension_numbers = #tpu.dot_dimension_numbers<[1], [0], [0], [1], [0, 0, 1, 1], [], []>} : vector<128x32xbf16>, vector<32x32xbf16>, vector<128x32xf32> -> vector<128x32xf32>
      %c0_41 = arith.constant 0 : index
      %c0_42 = arith.constant 0 : index
      %56 = vector.load %arg10[%c0_41, %c0_42] : memref<128x32xf32, #tpu.memory_space<vmem>>, vector<128x32xf32>
      %57 = arith.mulf %56, %55 : vector<128x32xf32>
      %58 = vector.shape_cast %57 : vector<128x32xf32> to vector<1x128x32xf32>
      %cst_43 = arith.constant dense<0.000000e+00> : vector<1x128xf32>
      %59 = vector.multi_reduction <add>, %58, %cst_43 [2] : vector<1x128x32xf32> to vector<1x128xf32>
      %c0_44 = arith.constant 0 : index
      %c0_45 = arith.constant 0 : index
      %60 = vector.load %arg11[%c0_44, %c0_45] : memref<1x128xf32, #tpu.memory_space<vmem>>, vector<1x128xf32>
      %61 = arith.addf %59, %60 : vector<1x128xf32>
      %c0_46 = arith.constant 0 : index
      %c0_47 = arith.constant 0 : index
      %c0_48 = arith.constant 0 : index
      %62 = vector.load %arg16[%c0_46, %c0_47, %c0_48] : memref<1x1x128xf32, #tpu.memory_space<vmem>>, vector<1x1x128xf32>
      %63 = vector.shape_cast %62 : vector<1x1x128xf32> to vector<1x128xf32>
      %64 = vector.shape_cast %61 : vector<1x128xf32> to vector<1x1x128xf32>
      tpu.vector_store %arg16[%c0_46, %c0_47, %c0_48], %64 {strides = array<i32>} : memref<1x1x128xf32, #tpu.memory_space<vmem>>, vector<1x1x128xf32>,
      %65 = arith.truncf %55 : vector<128x32xf32> to vector<128x32xbf16>
      %c0_49 = arith.constant 0 : index
      %c0_50 = arith.constant 0 : index
      %66 = vector.load %arg12[%c0_49, %c0_50] : memref<32x32xbf16, #tpu.memory_space<vmem>>, vector<32x32xbf16>
      %cst_51 = arith.constant dense<0.000000e+00> : vector<128x32xf32>
      %67 = tpu.matmul %65, %66, %cst_51 {dimension_numbers = #tpu.dot_dimension_numbers<[1], [0], [0], [1], [0, 0, 1, 1], [], []>} : vector<128x32xbf16>, vector<32x32xbf16>, vector<128x32xf32> -> vector<128x32xf32>
      %c0_52 = arith.constant 0 : index
      %c0_53 = arith.constant 0 : index
      %68 = vector.load %arg13[%c0_52, %c0_53] : memref<1x32xf32, #tpu.memory_space<vmem>>, vector<1x32xf32>
      %69 = vector.broadcast %68 : vector<1x32xf32> to vector<128x32xf32>
      %70 = arith.addf %67, %69 : vector<128x32xf32>
      %cst_54 = arith.constant 0.000000e+00 : f32
      %71 = vector.broadcast %cst_54 : f32 to vector<128x32xf32>
      %72 = arith.maximumf %70, %71 : vector<128x32xf32>
      %73 = arith.truncf %72 : vector<128x32xf32> to vector<128x32xbf16>
      %c0_55 = arith.constant 0 : index
      %c0_56 = arith.constant 0 : index
      %74 = vector.load %arg14[%c0_55, %c0_56] : memref<32x128xbf16, #tpu.memory_space<vmem>>, vector<32x128xbf16>
      %cst_57 = arith.constant dense<0.000000e+00> : vector<128x128xf32>
      %75 = tpu.matmul %73, %74, %cst_57 {dimension_numbers = #tpu.dot_dimension_numbers<[1], [0], [0], [1], [0, 0, 1, 1], [], []>} : vector<128x32xbf16>, vector<32x128xbf16>, vector<128x128xf32> -> vector<128x128xf32>
      %c0_58 = arith.constant 0 : index
      %c0_59 = arith.constant 0 : index
      %76 = vector.load %arg15[%c0_58, %c0_59] : memref<1x128xf32, #tpu.memory_space<vmem>>, vector<1x128xf32>
      %77 = vector.broadcast %76 : vector<1x128xf32> to vector<128x128xf32>
      %78 = arith.addf %75, %77 : vector<128x128xf32>
      %79 = arith.mulf %78, %78 : vector<128x128xf32>
      %cst_60 = arith.constant dense<0.000000e+00> : vector<128xf32>
      %80 = vector.multi_reduction <add>, %79, %cst_60 [1] : vector<128x128xf32> to vector<128xf32>
      %81 = vector.shape_cast %80 : vector<128xf32> to vector<128x1xf32>
      %cst_61 = arith.constant 1.000000e-24 : f32
      %82 = vector.broadcast %cst_61 : f32 to vector<128x1xf32>
      %83 = arith.maximumf %81, %82 : vector<128x1xf32>
      %84 = math.rsqrt %83 : vector<128x1xf32>
      %85 = vector.broadcast %84 : vector<128x1xf32> to vector<128x128xf32>
      %86 = arith.mulf %78, %85 : vector<128x128xf32>
      %c0_62 = arith.constant 0 : index
      %c0_63 = arith.constant 0 : index
      %c0_64 = arith.constant 0 : index
      %87 = vector.load %arg17[%c0_62, %c0_63, %c0_64] : memref<1x128x128xf32, #tpu.memory_space<vmem>>, vector<1x128x128xf32>
      %88 = vector.shape_cast %87 : vector<1x128x128xf32> to vector<128x128xf32>
      %89 = vector.shape_cast %86 : vector<128x128xf32> to vector<1x128x128xf32>
      tpu.vector_store %arg17[%c0_62, %c0_63, %c0_64], %89 {strides = array<i32>} : memref<1x128x128xf32, #tpu.memory_space<vmem>>, vector<1x128x128xf32>,
    } else {
    }
    return
  }
  func.func @transform_0(%arg0: i32, %arg1: i32) -> (i32, i32, i32) {
    %c0_i32 = arith.constant 0 : i32
    %c0_i32_0 = arith.constant 0 : i32
    return %arg0, %arg1, %c0_i32 : i32, i32, i32
  }
  func.func @transform_1(%arg0: i32, %arg1: i32) -> (i32, i32) {
    %c0_i32 = arith.constant 0 : i32
    %c0_i32_0 = arith.constant 0 : i32
    return %arg1, %c0_i32 : i32, i32
  }
  func.func @transform_2(%arg0: i32, %arg1: i32) -> (i32, i32) {
    %c0_i32 = arith.constant 0 : i32
    %c0_i32_0 = arith.constant 0 : i32
    %c0_i32_1 = arith.constant 0 : i32
    return %c0_i32, %c0_i32_0 : i32, i32
  }
  func.func @transform_3(%arg0: i32, %arg1: i32) -> (i32, i32) {
    %c0_i32 = arith.constant 0 : i32
    %c0_i32_0 = arith.constant 0 : i32
    %c0_i32_1 = arith.constant 0 : i32
    return %c0_i32, %c0_i32_0 : i32, i32
  }
  func.func @transform_4(%arg0: i32, %arg1: i32) -> (i32, i32) {
    %c0_i32 = arith.constant 0 : i32
    %c0_i32_0 = arith.constant 0 : i32
    %c0_i32_1 = arith.constant 0 : i32
    return %c0_i32, %c0_i32_0 : i32, i32
  }
  func.func @transform_5(%arg0: i32, %arg1: i32) -> (i32, i32) {
    %c0_i32 = arith.constant 0 : i32
    %c0_i32_0 = arith.constant 0 : i32
    %c0_i32_1 = arith.constant 0 : i32
    return %c0_i32, %c0_i32_0 : i32, i32
  }
  func.func @transform_6(%arg0: i32, %arg1: i32) -> (i32, i32) {
    %c0_i32 = arith.constant 0 : i32
    %c0_i32_0 = arith.constant 0 : i32
    %c0_i32_1 = arith.constant 0 : i32
    return %c0_i32, %c0_i32_0 : i32, i32
  }
  func.func @transform_7(%arg0: i32, %arg1: i32) -> (i32, i32) {
    %c0_i32 = arith.constant 0 : i32
    %c0_i32_0 = arith.constant 0 : i32
    %c0_i32_1 = arith.constant 0 : i32
    return %c0_i32, %c0_i32_0 : i32, i32
  }
  func.func @transform_8(%arg0: i32, %arg1: i32) -> (i32, i32) {
    %c0_i32 = arith.constant 0 : i32
    %c0_i32_0 = arith.constant 0 : i32
    %c0_i32_1 = arith.constant 0 : i32
    return %c0_i32, %c0_i32_0 : i32, i32
  }
  func.func @transform_9(%arg0: i32, %arg1: i32) -> (i32, i32) {
    %c0_i32 = arith.constant 0 : i32
    %c0_i32_0 = arith.constant 0 : i32
    %c0_i32_1 = arith.constant 0 : i32
    return %c0_i32, %c0_i32_0 : i32, i32
  }
  func.func @transform_10(%arg0: i32, %arg1: i32) -> (i32, i32) {
    %c0_i32 = arith.constant 0 : i32
    %c0_i32_0 = arith.constant 0 : i32
    %c0_i32_1 = arith.constant 0 : i32
    return %c0_i32, %c0_i32_0 : i32, i32
  }
  func.func @transform_11(%arg0: i32, %arg1: i32) -> (i32, i32) {
    %c0_i32 = arith.constant 0 : i32
    %c0_i32_0 = arith.constant 0 : i32
    %c0_i32_1 = arith.constant 0 : i32
    return %c0_i32, %c0_i32_0 : i32, i32
  }
  func.func @transform_12(%arg0: i32, %arg1: i32) -> (i32, i32) {
    %c0_i32 = arith.constant 0 : i32
    %c0_i32_0 = arith.constant 0 : i32
    %c0_i32_1 = arith.constant 0 : i32
    return %c0_i32, %c0_i32_0 : i32, i32
  }
  func.func @transform_13(%arg0: i32, %arg1: i32) -> (i32, i32) {
    %c0_i32 = arith.constant 0 : i32
    %c0_i32_0 = arith.constant 0 : i32
    %c0_i32_1 = arith.constant 0 : i32
    return %c0_i32, %c0_i32_0 : i32, i32
  }
  func.func @transform_14(%arg0: i32, %arg1: i32) -> (i32, i32, i32) {
    %c0_i32 = arith.constant 0 : i32
    %c0_i32_0 = arith.constant 0 : i32
    %c0_i32_1 = arith.constant 0 : i32
    return %arg0, %c0_i32, %c0_i32_0 : i32, i32, i32
  }
  func.func @transform_15(%arg0: i32, %arg1: i32) -> (i32, i32, i32) {
    %c0_i32 = arith.constant 0 : i32
    %c0_i32_0 = arith.constant 0 : i32
    %c0_i32_1 = arith.constant 0 : i32
    return %arg0, %c0_i32, %c0_i32_0 : i32, i32, i32
  }
}

</mosaic_0001>

<bundles_post_ra>
// kernel: le_model_forward.1
= control target key start
LH: loop header
LB: loop body
LE: loop exit
PB: predicated region body
PF: predicated region fallthrough
CT: control target
= control target key end

     0   :  { %s4907_s0 = inlined_call_operand.vmem [shape: bf16[2,256,4], index: 0, kind: input, shape index: {}]   ;;  %s4908_s1 = inlined_call_operand.vmem [shape: bf16[256,32], index: 1, kind: input, shape index: {}]   ;;  %s4909_s2 = inlined_call_operand.vmem [shape: bf16[4,32], index: 2, kind: input, shape index: {}]   ;;  %s4910_s3 = inlined_call_operand.vmem [shape: f32[1,32], index: 3, kind: input, shape index: {}]   ;;  %s4911_s4 = inlined_call_operand.vmem [shape: bf16[128,32], index: 4, kind: input, shape index: {}]   ;;  %s4912_s5 = inlined_call_operand.vmem [shape: bf16[32,32], index: 5, kind: input, shape index: {}]   ;;  %s4913_s6 = inlined_call_operand.vmem [shape: bf16[32,32], index: 6, kind: input, shape index: {}]   ;;  %s4914_s7 = inlined_call_operand.vmem [shape: bf16[32,32], index: 7, kind: input, shape index: {}]   ;;  %s4915_s8 = inlined_call_operand.vmem [shape: f32[128,32], index: 8, kind: input, shape index: {}]   ;;  %s4916_s9 = inlined_call_operand.vmem [shape: f32[1,128], index: 9, kind: input, shape index: {}]   ;;  %s4917_s10 = inlined_call_operand.vmem [shape: bf16[32,32], index: 10, kind: input, shape index: {}]   ;;  %s4918_s11 = inlined_call_operand.vmem [shape: f32[1,32], index: 11, kind: input, shape index: {}]   ;;  %s4919_s12 = inlined_call_operand.vmem [shape: bf16[32,128], index: 12, kind: input, shape index: {}]   ;;  %s4920_s13 = inlined_call_operand.vmem [shape: f32[1,128], index: 13, kind: input, shape index: {}]   ;;  %s4921_s14 = inlined_call_operand.hbm [shape: f32[2,1,128], index: 14, kind: output, shape index: {0}]   ;;  %s4922_s15 = inlined_call_operand.vmem [shape: f32[2,128,128], index: 15, kind: output, shape index: {1}]  }
   0x1   :  { %4936 = sst [smem:[#allocation19_spill]] %s4918_s11 }
   0x2   :  { %4937 = sst [smem:[#allocation20_spill]] %s4919_s12 }
   0x3   :  { %4938 = sst [smem:[#allocation21_spill]] %s4920_s13 }
   0x4   :  { %4939 = sst [smem:[#allocation22_spill]] %s4921_s14 }
   0x5   :  { %21 = vsyncpa [#allocation6], 0 }
   0x6   :  { %23 = vsyncpa [#allocation6 + $0x1], 0  ;;  %s3980_s18 = smov 0   ;;  %s3982_s19 = smov 0  }
   0x7   :  { %s3984_s20 = smov 0   ;;  %s3986_s21 = smov 0  }
   0x8   :  { %s3988_s22 = smov 0   ;;  %s3990_s23 = smov 0  }
   0x9   :  { %s3992_s24 = smov 0   ;;  %s3994_s25 = smov 0  }
   0xa LB: > { %4940 = sst [smem:[#allocation8_spill]] %s3865_s18  ;;  %s3139_s26 = sadd.s32 4294967295, %s3893_s25   ;;  %s3893_s25 = sphi %s3994_s25, %s29_s25   ;;  %s3889_s24 = sphi %s3992_s24, %s4969_s24   ;;  %s3885_s23 = sphi %s3990_s23, %s4968_s23   ;;  %s3881_s22 = sphi %s3988_s22, %s4967_s22   ;;  %s3877_s21 = sphi %s3986_s21, %s4966_s21   ;;  %s3873_s20 = sphi %s3984_s20, %s4965_s20   ;;  %s3869_s19 = sphi %s3982_s19, %s4971_s19   ;;  %s3865_s18 = sphi %s3980_s18, %s4970_s18  }
   0xb   : > { %4941 = sst [smem:[#allocation9_spill]] %s3873_s20  ;;  %s3140_s27 = sadd.s32 4294967294, %s3893_s25  }
   0xc   : > { %4942 = sst [smem:[#allocation10_spill]] %s3881_s22  ;;  %s38_s28 = sadd.s32 1, %s3885_s23 }
   0xd   : > { %4943 = sst [smem:[#allocation11_spill]] %s3885_s23  ;;  %p39_p0 = scmp.ge.s32.totalorder %s38_s28, 2 }
   0xe   : > { %4944 = sst [smem:[#allocation12_spill]] %s3889_s24  ;;  %s41_s29 = sadd.s32 1, %s3889_s24 }
   0xf   : > { %4945 = sst [smem:[#allocation13_spill]] %s3893_s25  ;;  %p364_p1 = scmp.ne.s32.totalorder %s3873_s20, %s3869_s19 }
  0x10   : > { %p365_p2 = scmp.eq.s32.totalorder %s3139_s26, 3  ;;  %s4973_s28 = smov (%p39_p0, %s38_s28), 0 }
  0x11   : > { %4946 = sst [smem:[#allocation14_spill]] %s4973_s28  ;;  %s4975_s29 = smov (!%p39_p0, %s41_s29), %s3889_s24 }
  0x12   : > { %p4029_p3 = por %p365_p2, %p364_p1  ;;  %p370_p4 = scmp.ne.s32.totalorder %s3869_s19, %s3865_s18 }
  0x13   : > { %p43_p5 = scmp.ge.s32.totalorder %s4975_s29, 2  ;;  %p371_p6 = scmp.eq.s32.totalorder %s3140_s27, 3 }
  0x14   : > { %s4947_s30 = scalar_select %p4029_p3, 1, 0 }
  0x15   : > { %p3143_p7 = scmp.ge.s32.totalorder %s3893_s25, 1  ;;  %p473_p8 = scmp.lt.s32.totalorder %s3893_s25, 5 }
  0x16   : > { %4948 = sst [smem:[#allocation15_spill]] %s4947_s30  ;;  %s4977_s29 = smov (%p43_p5, %s4975_s29), 0 }
  0x17   : > { %4949 = sst [smem:[#allocation16_spill]] %s4977_s29  ;;  %p4039_p9 = por %p371_p6, %p370_p4 }
  0x18   : > { %p474_p10 = pnand %p3143_p7, %p473_p8  ;;  %s351_s17 = ssub.s32 %s3889_s24, %s4977_s29 }
  0x19   : > { %s4950_s16 = scalar_select %p4039_p9, 1, 0 }
  0x1a   : > { %s354_s26 = sadd.s32 1, %s3873_s20  ;;  %p352_p11 = scmp.eq.s32.totalorder %s351_s17, 0 }
  0x1b   : > { %4951 = sst [smem:[#allocation17_spill]] %s4950_s16  ;;  %477 = sbr.rel (%p474_p10) target bundleno = 2256 (0x8d0), region = 76 }
  0x1c   : > { %s4047_s28 = scalar_select %p352_p11, %s3873_s20, %s354_s26  }
  0x1d   : > { %s3144_s23 = sshll.u32 (!%p474_p10), %s3877_s21, 4  ;;  %p535_p12 = scmp.lt.s32.totalorder (!%p474_p10), %s3881_s22, 1 }
  0x1e   : > { %4952 = sst [smem:[#allocation18_spill]] %s4047_s28  ;;  %p537_p13 = scmp.lt.s32.totalorder (!%p474_p10), %s3144_s23, 31 }
  0x1f   : > { %s4953_s12 = sand.u32 (!%p474_p10), 1, %s3869_s19   ;;  %p3151_p0 = scmp.ne.s32.totalorder (!%p474_p10), %s3877_s21, 0 }
  0x20   : > { %s536_s18 = scalar_select %p535_p12, %s3881_s22, 1 }
  0x21   : > { %s4979_s23 = smov (!%p537_p13, %s3144_s23), 31 }
  0x22   : > { %s3145_s25 = sshll.u32 %s536_s18, 5  ;;  %s3242_s16 = sshll.u32 %s536_s18, 7 }
  0x23   : > { %s540_s14 = sadd.s32 %s3145_s25, %s4979_s23  ;;  %s3148_s29 = sshll.u32 %s4979_s23, 2 }
  0x24   : > { %s3146_s24 = sshll.u32 %s540_s14, 2  ;;  %s4056_s28 = scalar_lea.vmem %s4908_s1, %s3148_s29 }
  0x25   : > { %s4061_s13 = scalar_lea.vmem %s4907_s0, %s3146_s24  ;;  %s4066_s22 = scalar_lea.vmem %s4922_s15, %s3242_s16 }
  0x26   : > { %s4070_s18 = scalar_lea.vmem [#allocation5], %s4953_s12  ;;  %559 = sbr.rel (%p3151_p0) target bundleno = 68 (0x44), region = 80 }
  0x2b   : > { %vm560_vm0 = vcmask 7168   ;;  %vm593_vm1 = vcmask 261120   ;;  %v3895_v0 = vmov -inf   ;;  %v3896_v1 = vmov 0.0  }
  0x2c   : > { %561 = vst.msk [vmem:[#allocation2] sm:$0xff] %vm560_vm0, %v3895_v0  ;;  %562 = vst.msk [vmem:[#allocation2 + $0x8] sm:$0xff] %vm560_vm0, %v3895_v0 }
  0x2d   : > { %563 = vst.msk [vmem:[#allocation2 + $0x10] sm:$0xff] %vm560_vm0, %v3895_v0  ;;  %564 = vst.msk [vmem:[#allocation2 + $0x18] sm:$0xff] %vm560_vm0, %v3895_v0 }
  0x2e   : > { %565 = vst.msk [vmem:[#allocation2 + $0x20] sm:$0xff] %vm560_vm0, %v3895_v0  ;;  %566 = vst.msk [vmem:[#allocation2 + $0x28] sm:$0xff] %vm560_vm0, %v3895_v0 }
  0x2f   : > { %567 = vst.msk [vmem:[#allocation2 + $0x30] sm:$0xff] %vm560_vm0, %v3895_v0  ;;  %568 = vst.msk [vmem:[#allocation2 + $0x38] sm:$0xff] %vm560_vm0, %v3895_v0 }
  0x30   : > { %569 = vst.msk [vmem:[#allocation2 + $0x40] sm:$0xff] %vm560_vm0, %v3895_v0  ;;  %570 = vst.msk [vmem:[#allocation2 + $0x48] sm:$0xff] %vm560_vm0, %v3895_v0 }
  0x31   : > { %571 = vst.msk [vmem:[#allocation2 + $0x50] sm:$0xff] %vm560_vm0, %v3895_v0  ;;  %572 = vst.msk [vmem:[#allocation2 + $0x58] sm:$0xff] %vm560_vm0, %v3895_v0 }
  0x32   : > { %573 = vst.msk [vmem:[#allocation2 + $0x60] sm:$0xff] %vm560_vm0, %v3895_v0  ;;  %574 = vst.msk [vmem:[#allocation2 + $0x68] sm:$0xff] %vm560_vm0, %v3895_v0 }
  0x33   : > { %575 = vst.msk [vmem:[#allocation2 + $0x70] sm:$0xff] %vm560_vm0, %v3895_v0  ;;  %576 = vst.msk [vmem:[#allocation2 + $0x78] sm:$0xff] %vm560_vm0, %v3895_v0 }
  0x34   : > { %577 = vst.msk [vmem:[#allocation3] sm:$0xff] %vm560_vm0, %v3896_v1  ;;  %578 = vst.msk [vmem:[#allocation3 + $0x8] sm:$0xff] %vm560_vm0, %v3896_v1 }
  0x35   : > { %579 = vst.msk [vmem:[#allocation3 + $0x10] sm:$0xff] %vm560_vm0, %v3896_v1  ;;  %580 = vst.msk [vmem:[#allocation3 + $0x18] sm:$0xff] %vm560_vm0, %v3896_v1 }
  0x36   : > { %581 = vst.msk [vmem:[#allocation3 + $0x20] sm:$0xff] %vm560_vm0, %v3896_v1  ;;  %582 = vst.msk [vmem:[#allocation3 + $0x28] sm:$0xff] %vm560_vm0, %v3896_v1 }
  0x37   : > { %583 = vst.msk [vmem:[#allocation3 + $0x30] sm:$0xff] %vm560_vm0, %v3896_v1  ;;  %584 = vst.msk [vmem:[#allocation3 + $0x38] sm:$0xff] %vm560_vm0, %v3896_v1 }
  0x38   : > { %585 = vst.msk [vmem:[#allocation3 + $0x40] sm:$0xff] %vm560_vm0, %v3896_v1  ;;  %586 = vst.msk [vmem:[#allocation3 + $0x48] sm:$0xff] %vm560_vm0, %v3896_v1 }
  0x39   : > { %587 = vst.msk [vmem:[#allocation3 + $0x50] sm:$0xff] %vm560_vm0, %v3896_v1  ;;  %588 = vst.msk [vmem:[#allocation3 + $0x58] sm:$0xff] %vm560_vm0, %v3896_v1 }
  0x3a   : > { %589 = vst.msk [vmem:[#allocation3 + $0x60] sm:$0xff] %vm560_vm0, %v3896_v1  ;;  %590 = vst.msk [vmem:[#allocation3 + $0x68] sm:$0xff] %vm560_vm0, %v3896_v1 }
  0x3b   : > { %591 = vst.msk [vmem:[#allocation3 + $0x70] sm:$0xff] %vm560_vm0, %v3896_v1  ;;  %592 = vst.msk [vmem:[#allocation3 + $0x78] sm:$0xff] %vm560_vm0, %v3896_v1 }
  0x3c   : > { %594 = vst.msk [vmem:[#allocation4] sm:$0xff] %vm593_vm1, %v3896_v1  ;;  %595 = vst.msk [vmem:[#allocation4 + $0x8] sm:$0xff] %vm593_vm1, %v3896_v1 }
  0x3d   : > { %596 = vst.msk [vmem:[#allocation4 + $0x10] sm:$0xff] %vm593_vm1, %v3896_v1  ;;  %597 = vst.msk [vmem:[#allocation4 + $0x18] sm:$0xff] %vm593_vm1, %v3896_v1 }
  0x3e   : > { %598 = vst.msk [vmem:[#allocation4 + $0x20] sm:$0xff] %vm593_vm1, %v3896_v1  ;;  %599 = vst.msk [vmem:[#allocation4 + $0x28] sm:$0xff] %vm593_vm1, %v3896_v1 }
  0x3f   : > { %600 = vst.msk [vmem:[#allocation4 + $0x30] sm:$0xff] %vm593_vm1, %v3896_v1  ;;  %601 = vst.msk [vmem:[#allocation4 + $0x38] sm:$0xff] %vm593_vm1, %v3896_v1 }
  0x40   : > { %602 = vst.msk [vmem:[#allocation4 + $0x40] sm:$0xff] %vm593_vm1, %v3896_v1  ;;  %603 = vst.msk [vmem:[#allocation4 + $0x48] sm:$0xff] %vm593_vm1, %v3896_v1 }
  0x41   : > { %604 = vst.msk [vmem:[#allocation4 + $0x50] sm:$0xff] %vm593_vm1, %v3896_v1  ;;  %605 = vst.msk [vmem:[#allocation4 + $0x58] sm:$0xff] %vm593_vm1, %v3896_v1 }
  0x42   : > { %606 = vst.msk [vmem:[#allocation4 + $0x60] sm:$0xff] %vm593_vm1, %v3896_v1  ;;  %607 = vst.msk [vmem:[#allocation4 + $0x68] sm:$0xff] %vm593_vm1, %v3896_v1 }
  0x43   : > { %608 = vst.msk [vmem:[#allocation4 + $0x70] sm:$0xff] %vm593_vm1, %v3896_v1  ;;  %609 = vst.msk [vmem:[#allocation4 + $0x78] sm:$0xff] %vm593_vm1, %v3896_v1 }
  0x44 PF: > { %v626_v2 = vld [vmem:[%s4909_s2] sm:$0x3]  ;;  %vm699_vm2 = vcmask 1041408   ;;  %vm674_vm3 = vcmask 31744   ;;  %v3646_v5 = vld [vmem:[%s4061_s13 + $0x8] sm:$0xff]   ;;  %v3647_v6 = vld [vmem:[%s4061_s13 + $0x10] sm:$0xff]  }
  0x45   : > { %v3645_v3 = vld [vmem:[%s4061_s13] sm:$0xff]   ;;  %3559 = vmatprep.subr.msk.bf16.mxu0 %vm699_vm2, %v626_v2  ;;  %v701_v4 = vsel %vm699_vm2, %v626_v2, 0  ;;  %v3648_v7 = vld [vmem:[%s4061_s13 + $0x18] sm:$0xff]   ;;  %v3650_v9 = vld [vmem:[%s4061_s13 + $0x28] sm:$0xff]   ;;  %vm872_vm4 = vcmask 261120   ;;  %vm1644_vm5 = vcmask 7168  }
  0x46   : > { %3374 = vmatpush3.bf16.msra.mxu0 %v701_v4  ;;  %3375 = vmatprep.mubr.msk.bf16.mxu0 %vm674_vm3, %v3645_v3  ;;  %v3649_v8 = vld [vmem:[%s4061_s13 + $0x20] sm:$0xff]   ;;  %v3651_v10 = vld [vmem:[%s4061_s13 + $0x30] sm:$0xff]   ;;  %v3652_v11 = vld [vmem:[%s4061_s13 + $0x38] sm:$0xff]   ;;  %p3205_p1 = scmp.ne.s32.totalorder %s3877_s21, 1 }
  0x47   : > { %v3653_v12 = vld [vmem:[%s4912_s5 + $0x8] sm:$0xff]   ;;  %v3655_v14 = vld [vmem:[%s4912_s5] sm:$0xff]   ;;  %v3276_v37 = vld [vmem:[%s4056_s28 + $0x10] sm:$0xff]   ;;  %s4954_s30 = sld [smem:[#allocation20_spill]] (!%p3205_p1) }
  0x48   : > { %v3654_v13 = vld [vmem:[%s4913_s6 + $0x8] sm:$0xff]   ;;  %3391 = vmatprep.subr.bf16.mxu1 %v3653_v12  ;;  %v3656_v15 = vld [vmem:[%s4913_s6] sm:$0xff]   ;;  %v3277_v38 = vld [vmem:[%s4056_s28 + $0x18] sm:$0xff]   ;;  %v3253_v44 = vunpack.c.l.bf16 %v3276_v37  ;;  %v3254_v46 = vunpack.c.h.bf16 %v3276_v37  ;;  %s4955_s17 = sld [smem:[#allocation19_spill]] (!%p3205_p1) }
  0x49   : > { %3376 = vmatmul.mubr.msk.bf16.vlgmr.msra.gmra.mxu0 %vm674_vm3, %v3646_v5  ;;  %3411 = vmatprep.subr.bf16.mxu0 %v3654_v13  ;;  %v3244_v18 = vld [vmem:[%s4056_s28] sm:$0xff]   ;;  %v3275_v20 = vld [vmem:[%s4056_s28 + $0x8] sm:$0xff]   ;;  %v3258_v42 = vunpack.c.h.bf16 %v3277_v38  ;;  %v3257_v48 = vunpack.c.l.bf16 %v3277_v38  ;;  %s4956_s12 = sld [smem:[#allocation21_spill]] (!%p3205_p1) }
  0x4a   : > { %3379 = vmatprep.mubr.msk.bf16.mxu0 %vm674_vm3, %v3647_v6  ;;  %3392 = vmatpush3.bf16.msra.mxu1 %v3653_v12  ;;  %v4156_v19 = vld [vmem:[%s4910_s3] ss:$0 sm:$0xff]  ;;  %v3250_v22 = vunpack.c.h.bf16 %v3275_v20  ;;  %v3245_v24 = vunpack.c.l.bf16 %v3244_v18  ;;  %v3246_v26 = vunpack.c.h.bf16 %v3244_v18  ;;  %v3249_v28 = vunpack.c.l.bf16 %v3275_v20  ;;  %v3279_v59 = vld [vmem:[%s4056_s28 + $0x28] sm:$0xff]  }
  0x4b   : > { %3412 = vmatpush3.bf16.msra.mxu0 %v3654_v13  ;;  %3393 = vmatprep.subr.bf16.mxu1 %v3655_v14  ;;  %v3278_v57 = vld [vmem:[%s4056_s28 + $0x20] sm:$0xff]   ;;  %v3266_v62 = vunpack.c.h.bf16 %v3279_v59  ;;  %v3265_v4 = vunpack.c.l.bf16 %v3279_v59  ;;  %v3280_v13 = vld [vmem:[%s4056_s28 + $0x30] sm:$0xff]  }
  0x4c   : > { %3413 = vmatprep.subr.bf16.mxu0 %v3656_v15  ;;  %v3261_v0 = vunpack.c.l.bf16 %v3278_v57  ;;  %v3262_v2 = vunpack.c.h.bf16 %v3278_v57 }
  0x4e   : > { %3394 = vmatpush3.bf16.msra.mxu1 %v3655_v14 }
  0x4f   : > { %3414 = vmatpush3.bf16.msra.mxu0 %v3656_v15  ;;  %v3281_v15 = vld [vmem:[%s4056_s28 + $0x38] sm:$0xff]  }
  0x50   : > { %v3274_v18 = vunpack.c.h.bf16 %v3281_v15 }
  0x51   : > { %3380 = vmatmul.mubr.msk.bf16.gmra.mxu0 %vm674_vm3, %v3648_v7 }
  0x52   : > { %3383 = vmatprep.mubr.msk.bf16.mxu0 %vm674_vm3, %v3649_v8 }
  0x59   : > { %3384 = vmatmul.mubr.msk.bf16.gmra.mxu0 %vm674_vm3, %v3650_v9 }
  0x5a   : > { %3387 = vmatprep.mubr.msk.bf16.mxu0 %vm674_vm3, %v3651_v10 }
  0x61   : > { %3388 = vmatmul.mubr.msk.bf16.gmra.mxu0 %vm674_vm3, %v3652_v11 }
 0x109   : > { %v3377_v16 = vpop.f32.mrf.mxu0 }
 0x10a   : > { %v746_v27 = vadd.f32 %v3377_v16, %v4156_v19 }
 0x10b   : > { %v737_v17 = vpop.f32.mrf.mxu0 }
 0x10c   : > { %v738_v23 = vadd.f32 %v4156_v19, %v737_v17  ;;  %v834_v35 = vadd.f32 %v3249_v28, %v746_v27 }
 0x10d   : > { %v3378_v21 = vpop.f32.mrf.mxu0 }
 0x10e   : > { %v749_v25 = vadd.f32 %v3378_v21, %v4156_v19  ;;  %v832_v33 = vadd.f32 %v3245_v24, %v738_v23  ;;  %v3269_v21 = vunpack.c.l.bf16 %v3280_v13  ;;  %v3270_v23 = vunpack.c.h.bf16 %v3280_v13 }
 0x10f   : > { %v740_v29 = vpop.f32.mrf.mxu0 }
 0x110   : > { %v741_v30 = vadd.f32 %v4156_v19, %v740_v29  ;;  %v835_v31 = vadd.f32 %v3250_v22, %v749_v25  ;;  %v3273_v25 = vunpack.c.l.bf16 %v3281_v15 }
 0x111   : > { %v3381_v32 = vpop.f32.mrf.mxu0 }
 0x112   : > { %v833_v34 = vadd.f32 %v3246_v26, %v741_v30  ;;  %v849_v40 = vpack.c.bf16 %v835_v31, %v834_v35  ;;  %v762_v47 = vadd.f32 %v3381_v32, %v4156_v19 }
 0x113   : > { %v753_v36 = vpop.f32.mrf.mxu0 }
 0x114   : > { %v848_v39 = vpack.c.bf16 %v833_v34, %v832_v33  ;;  %v754_v43 = vadd.f32 %v4156_v19, %v753_v36  ;;  %v838_v55 = vadd.f32 %v3257_v48, %v762_v47  ;;  %v3657_v34 = vld [vmem:[%s4911_s4] sm:$0xff]  }
 0x115   : > { %v3382_v41 = vpop.f32.mrf.mxu0 }
 0x116   : > { %v765_v45 = vadd.f32 %v3382_v41, %v4156_v19  ;;  %3395 = vmatprep.mubr.msk.bf16.mxu1 %vm872_vm4, %v848_v39  ;;  %3415 = vmatprep.mubr.msk.bf16.mxu0 %vm872_vm4, %v848_v39  ;;  %v836_v53 = vadd.f32 %v3253_v44, %v754_v43 }
 0x117   : > { %v756_v49 = vpop.f32.mrf.mxu0  ;;  %3396 = vmatmul.mubr.msk.bf16.vlgmr.msra.gmra.mxu1 %vm872_vm4, %v849_v40  ;;  %3416 = vmatmul.mubr.msk.bf16.vlgmr.msra.gmra.mxu0 %vm872_vm4, %v849_v40 }
 0x118   : > { %v757_v50 = vadd.f32 %v4156_v19, %v756_v49  ;;  %v839_v51 = vadd.f32 %v3258_v42, %v765_v45 }
 0x119   : > { %v3385_v52 = vpop.f32.mrf.mxu0 }
 0x11a   : > { %v837_v54 = vadd.f32 %v3254_v46, %v757_v50  ;;  %v851_v60 = vpack.c.bf16 %v839_v51, %v838_v55  ;;  %v778_v3 = vadd.f32 %v3385_v52, %v4156_v19 }
 0x11b   : > { %v769_v56 = vpop.f32.mrf.mxu0 }
 0x11c   : > { %v850_v58 = vpack.c.bf16 %v837_v54, %v836_v53  ;;  %v770_v63 = vadd.f32 %v4156_v19, %v769_v56  ;;  %v842_v11 = vadd.f32 %v3265_v4, %v778_v3 }
 0x11d   : > { %v3386_v61 = vpop.f32.mrf.mxu0 }
 0x11e   : > { %v781_v1 = vadd.f32 %v3386_v61, %v4156_v19  ;;  %3399 = vmatprep.mubr.msk.bf16.mxu1 %vm872_vm4, %v850_v58  ;;  %3419 = vmatprep.mubr.msk.bf16.mxu0 %vm872_vm4, %v850_v58  ;;  %v840_v9 = vadd.f32 %v3261_v0, %v770_v63 }
 0x11f   : > { %v772_v5 = vpop.f32.mrf.mxu0  ;;  %3400 = vmatmul.mubr.msk.bf16.gmra.mxu1 %vm872_vm4, %v851_v60  ;;  %3420 = vmatmul.mubr.msk.bf16.gmra.mxu0 %vm872_vm4, %v851_v60 }
 0x120   : > { %v773_v6 = vadd.f32 %v4156_v19, %v772_v5  ;;  %v843_v7 = vadd.f32 %v3266_v62, %v781_v1 }
 0x121   : > { %v3389_v8 = vpop.f32.mrf.mxu0 }
 0x122   : > { %v841_v10 = vadd.f32 %v3262_v2, %v773_v6  ;;  %v853_v16 = vpack.c.bf16 %v843_v7, %v842_v11  ;;  %v794_v24 = vadd.f32 %v3389_v8, %v4156_v19 }
 0x123   : > { %v785_v12 = vpop.f32.mrf.mxu0 }
 0x124   : > { %v852_v14 = vpack.c.bf16 %v841_v10, %v840_v9  ;;  %v786_v20 = vadd.f32 %v4156_v19, %v785_v12  ;;  %v846_v31 = vadd.f32 %v3273_v25, %v794_v24 }
 0x125   : > { %v3390_v17 = vpop.f32.mrf.mxu0 }
 0x126   : > { %v797_v22 = vadd.f32 %v3390_v17, %v4156_v19  ;;  %3403 = vmatprep.mubr.msk.bf16.mxu1 %vm872_vm4, %v852_v14  ;;  %3423 = vmatprep.mubr.msk.bf16.mxu0 %vm872_vm4, %v852_v14  ;;  %v844_v29 = vadd.f32 %v3269_v21, %v786_v20 }
 0x127   : > { %v788_v26 = vpop.f32.mrf.mxu0  ;;  %3404 = vmatmul.mubr.msk.bf16.gmra.mxu1 %vm872_vm4, %v853_v16  ;;  %3424 = vmatmul.mubr.msk.bf16.gmra.mxu0 %vm872_vm4, %v853_v16 }
 0x128   : > { %v789_v27 = vadd.f32 %v4156_v19, %v788_v26  ;;  %v847_v28 = vadd.f32 %v3274_v18, %v797_v22 }
 0x12a   : > { %v845_v30 = vadd.f32 %v3270_v23, %v789_v27  ;;  %v855_v33 = vpack.c.bf16 %v847_v28, %v846_v31  ;;  %v3658_v27 = vld [vmem:[%s4911_s4 + $0x8] sm:$0xff]   ;;  %v3659_v28 = vld [vmem:[%s4911_s4 + $0x10] sm:$0xff]  }
 0x12b   : > { %v3662_v31 = vld [vmem:[%s4911_s4 + $0x28] sm:$0xff]  }
 0x12c   : > { %v854_v32 = vpack.c.bf16 %v845_v30, %v844_v29  ;;  %v3660_v29 = vld [vmem:[%s4911_s4 + $0x18] sm:$0xff]   ;;  %v3661_v30 = vld [vmem:[%s4911_s4 + $0x20] sm:$0xff]  }
 0x12e   : > { %3407 = vmatprep.mubr.msk.bf16.mxu1 %vm872_vm4, %v854_v32  ;;  %3427 = vmatprep.mubr.msk.bf16.mxu0 %vm872_vm4, %v854_v32  ;;  %v3663_v32 = vld [vmem:[%s4911_s4 + $0x30] sm:$0xff]  }
 0x12f   : > { %3408 = vmatmul.mubr.msk.bf16.gmra.mxu1 %vm872_vm4, %v855_v33  ;;  %3428 = vmatmul.mubr.msk.bf16.gmra.mxu0 %vm872_vm4, %v855_v33  ;;  %v3664_v33 = vld [vmem:[%s4911_s4 + $0x38] sm:$0xff]  }
 0x130   : > { %3447 = vmatprep.mubr.msk.bf16.mxu1 %vm872_vm4, %v3657_v34 }
 0x1d7   : > { %v3397_v19 = vpop.f32.mrf.mxu1  ;;  %v4201_v35 = vpop.f32.mrf.mxu0 }
 0x1d9   : > { %v931_v36 = vpop.f32.mrf.mxu1  ;;  %v4203_v37 = vpop.f32.mrf.mxu0 }
 0x1db   : > { %v3398_v38 = vpop.f32.mrf.mxu1  ;;  %v3418_v39 = vpop.f32.mrf.mxu0 }
 0x1dc   : > { %v4205_v40 = vpack.c.bf16 %v3398_v38, %v3397_v19  ;;  %v1116_v17 = vpack.c.bf16 %v3418_v39, %v4201_v35 }
 0x1dd   : > { %v934_v41 = vpop.f32.mrf.mxu1  ;;  %v1055_v42 = vpop.f32.mrf.mxu0 }
 0x1de   : > { %v4207_v43 = vpack.c.bf16 %v934_v41, %v931_v36  ;;  %v1115_v18 = vpack.c.bf16 %v1055_v42, %v4203_v37  ;;  %v1207_v25 = vsel %vm872_vm4, %v4205_v40, 0 }
 0x1df   : > { %v3401_v44 = vpop.f32.mrf.mxu1  ;;  %v3421_v45 = vpop.f32.mrf.mxu0 }
 0x1e0   : > { %v1204_v26 = vsel %vm872_vm4, %v4207_v43, 0 }
 0x1e1   : > { %v4209_v46 = vpop.f32.mrf.mxu1  ;;  %v1068_v47 = vpop.f32.mrf.mxu0 }
 0x1e3   : > { %v3402_v48 = vpop.f32.mrf.mxu1  ;;  %v3422_v49 = vpop.f32.mrf.mxu0 }
 0x1e4   : > { %v1118_v13 = vpack.c.bf16 %v3422_v49, %v3421_v45  ;;  %v997_v20 = vpack.c.bf16 %v3402_v48, %v3401_v44 }
 0x1e5   : > { %v950_v50 = vpop.f32.mrf.mxu1  ;;  %v1071_v51 = vpop.f32.mrf.mxu0 }
 0x1e6   : > { %v1117_v14 = vpack.c.bf16 %v1071_v51, %v1068_v47  ;;  %v1213_v22 = vsel %vm872_vm4, %v997_v20, 0  ;;  %v996_v23 = vpack.c.bf16 %v950_v50, %v4209_v46  ;;  %v4310_v50 = vld [vmem:[#allocation2 + $0x10] sm:$0xff] }
 0x1e7   : > { %v3405_v52 = vpop.f32.mrf.mxu1  ;;  %v3425_v53 = vpop.f32.mrf.mxu0 }
 0x1e8   : > { %v1210_v24 = vsel %vm872_vm4, %v996_v23, 0 }
 0x1e9   : > { %v963_v54 = vpop.f32.mrf.mxu1  ;;  %v1084_v55 = vpop.f32.mrf.mxu0 }
 0x1eb   : > { %v3406_v56 = vpop.f32.mrf.mxu1  ;;  %v3426_v57 = vpop.f32.mrf.mxu0 }
 0x1ec   : > { %v1120_v9 = vpack.c.bf16 %v3426_v57, %v3425_v53  ;;  %v999_v10 = vpack.c.bf16 %v3406_v56, %v3405_v52  ;;  %v1324_v52 = vld [vmem:[#allocation2] sm:$0xff] }
 0x1ed   : > { %v966_v58 = vpop.f32.mrf.mxu1  ;;  %v1087_v59 = vpop.f32.mrf.mxu0 }
 0x1ee   : > { %v1119_v11 = vpack.c.bf16 %v1087_v59, %v1084_v55  ;;  %v1219_v15 = vsel %vm872_vm4, %v999_v10, 0  ;;  %v998_v16 = vpack.c.bf16 %v966_v58, %v963_v54  ;;  %v1327_v55 = vld [vmem:[#allocation2 + $0x18] sm:$0xff]  ;;  %v4318_v58 = vld [vmem:[#allocation2 + $0x8] sm:$0xff] }
 0x1ef   : > { %v3409_v60 = vpop.f32.mrf.mxu1  ;;  %v3429_v61 = vpop.f32.mrf.mxu0 }
 0x1f0   : > { %v1216_v21 = vsel %vm872_vm4, %v998_v16, 0 }
 0x1f1   : > { %v979_v62 = vpop.f32.mrf.mxu1  ;;  %v1100_v63 = vpop.f32.mrf.mxu0 }
 0x1f3   : > { %v3410_v0 = vpop.f32.mrf.mxu1  ;;  %v3430_v1 = vpop.f32.mrf.mxu0 }
 0x1f4   : > { %v1001_v2 = vpack.c.bf16 %v3410_v0, %v3409_v60  ;;  %v1122_v3 = vpack.c.bf16 %v3430_v1, %v3429_v61  ;;  %v1331_v0 = vld [vmem:[#allocation2 + $0x38] sm:$0xff] }
 0x1f5   : > { %v982_v4 = vpop.f32.mrf.mxu1  ;;  %v1103_v5 = vpop.f32.mrf.mxu0 }
 0x1f6   : > { %v1225_v6 = vsel %vm872_vm4, %v1001_v2, 0  ;;  %v1000_v7 = vpack.c.bf16 %v982_v4, %v979_v62  ;;  %v1121_v8 = vpack.c.bf16 %v1103_v5, %v1100_v63  ;;  %3560 = vmatprep.subr.msk.bf16.mxu1 %vm872_vm4, %v1001_v2  ;;  %3463 = vmatprep.subr.bf16.mxu0 %v1122_v3  ;;  %v4323_v62 = vld [vmem:[#allocation2 + $0x20] sm:$0xff] }
 0x1f7   : > { %3432 = vmatpush3.bf16.xpose.msra.mxu1 %v1225_v6  ;;  %3464 = vmatpush3.bf16.msra.mxu0 %v1122_v3  ;;  %v4329_v3 = vld [vmem:[#allocation2 + $0x30] sm:$0xff]  ;;  %v4333_v6 = vld [vmem:[#allocation2 + $0x28] sm:$0xff] }
 0x1f8   : > { %3561 = vmatprep.subr.msk.bf16.mxu1 %vm872_vm4, %v1000_v7  ;;  %3465 = vmatprep.subr.bf16.mxu0 %v1121_v8  ;;  %v1222_v12 = vsel %vm872_vm4, %v1000_v7, 0 }
 0x1fb   : > { %3466 = vmatpush3.bf16.msra.mxu0 %v1121_v8 }
 0x1fc   : > { %3467 = vmatprep.subr.bf16.mxu0 %v1120_v9 }
 0x1ff   : > { %3434 = vmatpush3.bf16.xpose.msra.mxu1 %v1222_v12  ;;  %3468 = vmatpush3.bf16.msra.mxu0 %v1120_v9  ;;  %v4339_v9 = vld [vmem:[#allocation2 + $0x40] sm:$0xff]  ;;  %v4345_v12 = vld [vmem:[#allocation2 + $0x58] sm:$0xff] }
 0x200   : > { %3562 = vmatprep.subr.msk.bf16.mxu1 %vm872_vm4, %v999_v10  ;;  %3469 = vmatprep.subr.bf16.mxu0 %v1119_v11 }
 0x203   : > { %3470 = vmatpush3.bf16.msra.mxu0 %v1119_v11 }
 0x204   : > { %3471 = vmatprep.subr.bf16.mxu0 %v1118_v13 }
 0x207   : > { %3436 = vmatpush3.bf16.xpose.msra.mxu1 %v1219_v15  ;;  %3472 = vmatpush3.bf16.msra.mxu0 %v1118_v13  ;;  %v4351_v15 = vld [vmem:[#allocation2 + $0x50] sm:$0xff] }
 0x208   : > { %3563 = vmatprep.subr.msk.bf16.mxu1 %vm872_vm4, %v998_v16  ;;  %3473 = vmatprep.subr.bf16.mxu0 %v1117_v14 }
 0x20b   : > { %3474 = vmatpush3.bf16.msra.mxu0 %v1117_v14 }
 0x20c   : > { %3475 = vmatprep.subr.bf16.mxu0 %v1116_v17 }
 0x20f   : > { %3438 = vmatpush3.bf16.xpose.msra.mxu1 %v1216_v21  ;;  %3476 = vmatpush3.bf16.msra.mxu0 %v1116_v17 }
 0x210   : > { %3564 = vmatprep.subr.msk.bf16.mxu1 %vm872_vm4, %v997_v20  ;;  %3477 = vmatprep.subr.bf16.mxu0 %v1115_v18  ;;  %v4357_v20 = vld [vmem:[#allocation2 + $0x48] sm:$0xff] }
 0x213   : > { %3478 = vmatpush3.bf16.msra.mxu0 %v1115_v18 }
 0x217   : > { %3440 = vmatpush3.bf16.xpose.msra.mxu1 %v1213_v22 }
 0x218   : > { %3565 = vmatprep.subr.msk.bf16.mxu1 %vm872_vm4, %v996_v23 }
 0x21f   : > { %3442 = vmatpush3.bf16.xpose.msra.mxu1 %v1210_v24  ;;  %v4363_v24 = vld [vmem:[#allocation2 + $0x60] sm:$0xff] }
 0x220   : > { %3566 = vmatprep.subr.msk.bf16.mxu1 %vm872_vm4, %v4205_v40  ;;  %v3897_v40 = vmov 0  }
 0x221   : > { %3644 = vset.pattern.permute.xlu1 %v3897_v40  ;;  %3643 = vset.pattern.permute.xlu0 %v3897_v40 }
 0x227   : > { %3444 = vmatpush3.bf16.xpose.msra.mxu1 %v1207_v25 }
 0x228   : > { %3567 = vmatprep.subr.msk.bf16.mxu1 %vm872_vm4, %v4207_v43 }
 0x22f   : > { %3446 = vmatpush3.bf16.xpose.msra.mxu1 %v1204_v26 }
 0x236   : > { %3448 = vmatmul.mubr.msk.bf16.vlgmr.msra.gmra.mxu1 %vm872_vm4, %v3658_v27 }
 0x237   : > { %3451 = vmatprep.mubr.msk.bf16.mxu1 %vm872_vm4, %v3659_v28  ;;  %v4368_v28 = vld [vmem:[#allocation2 + $0x78] sm:$0xff] }
 0x23e   : > { %3452 = vmatmul.mubr.msk.bf16.gmra.mxu1 %vm872_vm4, %v3660_v29 }
 0x23f   : > { %3455 = vmatprep.mubr.msk.bf16.mxu1 %vm872_vm4, %v3661_v30 }
 0x246   : > { %3456 = vmatmul.mubr.msk.bf16.gmra.mxu1 %vm872_vm4, %v3662_v31 }
 0x247   : > { %3459 = vmatprep.mubr.msk.bf16.mxu1 %vm872_vm4, %v3663_v32 }
 0x24e   : > { %3460 = vmatmul.mubr.msk.bf16.gmra.mxu1 %vm872_vm4, %v3664_v33  ;;  %v4375_v33 = vld [vmem:[#allocation2 + $0x70] sm:$0xff] }
 0x2f6   : > { %v4262_v34 = vpop.f32.mrf.mxu1 }
 0x2f7   : > { %1344 = vmax.xlane.f32.xlu1 %v4262_v34 }
 0x2f8   : > { %v4265_v19 = vpop.f32.mrf.mxu1 }
 0x2f9   : > { %1340 = vmax.xlane.f32.xlu0 %v4265_v19 }
 0x2fa   : > { %v4268_v35 = vpop.f32.mrf.mxu1 }
 0x2fb   : > { %1346 = vmax.xlane.f32.xlu1 %v4268_v35 }
 0x2fc   : > { %v4271_v36 = vpop.f32.mrf.mxu1 }
 0x2fd   : > { %1342 = vmax.xlane.f32.xlu0 %v4271_v36 }
 0x2fe   : > { %v4274_v37 = vpop.f32.mrf.mxu1 }
 0x300   : > { %v4276_v38 = vpop.f32.mrf.mxu1 }
 0x301   : > { %1348 = vmax.xlane.f32.xlu0 %v4276_v38 }
 0x302   : > { %v4279_v39 = vpop.f32.mrf.mxu1 }
 0x303   : > { %1354 = vmax.xlane.f32.xlu1 %v4279_v39 }
 0x304   : > { %v4282_v41 = vpop.f32.mrf.mxu1 }
 0x305   : > { %1352 = vmax.xlane.f32.xlu0 %v4274_v37 }
 0x306   : > { %v4285_v42 = vpop.f32.mrf.mxu1 }
 0x307   : > { %1350 = vmax.xlane.f32.xlu1 %v4282_v41 }
 0x308   : > { %v4288_v43 = vpop.f32.mrf.mxu1 }
 0x309   : > { %1356 = vmax.xlane.f32.xlu0 %v4288_v43 }
 0x30a   : > { %v4291_v44 = vpop.f32.mrf.mxu1 }
 0x30b   : > { %1362 = vmax.xlane.f32.xlu1 %v4291_v44 }
 0x30c   : > { %v4294_v45 = vpop.f32.mrf.mxu1 }
 0x30d   : > { %1360 = vmax.xlane.f32.xlu0 %v4285_v42 }
 0x30e   : > { %v4297_v46 = vpop.f32.mrf.mxu1 }
 0x30f   : > { %1358 = vmax.xlane.f32.xlu1 %v4294_v45 }
 0x310   : > { %v4300_v47 = vpop.f32.mrf.mxu1 }
 0x311   : > { %1364 = vmax.xlane.f32.xlu0 %v4300_v47 }
 0x312   : > { %v4303_v48 = vpop.f32.mrf.mxu1 }
 0x313   : > { %1370 = vmax.xlane.f32.xlu1 %v4303_v48 }
 0x314   : > { %v4307_v49 = vpop.f32.mrf.mxu1 }
 0x315   : > { %1368 = vmax.xlane.f32.xlu0 %v4297_v46 }
 0x317   : > { %1366 = vmax.xlane.f32.xlu1 %v4307_v49 }
 0x380   : > { %v1345_v51 = vpop.xlane.xlu1 %1344 }
 0x381   : > { %v4313_v53 = vmax.f32 %v4310_v50, %v1345_v51 }
 0x382   : > { %v1341_v54 = vpop.xlane.xlu0 %1340 }
 0x383   : > { %1912 = vst.msk [vmem:[#allocation2 + $0x10] sm:$0xff] %vm1644_vm5, %v4313_v53  ;;  %v1372_v56 = vmax.f32 %v1324_v52, %v1341_v54  ;;  %1448 = vperm.xlu1 %3644, %v4313_v53   ;;  %v1337_v54 = vld [vmem:[#allocation2 + $0x68] sm:$0xff] }
 0x384   : > { %v1347_v57 = vpop.xlane.xlu1 %1346 }
 0x385   : > { %1910 = vst.msk [vmem:[#allocation2] sm:$0xff] %vm1644_vm5, %v1372_v56  ;;  %v1375_v59 = vmax.f32 %v1327_v55, %v1347_v57  ;;  %1438 = vperm.xlu0 %3643, %v1372_v56   ;;  %v1388_v16 = vsub.f32 %v1324_v52, %v1372_v56 }
 0x386   : > { %v1343_v60 = vpop.xlane.xlu0 %1342 }
 0x387   : > { %1913 = vst.msk [vmem:[#allocation2 + $0x18] sm:$0xff] %vm1644_vm5, %v1375_v59  ;;  %v1373_v61 = vmax.f32 %v4318_v58, %v1343_v60  ;;  %1453 = vperm.xlu1 %3644, %v1375_v59   ;;  %v1391_v22 = vsub.f32 %v1327_v55, %v1375_v59  ;;  %v1404_v25 = vmul.f32 1.442695, %v1388_v16  ;;  %v1390_v55 = vsub.f32 %v4310_v50, %v4313_v53 }
 0x389   : > { %1911 = vst.msk [vmem:[#allocation2 + $0x8] sm:$0xff] %vm1644_vm5, %v1373_v61  ;;  %v1389_v29 = vsub.f32 %v4318_v58, %v1373_v61  ;;  %v1410_v31 = vmul.f32 1.442695, %v1391_v22  ;;  %3665 = vpow2.f32 %v1404_v25  ;;  %v1408_v53 = vmul.f32 1.442695, %v1390_v55 }
 0x38a   : > { %v1349_v63 = vpop.xlane.xlu0 %1348 }
 0x38b   : > { %v4327_v1 = vmax.f32 %v4323_v62, %v1349_v63  ;;  %1443 = vperm.xlu1 %3644, %v1373_v61   ;;  %v1406_v56 = vmul.f32 1.442695, %v1389_v29  ;;  %3667 = vpow2.f32 %v1410_v31 }
 0x38c   : > { %v1355_v2 = vpop.xlane.xlu1 %1354 }
 0x38d   : > { %1914 = vst.msk [vmem:[#allocation2 + $0x20] sm:$0xff] %vm1644_vm5, %v4327_v1  ;;  %v1379_v4 = vmax.f32 %v1331_v0, %v1355_v2  ;;  %3669 = vpow2.f32 %v1406_v56 }
 0x38e   : > { %v1353_v5 = vpop.xlane.xlu0 %1352 }
 0x38f   : > { %1917 = vst.msk [vmem:[#allocation2 + $0x38] sm:$0xff] %vm1644_vm5, %v1379_v4  ;;  %v4337_v7 = vmax.f32 %v4329_v3, %v1353_v5  ;;  %v1395_v40 = vsub.f32 %v1331_v0, %v1379_v4  ;;  %v1392_v0 = vsub.f32 %v4323_v62, %v4327_v1 }
 0x390   : > { %v1351_v8 = vpop.xlane.xlu1 %1350 }
 0x391   : > { %1916 = vst.msk [vmem:[#allocation2 + $0x30] sm:$0xff] %vm1644_vm5, %v4337_v7  ;;  %v1377_v10 = vmax.f32 %v4333_v6, %v1351_v8  ;;  %1468 = vperm.xlu1 %3644, %v4337_v7   ;;  %v1418_v60 = vmul.f32 1.442695, %v1395_v40  ;;  %v1412_v5 = vmul.f32 1.442695, %v1392_v0 }
 0x392   : > { %v1357_v11 = vpop.xlane.xlu0 %1356 }
 0x393   : > { %1915 = vst.msk [vmem:[#allocation2 + $0x28] sm:$0xff] %vm1644_vm5, %v1377_v10  ;;  %v4349_v13 = vmax.f32 %v4339_v9, %v1357_v11  ;;  %v1393_v61 = vsub.f32 %v4333_v6, %v1377_v10  ;;  %3671 = vpow2.f32 %v1418_v60  ;;  %v1394_v6 = vsub.f32 %v4329_v3, %v4337_v7 }
 0x394   : > { %v1363_v14 = vpop.xlane.xlu1 %1362  ;;  %3673 = vpow2.f32 %v1408_v53 }
 0x395   : > { %1918 = vst.msk [vmem:[#allocation2 + $0x40] sm:$0xff] %vm1644_vm5, %v4349_v13  ;;  %v1383_v17 = vmax.f32 %v4345_v12, %v1363_v14  ;;  %1458 = vperm.xlu1 %3644, %v4327_v1   ;;  %v1414_v2 = vmul.f32 1.442695, %v1393_v61  ;;  %v1396_v14 = vsub.f32 %v4339_v9, %v4349_v13 }
 0x396   : > { %v1361_v18 = vpop.xlane.xlu0 %1360  ;;  %v4407_v1 = vpop.eup %3665 }
 0x397   : > { %1921 = vst.msk [vmem:[#allocation2 + $0x58] sm:$0xff] %vm1644_vm5, %v1383_v17  ;;  %v4361_v21 = vmax.f32 %v4351_v15, %v1361_v18  ;;  %3675 = vpow2.f32 %v1414_v2 }
 0x398   : > { %v1359_v23 = vpop.xlane.xlu1 %1358  ;;  %3677 = vpow2.f32 %v1412_v5 }
 0x399   : > { %1920 = vst.msk [vmem:[#allocation2 + $0x50] sm:$0xff] %vm1644_vm5, %v4361_v21  ;;  %v1381_v26 = vmax.f32 %v4357_v20, %v1359_v23  ;;  %1463 = vperm.xlu1 %3644, %v1377_v10   ;;  %v1416_v10 = vmul.f32 1.442695, %v1394_v6  ;;  %v1398_v11 = vsub.f32 %v4351_v15, %v4361_v21 }
 0x39a   : > { %v1365_v27 = vpop.xlane.xlu0 %1364 }
 0x39b   : > { %1919 = vst.msk [vmem:[#allocation2 + $0x48] sm:$0xff] %vm1644_vm5, %v1381_v26  ;;  %v4373_v30 = vmax.f32 %v4363_v24, %v1365_v27  ;;  %1483 = vperm.xlu0 %3643, %v1381_v26   ;;  %v1397_v62 = vsub.f32 %v4357_v20, %v1381_v26  ;;  %v1424_v16 = vmul.f32 1.442695, %v1398_v11  ;;  %v1420_v20 = vmul.f32 1.442695, %v1396_v14 }
 0x39c   : > { %v1371_v32 = vpop.xlane.xlu1 %1370 }
 0x39d   : > { %1922 = vst.msk [vmem:[#allocation2 + $0x60] sm:$0xff] %vm1644_vm5, %v4373_v30  ;;  %v4380_v51 = vmax.f32 %v4368_v28, %v1371_v32  ;;  %1473 = vperm.xlu1 %3644, %v1379_v4   ;;  %v1399_v4 = vsub.f32 %v4345_v12, %v1383_v17  ;;  %v4412_v12 = vpop.eup %3667  ;;  %v1422_v3 = vmul.f32 1.442695, %v1397_v62 }
 0x39e   : > { %v1369_v52 = vpop.xlane.xlu0 %1368 }
 0x39f   : > { %v1403_v57 = vsub.f32 %v4368_v28, %v4380_v51  ;;  %1925 = vst.msk [vmem:[#allocation2 + $0x78] sm:$0xff] %vm1644_vm5, %v4380_v51  ;;  %v4389_v58 = vmax.f32 %v4375_v33, %v1369_v52  ;;  %1493 = vperm.xlu0 %3643, %v1383_v17   ;;  %v1426_v8 = vmul.f32 1.442695, %v1399_v4  ;;  %v4418_v17 = vpop.eup %3669 }
 0x3a0   : > { %v1367_v59 = vpop.xlane.xlu1 %1366  ;;  %v4421_v18 = vpop.eup %3671 }
 0x3a1   : > { %v1402_v63 = vsub.f32 %v4375_v33, %v4389_v58  ;;  %1924 = vst.msk [vmem:[#allocation2 + $0x70] sm:$0xff] %vm1644_vm5, %v4389_v58  ;;  %v1385_v50 = vmax.f32 %v1337_v54, %v1367_v59  ;;  %1478 = vperm.xlu1 %3644, %v4349_v13   ;;  %3679 = vpow2.f32 %v1426_v8  ;;  %v4426_v22 = vpop.eup %3673 }
 0x3a2   : > { %3681 = vpow2.f32 %v1416_v10 }
 0x3a3   : > { %1923 = vst.msk [vmem:[#allocation2 + $0x68] sm:$0xff] %vm1644_vm5, %v1385_v50  ;;  %1503 = vperm.xlu0 %3643, %v1385_v50   ;;  %v1401_v7 = vsub.f32 %v1337_v54, %v1385_v50  ;;  %3683 = vpow2.f32 %v1422_v3 }
 0x3a4   : > { %3685 = vpow2.f32 %v1424_v16  ;;  %v4429_v9 = vpop.eup %3675 }
 0x3a5   : > { %1488 = vperm.xlu1 %3644, %v4361_v21   ;;  %v1430_v15 = vmul.f32 1.442695, %v1401_v7  ;;  %v1400_v21 = vsub.f32 %v4363_v24, %v4373_v30  ;;  %v4432_v23 = vpop.eup %3677 }
 0x3a7   : > { %1513 = vperm.xlu0 %3643, %v4380_v51   ;;  %3687 = vpow2.f32 %v1430_v15  ;;  %v1428_v13 = vmul.f32 1.442695, %v1400_v21 }
 0x3a8   : > { %3689 = vpow2.f32 %v1420_v20 }
 0x3a9   : > { %1498 = vperm.xlu1 %3644, %v4373_v30   ;;  %3691 = vpow2.f32 %v1428_v13 }
 0x3ab   : > { %1679 = vperm.xlu0 %3643, %v4407_v1  }
 0x3ad   : > { %1508 = vperm.xlu1 %3644, %v4389_v58  }
 0x3ae   : > { %v4435_v25 = vpop.eup %3679 }
 0x3af   : > { %1694 = vperm.xlu0 %3643, %v4412_v12   ;;  %v4438_v24 = vpop.eup %3681 }
 0x3b0   : > { %v4441_v26 = vpop.eup %3683 }
 0x3b1   : > { %1684 = vperm.xlu1 %3644, %v4418_v17   ;;  %v4444_v27 = vpop.eup %3685 }
 0x3b3   : > { %1714 = vperm.xlu0 %3643, %v4421_v18  }
 0x3b4   : > { %v4447_v29 = vpop.eup %3687 }
 0x3b5   : > { %1689 = vperm.xlu1 %3644, %v4426_v22   ;;  %v4450_v30 = vpop.eup %3689 }
 0x3b6   : > { %v4453_v31 = vpop.eup %3691 }
 0x3b7   : > { %1704 = vperm.xlu0 %3643, %v4429_v9  }
 0x3b9   : > { %1699 = vperm.xlu1 %3644, %v4432_v23  }
 0x3bb   : > { %1734 = vperm.xlu0 %3643, %v4435_v25  }
 0x3bd   : > { %1709 = vperm.xlu1 %3644, %v4438_v24  }
 0x3bf   : > { %1724 = vperm.xlu0 %3643, %v4441_v26  }
 0x3c1   : > { %1729 = vperm.xlu1 %3644, %v4444_v27  }
 0x3c3   : > { %1744 = vperm.xlu0 %3643, %v4447_v29  }
 0x3c5   : > { %1719 = vperm.xlu1 %3644, %v4450_v30  }
 0x3c9   : > { %1739 = vperm.xlu1 %3644, %v4453_v31  }
 0x3fe   : > { %v1449_v32 = vpop.permute.xlu1 %1448 }
 0x3ff   : > { %v1518_v40 = vsub.f32 %v4262_v34, %v1449_v32 }
 0x400   : > { %v1439_v52 = vpop.permute.xlu0 %1438 }
 0x401   : > { %v1536_v54 = vmul.f32 1.442695, %v1518_v40  ;;  %v1516_v55 = vsub.f32 %v4265_v19, %v1439_v52 }
 0x402   : > { %v1454_v56 = vpop.permute.xlu1 %1453 }
 0x403   : > { %3693 = vpow2.f32 %v1536_v54  ;;  %v1532_v59 = vmul.f32 1.442695, %v1516_v55  ;;  %v1519_v60 = vsub.f32 %v4268_v35, %v1454_v56 }
 0x405   : > { %3695 = vpow2.f32 %v1532_v59  ;;  %v1538_v61 = vmul.f32 1.442695, %v1519_v60 }
 0x406   : > { %v1444_v50 = vpop.permute.xlu1 %1443 }
 0x407   : > { %v1517_v53 = vsub.f32 %v4271_v36, %v1444_v50  ;;  %3697 = vpow2.f32 %v1538_v61 }
 0x409   : > { %v1534_v0 = vmul.f32 1.442695, %v1517_v53 }
 0x40b   : > { %3699 = vpow2.f32 %v1534_v0 }
 0x40c   : > { %v1469_v2 = vpop.permute.xlu1 %1468 }
 0x40d   : > { %v1522_v34 = vsub.f32 %v4274_v37, %v1469_v2 }
 0x40f   : > { %v1544_v4 = vmul.f32 1.442695, %v1522_v34 }
 0x410   : > { %v3694_v5 = vpop.eup %3693  ;;  %v1459_v6 = vpop.permute.xlu1 %1458 }
 0x411   : > { %3701 = vpow2.f32 %v1544_v4  ;;  %v1520_v19 = vsub.f32 %v4276_v38, %v1459_v6  ;;  %1600 = vadd.xlane.f32.xlu0 %v3694_v5 }
 0x412   : > { %v3696_v8 = vpop.eup %3695 }
 0x413   : > { %v1540_v35 = vmul.f32 1.442695, %v1520_v19  ;;  %1596 = vadd.xlane.f32.xlu1 %v3696_v8 }
 0x414   : > { %v1464_v62 = vpop.permute.xlu1 %1463  ;;  %v3698_v10 = vpop.eup %3697 }
 0x415   : > { %3703 = vpow2.f32 %v1540_v35  ;;  %v1521_v36 = vsub.f32 %v4282_v41, %v1464_v62  ;;  %v1774_v20 = vpack.c.bf16 %v3698_v10, %v3694_v5 }
 0x416   : > { %v1484_v11 = vpop.permute.xlu0 %1483 }
 0x417   : > { %v1542_v3 = vmul.f32 1.442695, %v1521_v36  ;;  %1602 = vadd.xlane.f32.xlu1 %v3698_v10  ;;  %v1525_v37 = vsub.f32 %v4294_v45, %v1484_v11 }
 0x418   : > { %v3700_v7 = vpop.eup %3699  ;;  %v1474_v14 = vpop.permute.xlu1 %1473 }
 0x419   : > { %3705 = vpow2.f32 %v1542_v3  ;;  %v1523_v16 = vsub.f32 %v4279_v39, %v1474_v14  ;;  %1598 = vadd.xlane.f32.xlu0 %v3700_v7  ;;  %v1773_v38 = vpack.c.bf16 %v3700_v7, %v3696_v8  ;;  %v1550_v13 = vmul.f32 1.442695, %v1525_v37 }
 0x41a   : > { %v1494_v15 = vpop.permute.xlu0 %1493 }
 0x41b   : > { %v1546_v21 = vmul.f32 1.442695, %v1523_v16  ;;  %3479 = vmatprep.mubr.bf16.mxu0 %v1773_v38  ;;  %v1527_v41 = vsub.f32 %v4291_v44, %v1494_v15  ;;  %v1432_v16 = vmul.f32 1.442695, %v1402_v63  ;;  %v1434_v38 = vmul.f32 1.442695, %v1403_v57 }
 0x41c   : > { %3480 = vmatmul.mubr.bf16.vlgmr.msra.gmra.mxu0 %v1774_v20  ;;  %v1479_v32 = vpop.permute.xlu1 %1478 }
 0x41d   : > { %3707 = vpow2.f32 %v1546_v21  ;;  %v1524_v40 = vsub.f32 %v4288_v43, %v1479_v32  ;;  %v1554_v39 = vmul.f32 1.442695, %v1527_v41 }
 0x41e   : > { %v3702_v52 = vpop.eup %3701  ;;  %v1504_v45 = vpop.permute.xlu0 %1503  ;;  %3709 = vpow2.f32 %v1550_v13 }
 0x41f   : > { %v1548_v54 = vmul.f32 1.442695, %v1524_v40  ;;  %1608 = vadd.xlane.f32.xlu0 %v3702_v52  ;;  %v1529_v55 = vsub.f32 %v4307_v49, %v1504_v45 }
 0x420   : > { %v1489_v56 = vpop.permute.xlu1 %1488 }
 0x421   : > { %3711 = vpow2.f32 %v1548_v54  ;;  %v1526_v59 = vsub.f32 %v4285_v42, %v1489_v56  ;;  %v1558_v50 = vmul.f32 1.442695, %v1529_v55  ;;  %v1566_v54 = vld [vmem:[#allocation3 + $0x10] sm:$0xff]  ;;  %v1564_v55 = vld [vmem:[#allocation3] sm:$0xff] }
 0x422   : > { %v3704_v60 = vpop.eup %3703  ;;  %v1514_v61 = vpop.permute.xlu0 %1513  ;;  %3713 = vpow2.f32 %v1554_v39  ;;  %v1582_v56 = vmul.f32 %v4426_v22, %v1566_v54 }
 0x423   : > { %v1552_v44 = vmul.f32 1.442695, %v1526_v59  ;;  %1604 = vadd.xlane.f32.xlu0 %v3704_v60  ;;  %v1531_v43 = vsub.f32 %v4303_v48, %v1514_v61  ;;  %v1580_v61 = vmul.f32 %v4407_v1, %v1564_v55 }
 0x424   : > { %v1499_v53 = vpop.permute.xlu1 %1498 }
 0x425   : > { %3715 = vpow2.f32 %v1552_v44  ;;  %v1528_v0 = vsub.f32 %v4300_v47, %v1499_v53  ;;  %v1562_v49 = vmul.f32 1.442695, %v1531_v43  ;;  %v1565_v53 = vld [vmem:[#allocation3 + $0x8] sm:$0xff] }
 0x426   : > { %v3706_v2 = vpop.eup %3705  ;;  %3717 = vpow2.f32 %v1558_v50  ;;  %v4484_v21 = vpop.permute.xlu0 %1679  ;;  %v1567_v50 = vld [vmem:[#allocation3 + $0x18] sm:$0xff] }
 0x427   : > { %v1556_v34 = vmul.f32 1.442695, %v1528_v0  ;;  %v1775_v4 = vpack.c.bf16 %v3706_v2, %v3704_v60  ;;  %v1583_v0 = vmul.f32 %v4412_v12, %v1567_v50 }
 0x428   : > { %v1509_v5 = vpop.permute.xlu1 %1508 }
 0x429   : > { %3719 = vpow2.f32 %v1556_v34  ;;  %v1530_v42 = vsub.f32 %v4297_v46, %v1509_v5  ;;  %3483 = vmatprep.mubr.bf16.mxu0 %v1775_v4  ;;  %v1581_v4 = vmul.f32 %v4418_v17, %v1565_v53  ;;  %v1570_v5 = vld [vmem:[#allocation3 + $0x30] sm:$0xff]  ;;  %v1571_v17 = vld [vmem:[#allocation3 + $0x38] sm:$0xff] }
 0x42a   : > { %v3708_v6 = vpop.eup %3707  ;;  %3721 = vpow2.f32 %v1562_v49  ;;  %v4488_v58 = vpop.permute.xlu0 %1694  ;;  %v1586_v1 = vmul.f32 %v4438_v24, %v1570_v5 }
 0x42b   : > { %v1560_v19 = vmul.f32 1.442695, %v1530_v42  ;;  %1610 = vadd.xlane.f32.xlu1 %v3708_v6  ;;  %v1776_v8 = vpack.c.bf16 %v3708_v6, %v3702_v52  ;;  %v3710_v48 = vpop.eup %3709  ;;  %v1568_v6 = vld [vmem:[#allocation3 + $0x20] sm:$0xff] }
 0x42c   : > { %v4486_v33 = vpop.permute.xlu1 %1684  ;;  %v1584_v12 = vmul.f32 %v4432_v23, %v1568_v6  ;;  %v1664_v6 = vld [vmem:[#allocation4 + $0x18] sm:$0xff] }
 0x42d   : > { %3723 = vpow2.f32 %v1560_v19  ;;  %3484 = vmatmul.mubr.bf16.gmra.mxu0 %v1776_v8 }
 0x42e   : > { %v3712_v35 = vpop.eup %3711  ;;  %3725 = vpow2.f32 %v1432_v16  ;;  %v4492_v13 = vpop.permute.xlu0 %1714  ;;  %v1573_v16 = vld [vmem:[#allocation3 + $0x48] sm:$0xff] }
 0x42f   : > { %1606 = vadd.xlane.f32.xlu1 %v3706_v2  ;;  %v1777_v47 = vpack.c.bf16 %v3710_v48, %v3712_v35  ;;  %v3714_v62 = vpop.eup %3713  ;;  %3727 = vpow2.f32 %v1434_v38  ;;  %v1589_v55 = vmul.f32 %v4441_v26, %v1573_v16 }
 0x430   : > { %v4490_v63 = vpop.permute.xlu1 %1689 }
 0x431   : > { %3487 = vmatprep.mubr.bf16.mxu0 %v1777_v47 }
 0x432   : > { %v3716_v36 = vpop.eup %3715  ;;  %v4496_v51 = vpop.permute.xlu0 %1704 }
 0x433   : > { %1618 = vadd.xlane.f32.xlu1 %v3714_v62  ;;  %1616 = vadd.xlane.f32.xlu0 %v3716_v36  ;;  %v1778_v10 = vpack.c.bf16 %v3714_v62, %v3716_v36  ;;  %v3718_v11 = vpop.eup %3717  ;;  %v1569_v62 = vld [vmem:[#allocation3 + $0x28] sm:$0xff] }
 0x434   : > { %v4494_v28 = vpop.permute.xlu1 %1699  ;;  %v1585_v24 = vmul.f32 %v4429_v9, %v1569_v62 }
 0x435   : > { %3488 = vmatmul.mubr.bf16.gmra.mxu0 %v1778_v10 }
 0x436   : > { %v3720_v46 = vpop.eup %3719  ;;  %v4500_v41 = vpop.permute.xlu0 %1734 }
 0x437   : > { %1614 = vadd.xlane.f32.xlu1 %v3710_v48  ;;  %1612 = vadd.xlane.f32.xlu0 %v3712_v35  ;;  %v1779_v3 = vpack.c.bf16 %v3718_v11, %v3720_v46  ;;  %v3722_v7 = vpop.eup %3721  ;;  %v1587_v35 = vmul.f32 %v4421_v18, %v1571_v17  ;;  %v1572_v18 = vld [vmem:[#allocation3 + $0x40] sm:$0xff] }
 0x438   : > { %v4498_v57 = vpop.permute.xlu1 %1709  ;;  %v1588_v9 = vmul.f32 %v4450_v30, %v1572_v18  ;;  %v1577_v30 = vld [vmem:[#allocation3 + $0x68] sm:$0xff] }
 0x439   : > { %3491 = vmatprep.mubr.bf16.mxu0 %v1779_v3 }
 0x43a   : > { %v3724_v37 = vpop.eup %3723  ;;  %v4504_v40 = vpop.permute.xlu0 %1724 }
 0x43b   : > { %1626 = vadd.xlane.f32.xlu1 %v3722_v7  ;;  %1624 = vadd.xlane.f32.xlu0 %v3724_v37  ;;  %v1780_v14 = vpack.c.bf16 %v3722_v7, %v3724_v37  ;;  %v4478_v15 = vpop.eup %3725 }
 0x43c   : > { %v4481_v20 = vpop.eup %3727  ;;  %v4502_v32 = vpop.permute.xlu1 %1729 }
 0x43d   : > { %3492 = vmatmul.mubr.bf16.gmra.mxu0 %v1780_v14 }
 0x43e   : > { %v4508_v45 = vpop.permute.xlu0 %1744 }
 0x43f   : > { %1622 = vadd.xlane.f32.xlu1 %v3718_v11  ;;  %1620 = vadd.xlane.f32.xlu0 %v3720_v46  ;;  %v1574_v11 = vld [vmem:[#allocation3 + $0x50] sm:$0xff]  ;;  %v1575_v46 = vld [vmem:[#allocation3 + $0x58] sm:$0xff] }
 0x440   : > { %v4506_v52 = vpop.permute.xlu1 %1719  ;;  %v1590_v23 = vmul.f32 %v4444_v27, %v1574_v11  ;;  %v1591_v7 = vmul.f32 %v4435_v25, %v1575_v46  ;;  %v1579_v27 = vld [vmem:[#allocation3 + $0x78] sm:$0xff] }
 0x441   : > { %v1595_v50 = vmul.f32 %v4481_v20, %v1579_v27 }
 0x444   : > { %v4510_v39 = vpop.permute.xlu1 %1739 }
 0x450   : > { %1749 = vperm.xlu1 %3644, %v4478_v15  }
 0x455   : > { %1754 = vperm.xlu0 %3643, %v4481_v20   ;;  %v1663_v20 = vld [vmem:[#allocation4 + $0x10] sm:$0xff] }
 0x49a   : > { %v1601_v59 = vpop.xlane.xlu0 %1600 }
 0x49b   : > { %v1630_v60 = vadd.f32 %v1601_v59, %v1582_v56 }
 0x49c   : > { %v1597_v44 = vpop.xlane.xlu1 %1596 }
 0x49d   : > { %1647 = vst.msk [vmem:[#allocation3 + $0x10] sm:$0xff] %vm1644_vm5, %v1630_v60  ;;  %v1628_v43 = vadd.f32 %v1597_v44, %v1580_v61  ;;  %v1578_v60 = vld [vmem:[#allocation3 + $0x70] sm:$0xff] }
 0x49e   : > { %v1594_v44 = vmul.f32 %v4478_v15, %v1578_v60  ;;  %v1670_v60 = vld [vmem:[#allocation4 + $0x48] sm:$0xff] }
 0x49f   : > { %1645 = vst.msk [vmem:[#allocation3] sm:$0xff] %vm1644_vm5, %v1628_v43 }
 0x4a0   : > { %v1603_v2 = vpop.xlane.xlu1 %1602 }
 0x4a1   : > { %v1631_v34 = vadd.f32 %v1603_v2, %v1583_v0  ;;  %v1576_v0 = vld [vmem:[#allocation3 + $0x60] sm:$0xff] }
 0x4a2   : > { %v1599_v49 = vpop.xlane.xlu0 %1598 }
 0x4a3   : > { %1648 = vst.msk [vmem:[#allocation3 + $0x18] sm:$0xff] %vm1644_vm5, %v1631_v34  ;;  %v1629_v22 = vadd.f32 %v1599_v49, %v1581_v4  ;;  %v1592_v34 = vmul.f32 %v4453_v31, %v1576_v0  ;;  %v1593_v4 = vmul.f32 %v4447_v29, %v1577_v30  ;;  %v1662_v31 = vld [vmem:[#allocation4 + $0x8] sm:$0xff]  ;;  %v1760_v29 = vmul.f32 %v4488_v58, %v1664_v6  ;;  %v1668_v58 = vld [vmem:[#allocation4 + $0x38] sm:$0xff] }
 0x4a5   : > { %1646 = vst.msk [vmem:[#allocation3 + $0x8] sm:$0xff] %vm1644_vm5, %v1629_v22 }
 0x4a8   : > { %v1609_v42 = vpop.xlane.xlu0 %1608 }
 0x4a9   : > { %v1634_v19 = vadd.f32 %v1609_v42, %v1586_v1  ;;  %v1661_v1 = vld [vmem:[#allocation4] sm:$0xff]  ;;  %v1759_v42 = vmul.f32 %v4490_v63, %v1663_v20 }
 0x4ab   : > { %1651 = vst.msk [vmem:[#allocation3 + $0x30] sm:$0xff] %vm1644_vm5, %v1634_v19 }
 0x4ac   : > { %v1605_v8 = vpop.xlane.xlu0 %1604 }
 0x4ad   : > { %v1632_v48 = vadd.f32 %v1605_v8, %v1584_v12  ;;  %v1757_v12 = vmul.f32 %v4484_v21, %v1661_v1  ;;  %v1667_v21 = vld [vmem:[#allocation4 + $0x30] sm:$0xff] }
 0x4af   : > { %1649 = vst.msk [vmem:[#allocation3 + $0x20] sm:$0xff] %vm1644_vm5, %v1632_v48 }
 0x4b4   : > { %v1611_v47 = vpop.xlane.xlu1 %1610 }
 0x4b5   : > { %v1635_v36 = vadd.f32 %v1611_v47, %v1587_v35  ;;  %v1758_v47 = vmul.f32 %v4486_v33, %v1662_v31 }
 0x4b7   : > { %1652 = vst.msk [vmem:[#allocation3 + $0x38] sm:$0xff] %vm1644_vm5, %v1635_v36 }
 0x4b8   : > { %v1607_v10 = vpop.xlane.xlu1 %1606 }
 0x4b9   : > { %v1633_v3 = vadd.f32 %v1607_v10, %v1585_v24  ;;  %v1665_v24 = vld [vmem:[#allocation4 + $0x20] sm:$0xff]  ;;  %v1763_v10 = vmul.f32 %v4498_v57, %v1667_v21 }
 0x4ba   : > { %v1761_v46 = vmul.f32 %v4494_v28, %v1665_v24  ;;  %v1669_v57 = vld [vmem:[#allocation4 + $0x40] sm:$0xff] }
 0x4bb   : > { %1650 = vst.msk [vmem:[#allocation3 + $0x28] sm:$0xff] %vm1644_vm5, %v1633_v3 }
 0x4bc   : > { %v1617_v37 = vpop.xlane.xlu0 %1616  ;;  %v1619_v14 = vpop.xlane.xlu1 %1618 }
 0x4bd   : > { %v1638_v38 = vadd.f32 %v1617_v37, %v1590_v23  ;;  %v1639_v54 = vadd.f32 %v1619_v14, %v1591_v7  ;;  %v1666_v23 = vld [vmem:[#allocation4 + $0x28] sm:$0xff]  ;;  %v1764_v7 = vmul.f32 %v4492_v13, %v1668_v58  ;;  %v1671_v14 = vld [vmem:[#allocation4 + $0x50] sm:$0xff]  ;;  %v1765_v13 = vmul.f32 %v4506_v52, %v1669_v57 }
 0x4be   : > { %v1762_v16 = vmul.f32 %v4496_v51, %v1666_v23 }
 0x4bf   : > { %1655 = vst.msk [vmem:[#allocation3 + $0x50] sm:$0xff] %vm1644_vm5, %v1638_v38  ;;  %1656 = vst.msk [vmem:[#allocation3 + $0x58] sm:$0xff] %vm1644_vm5, %v1639_v54 }
 0x4c0   : > { %v1613_v56 = vpop.xlane.xlu0 %1612  ;;  %v1615_v59 = vpop.xlane.xlu1 %1614 }
 0x4c1   : > { %v1636_v61 = vadd.f32 %v1613_v56, %v1588_v9  ;;  %v1637_v25 = vadd.f32 %v1615_v59, %v1589_v55  ;;  %v1767_v9 = vmul.f32 %v4502_v32, %v1671_v14  ;;  %v1672_v55 = vld [vmem:[#allocation4 + $0x58] sm:$0xff] }
 0x4c2   : > { %v1768_v51 = vmul.f32 %v4500_v41, %v1672_v55 }
 0x4c3   : > { %1653 = vst.msk [vmem:[#allocation3 + $0x40] sm:$0xff] %vm1644_vm5, %v1636_v61  ;;  %1654 = vst.msk [vmem:[#allocation3 + $0x48] sm:$0xff] %vm1644_vm5, %v1637_v25  ;;  %v1675_v25 = vld [vmem:[#allocation4 + $0x70] sm:$0xff] }
 0x4c4   : > { %v1625_v43 = vpop.xlane.xlu0 %1624  ;;  %v1627_v53 = vpop.xlane.xlu1 %1626 }
 0x4c5   : > { %v1642_v2 = vadd.f32 %v1625_v43, %v1594_v44  ;;  %v1643_v26 = vadd.f32 %v1627_v53, %v1595_v50  ;;  %v1766_v50 = vmul.f32 %v4504_v40, %v1670_v60  ;;  %v1673_v53 = vld [vmem:[#allocation4 + $0x60] sm:$0xff] }
 0x4c7   : > { %1659 = vst.msk [vmem:[#allocation3 + $0x70] sm:$0xff] %vm1644_vm5, %v1642_v2  ;;  %1660 = vst.msk [vmem:[#allocation3 + $0x78] sm:$0xff] %vm1644_vm5, %v1643_v26  ;;  %v1676_v2 = vld [vmem:[#allocation4 + $0x78] sm:$0xff] }
 0x4c8   : > { %v1621_v49 = vpop.xlane.xlu0 %1620  ;;  %v1623_v22 = vpop.xlane.xlu1 %1622 }
 0x4c9   : > { %v1640_v5 = vadd.f32 %v1621_v49, %v1592_v34  ;;  %v1641_v15 = vadd.f32 %v1623_v22, %v1593_v4  ;;  %v1769_v34 = vmul.f32 %v4510_v39, %v1673_v53  ;;  %v1674_v49 = vld [vmem:[#allocation4 + $0x68] sm:$0xff] }
 0x4ca   : > { %v1770_v20 = vmul.f32 %v4508_v45, %v1674_v49 }
 0x4cb   : > { %1657 = vst.msk [vmem:[#allocation3 + $0x60] sm:$0xff] %vm1644_vm5, %v1640_v5  ;;  %1658 = vst.msk [vmem:[#allocation3 + $0x68] sm:$0xff] %vm1644_vm5, %v1641_v15 }
 0x4cc   : > { %v1750_v44 = vpop.permute.xlu1 %1749 }
 0x4cd   : > { %v1771_v0 = vmul.f32 %v1750_v44, %v1675_v25 }
 0x4d0   : > { %v1755_v26 = vpop.permute.xlu0 %1754 }
 0x4d1   : > { %v1772_v40 = vmul.f32 %v1755_v26, %v1676_v2 }
 0x4dc   : > { %v3481_v19 = vpop.f32.mrf.mxu0 }
 0x4dd   : > { %v1880_v8 = vadd.f32 %v3481_v19, %v1759_v42 }
 0x4de   : > { %v1815_v48 = vpop.f32.mrf.mxu0 }
 0x4df   : > { %1896 = vst.msk [vmem:[#allocation4 + $0x10] sm:$0xff] %vm872_vm4, %v1880_v8  ;;  %v1878_v17 = vadd.f32 %v1815_v48, %v1757_v12 }
 0x4e0   : > { %v3482_v35 = vpop.f32.mrf.mxu0 }
 0x4e1   : > { %1894 = vst.msk [vmem:[#allocation4] sm:$0xff] %vm872_vm4, %v1878_v17  ;;  %v1881_v62 = vadd.f32 %v3482_v35, %v1760_v29 }
 0x4e2   : > { %v1818_v36 = vpop.f32.mrf.mxu0 }
 0x4e3   : > { %1897 = vst.msk [vmem:[#allocation4 + $0x18] sm:$0xff] %vm872_vm4, %v1881_v62  ;;  %v1879_v63 = vadd.f32 %v1818_v36, %v1758_v47 }
 0x4e5   : > { %1895 = vst.msk [vmem:[#allocation4 + $0x8] sm:$0xff] %vm872_vm4, %v1879_v63 }
 0x4ed   : > { %v3485_v11 = vpop.f32.mrf.mxu0 }
 0x4ee   : > { %v1884_v3 = vadd.f32 %v3485_v11, %v1763_v10 }
 0x4ef   : > { %v1831_v33 = vpop.f32.mrf.mxu0 }
 0x4f0   : > { %1900 = vst.msk [vmem:[#allocation4 + $0x30] sm:$0xff] %vm872_vm4, %v1884_v3  ;;  %v1882_v37 = vadd.f32 %v1831_v33, %v1761_v46 }
 0x4f1   : > { %v3486_v18 = vpop.f32.mrf.mxu0 }
 0x4f2   : > { %1898 = vst.msk [vmem:[#allocation4 + $0x20] sm:$0xff] %vm872_vm4, %v1882_v37  ;;  %v1885_v38 = vadd.f32 %v3486_v18, %v1764_v7 }
 0x4f3   : > { %v1834_v54 = vpop.f32.mrf.mxu0 }
 0x4f4   : > { %1901 = vst.msk [vmem:[#allocation4 + $0x38] sm:$0xff] %vm872_vm4, %v1885_v38  ;;  %v1883_v28 = vadd.f32 %v1834_v54, %v1762_v16 }
 0x4f5   : > { %v3489_v56 = vpop.f32.mrf.mxu0 }
 0x4f6   : > { %1899 = vst.msk [vmem:[#allocation4 + $0x28] sm:$0xff] %vm872_vm4, %v1883_v28  ;;  %v1888_v59 = vadd.f32 %v3489_v56, %v1767_v9 }
 0x4f7   : > { %v1847_v27 = vpop.f32.mrf.mxu0 }
 0x4f8   : > { %1904 = vst.msk [vmem:[#allocation4 + $0x50] sm:$0xff] %vm872_vm4, %v1888_v59  ;;  %v1886_v61 = vadd.f32 %v1847_v27, %v1765_v13 }
 0x4f9   : > { %v3490_v32 = vpop.f32.mrf.mxu0 }
 0x4fa   : > { %1902 = vst.msk [vmem:[#allocation4 + $0x40] sm:$0xff] %vm872_vm4, %v1886_v61  ;;  %v1889_v43 = vadd.f32 %v3490_v32, %v1768_v51 }
 0x4fb   : > { %v1850_v52 = vpop.f32.mrf.mxu0 }
 0x4fc   : > { %1905 = vst.msk [vmem:[#allocation4 + $0x58] sm:$0xff] %vm872_vm4, %v1889_v43  ;;  %v1887_v30 = vadd.f32 %v1850_v52, %v1766_v50 }
 0x4fd   : > { %v3493_v41 = vpop.f32.mrf.mxu0 }
 0x4fe   : > { %1903 = vst.msk [vmem:[#allocation4 + $0x48] sm:$0xff] %vm872_vm4, %v1887_v30  ;;  %v1892_v4 = vadd.f32 %v3493_v41, %v1771_v0 }
 0x4ff   : > { %v1863_v22 = vpop.f32.mrf.mxu0 }
 0x500   : > { %1908 = vst.msk [vmem:[#allocation4 + $0x70] sm:$0xff] %vm872_vm4, %v1892_v4  ;;  %v1890_v5 = vadd.f32 %v1863_v22, %v1769_v34 }
 0x501   : > { %v3494_v15 = vpop.f32.mrf.mxu0 }
 0x502   : > { %1906 = vst.msk [vmem:[#allocation4 + $0x60] sm:$0xff] %vm872_vm4, %v1890_v5  ;;  %v1893_v1 = vadd.f32 %v3494_v15, %v1772_v40  ;;  %1929 = sbr.rel (%p3205_p1) target bundleno = 2230 (0x8b6), region = 84 }
 0x503   : > { %v1866_v42 = vpop.f32.mrf.mxu0 }
 0x504   : > { %1909 = vst.msk [vmem:[#allocation4 + $0x78] sm:$0xff] %vm872_vm4, %v1893_v1  ;;  %v1891_v6 = vadd.f32 %v1866_v42, %v1770_v20 }
 0x506   : > { %1907 = vst.msk [vmem:[#allocation4 + $0x68] sm:$0xff] %vm872_vm4, %v1891_v6 }
 0x507   : > { %v1932_v39 = vld [vmem:[#allocation3 + $0x10] sm:$0xff]  ;;  %v1930_v19 = vld [vmem:[#allocation3] sm:$0xff]  ;;  %v1933_v12 = vld [vmem:[#allocation3 + $0x18] sm:$0xff]  ;;  %v3898_v8 = vmov 0   ;;  %vm2475_vm6 = vcmask 130112   ;;  %vm2482_vm7 = vcmask 195712  }
 0x508   : > { %3730 = vset.pattern.permute.xlu1 %v3898_v8  ;;  %3729 = vset.pattern.permute.xlu0 %v3898_v8  ;;  %3737 = vrcp.f32 %v1932_v39  ;;  %v1931_v45 = vld [vmem:[#allocation3 + $0x8] sm:$0xff]  ;;  %v1934_v48 = vld [vmem:[#allocation3 + $0x20] sm:$0xff]  ;;  %v1937_v29 = vld [vmem:[#allocation3 + $0x38] sm:$0xff]  ;;  %vm2489_vm8 = vcmask 261312   ;;  %vm2496_vm9 = vcmask 326912   ;;  %vm2503_vm10 = vcmask 392512  }
 0x509   : > { %3739 = vrcp.f32 %v1930_v19  ;;  %v1935_v31 = vld [vmem:[#allocation3 + $0x28] sm:$0xff]  ;;  %v1936_v17 = vld [vmem:[#allocation3 + $0x30] sm:$0xff]  ;;  %v1938_v62 = vld [vmem:[#allocation3 + $0x40] sm:$0xff]  ;;  %vm2510_vm11 = vcmask 458112   ;;  %vm2517_vm12 = vcmask 523712   ;;  %vm2524_vm13 = vcmask 589312  }
 0x50a   : > { %3741 = vrcp.f32 %v1933_v12  ;;  %v3731_v35 = vld [vmem:[%s4914_s7 + $0x8] sm:$0xff]   ;;  %v3732_v21 = vld [vmem:[%s4914_s7] sm:$0xff]   ;;  %v1941_v10 = vld [vmem:[#allocation3 + $0x58] sm:$0xff]  ;;  %vm2531_vm14 = vcmask 654912   ;;  %vm2538_vm15 = vcmask 720512   ;;  %vm2545_vm0 = vcmask 786112  }
 0x50b   : > { %3743 = vrcp.f32 %v1931_v45  ;;  %v1939_v47 = vld [vmem:[#allocation3 + $0x48] sm:$0xff]  ;;  %3495 = vmatprep.subr.bf16.mxu0 %v3731_v35  ;;  %3555 = vmatprep.subr.bf16.mxu1 %v3731_v35  ;;  %v1940_v11 = vld [vmem:[#allocation3 + $0x50] sm:$0xff]  ;;  %v1942_v33 = vld [vmem:[#allocation3 + $0x60] sm:$0xff]  ;;  %vm2552_vm1 = vcmask 851712   ;;  %vm2559_vm2 = vcmask 917312   ;;  %vm2566_vm3 = vcmask 982912  }
 0x50c   : > { %3745 = vrcp.f32 %v1935_v31  ;;  %3496 = vmatpush3.bf16.msra.mxu0 %v3731_v35  ;;  %3557 = vmatpush3.bf16.msra.mxu1 %v3731_v35  ;;  %v1943_v3 = vld [vmem:[#allocation3 + $0x68] sm:$0xff]  ;;  %v1945_v37 = vld [vmem:[#allocation3 + $0x78] sm:$0xff]  ;;  %v1944_v18 = vld [vmem:[#allocation3 + $0x70] sm:$0xff] }
 0x50d   : > { %3747 = vrcp.f32 %v1934_v48  ;;  %3497 = vmatprep.subr.bf16.mxu0 %v3732_v21  ;;  %3556 = vmatprep.subr.bf16.mxu1 %v3732_v21  ;;  %v4584_v13 = vld [vmem:[%s4917_s10 + $0x8] sm:$0xff]   ;;  %v3216_v59 = vld [vmem:[%s4916_s9] ss:$0 sm:$0xff]  ;;  %v1964_v51 = vld [vmem:[#allocation4 + $0x10] sm:$0xff] }
 0x50e   : > { %3749 = vrcp.f32 %v1937_v29  ;;  %v1965_v61 = vld [vmem:[#allocation4 + $0x18] sm:$0xff]  ;;  %v1962_v25 = vld [vmem:[#allocation4] sm:$0xff]  ;;  %v1963_v44 = vld [vmem:[#allocation4 + $0x8] sm:$0xff] }
 0x50f   : > { %3751 = vrcp.f32 %v1936_v17  ;;  %v1967_v30 = vld [vmem:[#allocation4 + $0x28] sm:$0xff]  ;;  %v1966_v26 = vld [vmem:[#allocation4 + $0x20] sm:$0xff]  ;;  %v1969_v40 = vld [vmem:[#allocation4 + $0x38] sm:$0xff] }
 0x510   : > { %3753 = vrcp.f32 %v1939_v47  ;;  %3498 = vmatpush3.bf16.msra.mxu0 %v3732_v21  ;;  %3558 = vmatpush3.bf16.msra.mxu1 %v3732_v21  ;;  %v1968_v5 = vld [vmem:[#allocation4 + $0x30] sm:$0xff]  ;;  %v1971_v39 = vld [vmem:[#allocation4 + $0x48] sm:$0xff]  ;;  %v1970_v19 = vld [vmem:[#allocation4 + $0x40] sm:$0xff] }
 0x511   : > { %3755 = vrcp.f32 %v1938_v62  ;;  %3515 = vmatprep.subr.bf16.mxu1 %v4584_v13  ;;  %v1973_v29 = vld [vmem:[#allocation4 + $0x58] sm:$0xff]  ;;  %v1972_v17 = vld [vmem:[#allocation4 + $0x50] sm:$0xff]  ;;  %v1975_v21 = vld [vmem:[#allocation4 + $0x68] sm:$0xff] }
 0x512   : > { %3757 = vrcp.f32 %v1941_v10 }
 0x513   : > { %3759 = vrcp.f32 %v1940_v11 }
 0x514   : > { %3761 = vrcp.f32 %v1943_v3 }
 0x515   : > { %v3738_v36 = vpop.eup %3737  ;;  %3763 = vrcp.f32 %v1942_v33  ;;  %v1976_v33 = vld [vmem:[#allocation4 + $0x70] sm:$0xff] }
 0x516   : > { %v3740_v63 = vpop.eup %3739  ;;  %1990 = vperm.xlu1 %3730, %v3738_v36   ;;  %3765 = vrcp.f32 %v1945_v37 }
 0x517   : > { %v3742_v24 = vpop.eup %3741  ;;  %1980 = vperm.xlu0 %3729, %v3740_v63   ;;  %3767 = vrcp.f32 %v1944_v18 }
 0x518   : > { %v3744_v58 = vpop.eup %3743 }
 0x519   : > { %v3746_v46 = vpop.eup %3745 }
 0x51a   : > { %1995 = vperm.xlu1 %3730, %v3742_v24   ;;  %v3748_v23 = vpop.eup %3747  ;;  %v1974_v24 = vld [vmem:[#allocation4 + $0x60] sm:$0xff] }
 0x51b   : > { %1985 = vperm.xlu0 %3729, %v3744_v58   ;;  %v3750_v7 = vpop.eup %3749 }
 0x51c   : > { %v3752_v14 = vpop.eup %3751 }
 0x51d   : > { %v3754_v16 = vpop.eup %3753 }
 0x51e   : > { %2005 = vperm.xlu1 %3730, %v3746_v46   ;;  %v3756_v38 = vpop.eup %3755 }
 0x51f   : > { %2000 = vperm.xlu0 %3729, %v3748_v23   ;;  %v3758_v57 = vpop.eup %3757  ;;  %v1977_v23 = vld [vmem:[#allocation4 + $0x78] sm:$0xff] }
 0x520   : > { %v3760_v54 = vpop.eup %3759 }
 0x521   : > { %v3762_v9 = vpop.eup %3761 }
 0x522   : > { %2015 = vperm.xlu1 %3730, %v3750_v7   ;;  %v3764_v28 = vpop.eup %3763 }
 0x523   : > { %2010 = vperm.xlu0 %3729, %v3752_v14   ;;  %v3766_v55 = vpop.eup %3765 }
 0x524   : > { %v3768_v56 = vpop.eup %3767 }
 0x526   : > { %2025 = vperm.xlu1 %3730, %v3754_v16  }
 0x527   : > { %2020 = vperm.xlu0 %3729, %v3756_v38  }
 0x52a   : > { %2035 = vperm.xlu1 %3730, %v3758_v57   ;;  %v3734_v57 = vld [vmem:[%s4917_s10] sm:$0xff]  }
 0x52b   : > { %2030 = vperm.xlu0 %3729, %v3760_v54   ;;  %v2221_v54 = vld [vmem:[%s4915_s8 + $0x10] sm:$0xff] }
 0x52e   : > { %2045 = vperm.xlu1 %3730, %v3762_v9  }
 0x52f   : > { %2040 = vperm.xlu0 %3729, %v3764_v28   ;;  %v2219_v28 = vld [vmem:[%s4915_s8] sm:$0xff] }
 0x532   : > { %2055 = vperm.xlu1 %3730, %v3766_v55  }
 0x533   : > { %2050 = vperm.xlu0 %3729, %v3768_v56  }
 0x536   : > { %2306 = vbcast.lane.b32.xlu1 %v3216_v59, 256 }
 0x537   : > { %2310 = vbcast.lane.b32.xlu0 %v3216_v59, 264 }
 0x53a   : > { %2314 = vbcast.lane.b32.xlu1 %v3216_v59, 272 }
 0x53b   : > { %2322 = vbcast.lane.b32.xlu0 %v3216_v59, 288 }
 0x53e   : > { %2318 = vbcast.lane.b32.xlu1 %v3216_v59, 280 }
 0x53f   : > { %2330 = vbcast.lane.b32.xlu0 %v3216_v59, 304 }
 0x542   : > { %2326 = vbcast.lane.b32.xlu1 %v3216_v59, 296 }
 0x543   : > { %2338 = vbcast.lane.b32.xlu0 %v3216_v59, 320 }
 0x546   : > { %2334 = vbcast.lane.b32.xlu1 %v3216_v59, 312 }
 0x547   : > { %2346 = vbcast.lane.b32.xlu0 %v3216_v59, 336 }
 0x54a   : > { %2342 = vbcast.lane.b32.xlu1 %v3216_v59, 328 }
 0x54b   : > { %2354 = vbcast.lane.b32.xlu0 %v3216_v59, 352 }
 0x54e   : > { %2350 = vbcast.lane.b32.xlu1 %v3216_v59, 344 }
 0x54f   : > { %2362 = vbcast.lane.b32.xlu0 %v3216_v59, 368 }
 0x552   : > { %2358 = vbcast.lane.b32.xlu1 %v3216_v59, 360 }
 0x556   : > { %2366 = vbcast.lane.b32.xlu1 %v3216_v59, 376 }
 0x591   : > { %v1991_v60 = vpop.permute.xlu1 %1990 }
 0x592   : > { %v1981_v27 = vpop.permute.xlu0 %1980  ;;  %v2060_v50 = vmul.f32 %v1991_v60, %v1964_v51 }
 0x593   : > { %v2058_v52 = vmul.f32 %v1981_v27, %v1962_v25  ;;  %v2222_v27 = vld [vmem:[%s4915_s8 + $0x18] sm:$0xff] }
 0x595   : > { %v1996_v32 = vpop.permute.xlu1 %1995 }
 0x596   : > { %v2061_v43 = vmul.f32 %v1996_v32, %v1965_v61  ;;  %v1986_v53 = vpop.permute.xlu0 %1985 }
 0x597   : > { %v2059_v0 = vmul.f32 %v1986_v53, %v1963_v44 }
 0x598   : > { %v2075_v2 = vpack.c.bf16 %v2061_v43, %v2060_v50 }
 0x599   : > { %v2006_v41 = vpop.permute.xlu1 %2005  ;;  %v2074_v34 = vpack.c.bf16 %v2059_v0, %v2058_v52  ;;  %v2229_v0 = vld [vmem:[%s4915_s8 + $0x50] sm:$0xff] }
 0x59a   : > { %v2063_v4 = vmul.f32 %v2006_v41, %v1967_v30  ;;  %v2001_v49 = vpop.permute.xlu0 %2000  ;;  %v2227_v41 = vld [vmem:[%s4915_s8 + $0x40] sm:$0xff] }
 0x59b   : > { %v2062_v22 = vmul.f32 %v2001_v49, %v1966_v26  ;;  %3499 = vmatprep.mubr.msk.bf16.mxu0 %vm872_vm4, %v2074_v34 }
 0x59c   : > { %3500 = vmatmul.mubr.msk.bf16.vlgmr.msra.gmra.mxu0 %vm872_vm4, %v2075_v2 }
 0x59d   : > { %v2076_v15 = vpack.c.bf16 %v2063_v4, %v2062_v22  ;;  %v2016_v20 = vpop.permute.xlu1 %2015  ;;  %v2230_v22 = vld [vmem:[%s4915_s8 + $0x58] sm:$0xff] }
 0x59e   : > { %v2065_v1 = vmul.f32 %v2016_v20, %v1969_v40  ;;  %v2011_v42 = vpop.permute.xlu0 %2010 }
 0x59f   : > { %v2064_v6 = vmul.f32 %v2011_v42, %v1968_v5  ;;  %3503 = vmatprep.mubr.msk.bf16.mxu0 %vm872_vm4, %v2076_v15  ;;  %v2220_v15 = vld [vmem:[%s4915_s8 + $0x8] sm:$0xff] }
 0x5a1   : > { %v2077_v12 = vpack.c.bf16 %v2065_v1, %v2064_v6  ;;  %v2026_v8 = vpop.permute.xlu1 %2025  ;;  %v2228_v1 = vld [vmem:[%s4915_s8 + $0x48] sm:$0xff] }
 0x5a2   : > { %v2067_v45 = vmul.f32 %v2026_v8, %v1971_v39  ;;  %v2021_v31 = vpop.permute.xlu0 %2020 }
 0x5a3   : > { %v2066_v48 = vmul.f32 %v2021_v31, %v1970_v19  ;;  %v2225_v31 = vld [vmem:[%s4915_s8 + $0x30] sm:$0xff] }
 0x5a4   : > { %3504 = vmatmul.mubr.msk.bf16.gmra.mxu0 %vm872_vm4, %v2077_v12 }
 0x5a5   : > { %v2036_v35 = vpop.permute.xlu1 %2035  ;;  %v2078_v47 = vpack.c.bf16 %v2067_v45, %v2066_v48 }
 0x5a6   : > { %v2069_v62 = vmul.f32 %v2036_v35, %v1973_v29  ;;  %v2031_v36 = vpop.permute.xlu0 %2030  ;;  %v2226_v29 = vld [vmem:[%s4915_s8 + $0x38] sm:$0xff] }
 0x5a7   : > { %v2068_v63 = vmul.f32 %v2031_v36, %v1972_v17  ;;  %3507 = vmatprep.mubr.msk.bf16.mxu1 %vm872_vm4, %v2078_v47 }
 0x5a9   : > { %v2079_v10 = vpack.c.bf16 %v2069_v62, %v2068_v63  ;;  %v2046_v58 = vpop.permute.xlu1 %2045 }
 0x5aa   : > { %v2071_v11 = vmul.f32 %v2046_v58, %v1975_v21  ;;  %v2041_v46 = vpop.permute.xlu0 %2040 }
 0x5ab   : > { %v2070_v3 = vmul.f32 %v2041_v46, %v1974_v24  ;;  %3508 = vmatmul.mubr.msk.bf16.vlgmr.msra.gmra.mxu1 %vm872_vm4, %v2079_v10  ;;  %v2233_v24 = vld [vmem:[%s4915_s8 + $0x70] sm:$0xff]  ;;  %v2234_v10 = vld [vmem:[%s4915_s8 + $0x78] sm:$0xff] }
 0x5ac   : > { %3516 = vmatpush3.bf16.msra.mxu1 %v4584_v13 }
 0x5ad   : > { %v2080_v7 = vpack.c.bf16 %v2071_v11, %v2070_v3  ;;  %v2056_v37 = vpop.permute.xlu1 %2055  ;;  %3517 = vmatprep.subr.bf16.mxu1 %v3734_v57 }
 0x5ae   : > { %v2073_v14 = vmul.f32 %v2056_v37, %v1977_v23  ;;  %v2051_v18 = vpop.permute.xlu0 %2050  ;;  %v2224_v37 = vld [vmem:[%s4915_s8 + $0x28] sm:$0xff] }
 0x5af   : > { %v2072_v16 = vmul.f32 %v2051_v18, %v1976_v33  ;;  %3511 = vmatprep.mubr.msk.bf16.mxu1 %vm872_vm4, %v2080_v7  ;;  %v2223_v7 = vld [vmem:[%s4915_s8 + $0x20] sm:$0xff] }
 0x5b0   : > { %3518 = vmatpush3.bf16.msra.mxu1 %v3734_v57 }
 0x5b1   : > { %v2081_v38 = vpack.c.bf16 %v2073_v14, %v2072_v16 }
 0x5b3   : > { %3512 = vmatmul.mubr.msk.bf16.gmra.mxu1 %vm872_vm4, %v2081_v38 }
 0x65c   : > { %v3501_v9 = vpop.f32.mrf.mxu0 }
 0x65d   : > { %v2237_v55 = vmul.f32 %v3501_v9, %v2221_v54  ;;  %v2231_v54 = vld [vmem:[%s4915_s8 + $0x60] sm:$0xff] }
 0x65e   : > { %v2156_v56 = vpop.f32.mrf.mxu0 }
 0x65f   : > { %v2257_v13 = vsel %vm872_vm4, %v2237_v55, 0.0  ;;  %v2235_v59 = vmul.f32 %v2219_v28, %v2156_v56 }
 0x660   : > { %2258 = vadd.xlane.f32.xlu0 %v2257_v13  ;;  %v3502_v60 = vpop.f32.mrf.mxu0 }
 0x661   : > { %v2251_v25 = vsel %vm872_vm4, %v2235_v59, 0.0  ;;  %v2238_v44 = vmul.f32 %v3502_v60, %v2222_v27  ;;  %v2578_v32 = vpack.c.bf16 %v3502_v60, %v3501_v9  ;;  %v2232_v9 = vld [vmem:[%s4915_s8 + $0x68] sm:$0xff] }
 0x662   : > { %v2159_v51 = vpop.f32.mrf.mxu0  ;;  %v3735_v27 = vld [vmem:[%s4954_s30 + $0x8] sm:$0xff]  }
 0x663   : > { %v2577_v61 = vpack.c.bf16 %v2159_v51, %v2156_v56  ;;  %v2260_v53 = vsel %vm872_vm4, %v2238_v44, 0.0  ;;  %v2236_v39 = vmul.f32 %v2220_v15, %v2159_v51  ;;  %3535 = vmatprep.subr.bf16.mxu0 %v3735_v27  ;;  %v3736_v51 = vld [vmem:[%s4954_s30] sm:$0xff]  }
 0x664   : > { %2252 = vadd.xlane.f32.xlu0 %v2251_v25  ;;  %v3505_v50 = vpop.f32.mrf.mxu0  ;;  %3536 = vmatpush3.bf16.msra.mxu0 %v3735_v27  ;;  %v2307_v25 = vpop.permute.xlu1 %2306 }
 0x665   : > { %3519 = vmatprep.mubr.msk.bf16.mxu1 %vm872_vm4, %v2577_v61  ;;  %v2241_v47 = vmul.f32 %v3505_v50, %v2225_v31  ;;  %v2254_v62 = vsel %vm872_vm4, %v2236_v39, 0.0  ;;  %3537 = vmatprep.subr.bf16.mxu0 %v3736_v51  ;;  %v2311_v61 = vpop.permute.xlu0 %2310 }
 0x666   : > { %v2172_v43 = vpop.f32.mrf.mxu0  ;;  %3520 = vmatmul.mubr.msk.bf16.vlgmr.msra.gmra.mxu1 %vm872_vm4, %v2578_v32 }
 0x667   : > { %v2269_v11 = vsel %vm872_vm4, %v2241_v47, 0.0  ;;  %v2239_v38 = vmul.f32 %v2223_v7, %v2172_v43 }
 0x668   : > { %2261 = vadd.xlane.f32.xlu0 %v2260_v53  ;;  %v3506_v52 = vpop.f32.mrf.mxu0  ;;  %3538 = vmatpush3.bf16.msra.mxu0 %v3736_v51  ;;  %v2315_v32 = vpop.permute.xlu1 %2314 }
 0x669   : > { %v2580_v34 = vpack.c.bf16 %v3506_v52, %v3505_v50  ;;  %v2242_v63 = vmul.f32 %v3506_v52, %v2226_v29  ;;  %v2263_v28 = vsel %vm872_vm4, %v2239_v38, 0.0  ;;  %v2323_v44 = vpop.permute.xlu0 %2322 }
 0x66a   : > { %v2175_v30 = vpop.f32.mrf.mxu0 }
 0x66b   : > { %v2579_v2 = vpack.c.bf16 %v2175_v30, %v2172_v43  ;;  %v3509_v26 = vpop.f32.mrf.mxu1  ;;  %v2272_v3 = vsel %vm872_vm4, %v2242_v63, 0.0  ;;  %v2240_v57 = vmul.f32 %v2224_v37, %v2175_v30 }
 0x66c   : > { %v2245_v4 = vmul.f32 %v3509_v26, %v2229_v0  ;;  %v2319_v43 = vpop.permute.xlu1 %2318 }
 0x66d   : > { %v2188_v49 = vpop.f32.mrf.mxu1  ;;  %3523 = vmatprep.mubr.msk.bf16.mxu1 %vm872_vm4, %v2579_v2  ;;  %v2266_v55 = vsel %vm872_vm4, %v2240_v57, 0.0  ;;  %v2331_v50 = vpop.permute.xlu0 %2330 }
 0x66e   : > { %3524 = vmatmul.mubr.msk.bf16.gmra.mxu1 %vm872_vm4, %v2580_v34  ;;  %v2281_v40 = vsel %vm872_vm4, %v2245_v4, 0.0  ;;  %v2243_v5 = vmul.f32 %v2227_v41, %v2188_v49 }
 0x66f   : > { %2282 = vadd.xlane.f32.xlu1 %v2281_v40  ;;  %v3510_v20 = vpop.f32.mrf.mxu1 }
 0x670   : > { %v2246_v42 = vmul.f32 %v3510_v20, %v2230_v22  ;;  %v2275_v12 = vsel %vm872_vm4, %v2243_v5, 0.0  ;;  %v2582_v17 = vpack.c.bf16 %v3510_v20, %v3509_v26  ;;  %v2327_v52 = vpop.permute.xlu1 %2326 }
 0x671   : > { %v2191_v6 = vpop.f32.mrf.mxu1  ;;  %v2339_v53 = vpop.permute.xlu0 %2338 }
 0x672   : > { %v2581_v19 = vpack.c.bf16 %v2191_v6, %v2188_v49  ;;  %v2284_v8 = vsel %vm872_vm4, %v2246_v42, 0.0  ;;  %v2244_v45 = vmul.f32 %v2228_v1, %v2191_v6 }
 0x673   : > { %2276 = vadd.xlane.f32.xlu1 %v2275_v12  ;;  %2285 = vadd.xlane.f32.xlu0 %v2284_v8  ;;  %v3513_v48 = vpop.f32.mrf.mxu1 }
 0x674   : > { %3527 = vmatprep.mubr.msk.bf16.mxu1 %vm872_vm4, %v2581_v19  ;;  %v2278_v36 = vsel %vm872_vm4, %v2244_v45, 0.0  ;;  %v2249_v23 = vmul.f32 %v3513_v48, %v2233_v24  ;;  %v2335_v30 = vpop.permute.xlu1 %2334 }
 0x675   : > { %v2204_v35 = vpop.f32.mrf.mxu1  ;;  %v2347_v0 = vpop.permute.xlu0 %2346 }
 0x676   : > { %3528 = vmatmul.mubr.msk.bf16.gmra.mxu1 %vm872_vm4, %v2582_v17  ;;  %v2293_v18 = vsel %vm872_vm4, %v2249_v23, 0.0  ;;  %v2247_v56 = vmul.f32 %v2231_v54, %v2204_v35 }
 0x677   : > { %2255 = vadd.xlane.f32.xlu1 %v2254_v62  ;;  %2279 = vadd.xlane.f32.xlu0 %v2278_v36  ;;  %v3514_v21 = vpop.f32.mrf.mxu1 }
 0x678   : > { %v2250_v33 = vmul.f32 %v3514_v21, %v2234_v10  ;;  %v2584_v14 = vpack.c.bf16 %v3514_v21, %v3513_v48  ;;  %v2287_v59 = vsel %vm872_vm4, %v2247_v56, 0.0  ;;  %v2343_v26 = vpop.permute.xlu1 %2342 }
 0x679   : > { %v2207_v58 = vpop.f32.mrf.mxu1  ;;  %v2355_v2 = vpop.permute.xlu0 %2354 }
 0x67a   : > { %v2583_v46 = vpack.c.bf16 %v2207_v58, %v2204_v35  ;;  %v2296_v16 = vsel %vm872_vm4, %v2250_v33, 0.0  ;;  %v2248_v13 = vmul.f32 %v2232_v9, %v2207_v58 }
 0x67b   : > { %2270 = vadd.xlane.f32.xlu1 %v2269_v11  ;;  %2273 = vadd.xlane.f32.xlu0 %v2272_v3 }
 0x67c   : > { %3531 = vmatprep.mubr.msk.bf16.mxu1 %vm872_vm4, %v2583_v46  ;;  %v2290_v60 = vsel %vm872_vm4, %v2248_v13, 0.0  ;;  %v2351_v34 = vpop.permute.xlu1 %2350 }
 0x67d   : > { %v2363_v41 = vpop.permute.xlu0 %2362 }
 0x67e   : > { %3532 = vmatmul.mubr.msk.bf16.gmra.mxu1 %vm872_vm4, %v2584_v14 }
 0x67f   : > { %2294 = vadd.xlane.f32.xlu1 %v2293_v18  ;;  %2297 = vadd.xlane.f32.xlu0 %v2296_v16  ;;  %v3217_v18 = vld [vmem:[%s4955_s17] ss:$0 sm:$0xff] }
 0x680   : > { %v2359_v22 = vpop.permute.xlu1 %2358 }
 0x683   : > { %2264 = vadd.xlane.f32.xlu1 %v2263_v28  ;;  %2267 = vadd.xlane.f32.xlu0 %v2266_v55 }
 0x684   : > { %v2367_v5 = vpop.permute.xlu1 %2366 }
 0x687   : > { %2288 = vadd.xlane.f32.xlu1 %v2287_v59  ;;  %2291 = vadd.xlane.f32.xlu0 %v2290_v60 }
 0x6e9   : > { %v2259_v4 = vpop.xlane.xlu0 %2258 }
 0x6ea   : > { %v2386_v49 = vadd.f32 %v2315_v32, %v2259_v4 }
 0x6ec   : > { %2423 = vperm.xlu0 %3729, %v2386_v49  }
 0x6ed   : > { %v2253_v40 = vpop.xlane.xlu0 %2252 }
 0x6ee   : > { %v2384_v39 = vadd.f32 %v2307_v25, %v2253_v40 }
 0x6f1   : > { %v2262_v15 = vpop.xlane.xlu0 %2261 }
 0x6f2   : > { %v2387_v45 = vadd.f32 %v2319_v43, %v2262_v15 }
 0x6f8   : > { %v2283_v20 = vpop.xlane.xlu1 %2282 }
 0x6f9   : > { %v2394_v1 = vadd.f32 %v2347_v0, %v2283_v20 }
 0x6fb   : > { %2447 = vperm.xlu0 %3729, %v2394_v1  }
 0x6fc   : > { %v2277_v42 = vpop.xlane.xlu1 %2276  ;;  %v2286_v6 = vpop.xlane.xlu0 %2285 }
 0x6fd   : > { %v2392_v19 = vadd.f32 %v2339_v53, %v2277_v42  ;;  %v2395_v29 = vadd.f32 %v2351_v34, %v2286_v6 }
 0x6ff   : > { %2441 = vperm.xlu1 %3730, %v2392_v19   ;;  %2417 = vperm.xlu0 %3729, %v2384_v39  }
 0x700   : > { %v2256_v12 = vpop.xlane.xlu1 %2255  ;;  %v2280_v8 = vpop.xlane.xlu0 %2279 }
 0x701   : > { %v2385_v47 = vadd.f32 %v2311_v61, %v2256_v12  ;;  %v2393_v21 = vadd.f32 %v2343_v26, %v2280_v8 }
 0x703   : > { %2426 = vperm.xlu1 %3730, %v2387_v45  }
 0x704   : > { %v2271_v31 = vpop.xlane.xlu1 %2270  ;;  %v2274_v48 = vpop.xlane.xlu0 %2273 }
 0x705   : > { %v2390_v11 = vadd.f32 %v2331_v50, %v2271_v31  ;;  %v2391_v3 = vadd.f32 %v2335_v30, %v2274_v48 }
 0x707   : > { %2450 = vperm.xlu1 %3730, %v2395_v29  }
 0x708   : > { %v2295_v17 = vpop.xlane.xlu1 %2294  ;;  %v2298_v35 = vpop.xlane.xlu0 %2297 }
 0x709   : > { %v4680_v62 = vadd.f32 %v2363_v41, %v2295_v17  ;;  %v4682_v36 = vadd.f32 %v2367_v5, %v2298_v35 }
 0x70b   : > { %2420 = vperm.xlu1 %3730, %v2385_v47  }
 0x70c   : > { %v2265_v63 = vpop.xlane.xlu1 %2264  ;;  %v2268_v10 = vpop.xlane.xlu0 %2267 }
 0x70d   : > { %v2388_v24 = vadd.f32 %v2323_v44, %v2265_v63  ;;  %v2389_v23 = vadd.f32 %v2327_v52, %v2268_v10 }
 0x70f   : > { %2429 = vperm.xlu0 %3729, %v2388_v24   ;;  %2444 = vperm.xlu1 %3730, %v2393_v21  }
 0x710   : > { %v2289_v58 = vpop.xlane.xlu1 %2288  ;;  %v2292_v33 = vpop.xlane.xlu0 %2291 }
 0x711   : > { %v2396_v46 = vadd.f32 %v2355_v2, %v2289_v58  ;;  %v2397_v7 = vadd.f32 %v2359_v22, %v2292_v33 }
 0x713   : > { %2453 = vperm.xlu0 %3729, %v2396_v46   ;;  %2435 = vperm.xlu1 %3730, %v2390_v11   ;;  %v3228_v46 = vld [vmem:[%s4956_s12] ss:$0 sm:$0xff] }
 0x717   : > { %2438 = vperm.xlu0 %3729, %v2391_v3   ;;  %2432 = vperm.xlu1 %3730, %v2389_v23  }
 0x71b   : > { %2456 = vperm.xlu1 %3730, %v2397_v7  }
 0x726   : > { %v3521_v37 = vpop.f32.mrf.mxu1 }
 0x727   : > { %v2675_v54 = vadd.f32 %v3521_v37, %v3217_v18 }
 0x728   : > { %v2666_v14 = vpop.f32.mrf.mxu1 }
 0x729   : > { %v2667_v38 = vadd.f32 %v3217_v18, %v2666_v14  ;;  %v2731_v60 = vmax.f32 %v2675_v54, 0.0 }
 0x72a   : > { %v3522_v16 = vpop.f32.mrf.mxu1 }
 0x72b   : > { %v2678_v57 = vadd.f32 %v3522_v16, %v3217_v18  ;;  %v2729_v13 = vmax.f32 %v2667_v38, 0.0 }
 0x72c   : > { %v2669_v9 = vpop.f32.mrf.mxu1 }
 0x72d   : > { %v2670_v28 = vadd.f32 %v3217_v18, %v2669_v9  ;;  %v2732_v55 = vmax.f32 %v2678_v57, 0.0 }
 0x72e   : > { %v3525_v56 = vpop.f32.mrf.mxu1 }
 0x72f   : > { %v2730_v59 = vmax.f32 %v2670_v28, 0.0  ;;  %v2746_v61 = vpack.c.bf16 %v2732_v55, %v2731_v60  ;;  %v2691_v50 = vadd.f32 %v3525_v56, %v3217_v18 }
 0x730   : > { %v2682_v27 = vpop.f32.mrf.mxu1 }
 0x731   : > { %v2745_v51 = vpack.c.bf16 %v2730_v59, %v2729_v13  ;;  %v2683_v44 = vadd.f32 %v3217_v18, %v2682_v27  ;;  %v2735_v26 = vmax.f32 %v2691_v50, 0.0 }
 0x732   : > { %v3526_v25 = vpop.f32.mrf.mxu1 }
 0x733   : > { %v2694_v32 = vadd.f32 %v3526_v25, %v3217_v18  ;;  %3539 = vmatprep.mubr.msk.bf16.mxu0 %vm872_vm4, %v2745_v51  ;;  %v2733_v30 = vmax.f32 %v2683_v44, 0.0 }
 0x734   : > { %v2685_v43 = vpop.f32.mrf.mxu1  ;;  %3540 = vmatmul.mubr.msk.bf16.vlgmr.msra.gmra.mxu0 %vm872_vm4, %v2746_v61 }
 0x735   : > { %v2686_v53 = vadd.f32 %v3217_v18, %v2685_v43  ;;  %v2736_v52 = vmax.f32 %v2694_v32, 0.0 }
 0x736   : > { %v3529_v0 = vpop.f32.mrf.mxu1 }
 0x737   : > { %v2734_v2 = vmax.f32 %v2686_v53, 0.0  ;;  %v2748_v4 = vpack.c.bf16 %v2736_v52, %v2735_v26  ;;  %v2707_v5 = vadd.f32 %v3529_v0, %v3217_v18 }
 0x738   : > { %v2698_v41 = vpop.f32.mrf.mxu1 }
 0x739   : > { %v2747_v34 = vpack.c.bf16 %v2734_v2, %v2733_v30  ;;  %v2699_v22 = vadd.f32 %v3217_v18, %v2698_v41  ;;  %v2739_v19 = vmax.f32 %v2707_v5, 0.0 }
 0x73a   : > { %v3530_v49 = vpop.f32.mrf.mxu1 }
 0x73b   : > { %v2710_v40 = vadd.f32 %v3530_v49, %v3217_v18  ;;  %3543 = vmatprep.mubr.msk.bf16.mxu0 %vm872_vm4, %v2747_v34  ;;  %v2737_v6 = vmax.f32 %v2699_v22, 0.0 }
 0x73c   : > { %v2701_v15 = vpop.f32.mrf.mxu1  ;;  %3544 = vmatmul.mubr.msk.bf16.gmra.mxu0 %vm872_vm4, %v2748_v4 }
 0x73d   : > { %v2702_v20 = vadd.f32 %v3217_v18, %v2701_v15  ;;  %v2740_v1 = vmax.f32 %v2710_v40, 0.0 }
 0x73e   : > { %v3533_v42 = vpop.f32.mrf.mxu1 }
 0x73f   : > { %v2738_v39 = vmax.f32 %v2702_v20, 0.0  ;;  %v2750_v45 = vpack.c.bf16 %v2740_v1, %v2739_v19  ;;  %v2723_v17 = vadd.f32 %v3533_v42, %v3217_v18 }
 0x740   : > { %v2714_v12 = vpop.f32.mrf.mxu1 }
 0x741   : > { %v2749_v8 = vpack.c.bf16 %v2738_v39, %v2737_v6  ;;  %v2715_v48 = vadd.f32 %v3217_v18, %v2714_v12  ;;  %v2743_v10 = vmax.f32 %v2723_v17, 0.0 }
 0x742   : > { %v3534_v31 = vpop.f32.mrf.mxu1 }
 0x743   : > { %v2726_v29 = vadd.f32 %v3534_v31, %v3217_v18  ;;  %3547 = vmatprep.mubr.msk.bf16.mxu0 %vm872_vm4, %v2749_v8  ;;  %v2741_v21 = vmax.f32 %v2715_v48, 0.0 }
 0x744   : > { %v2717_v35 = vpop.f32.mrf.mxu1  ;;  %3548 = vmatmul.mubr.msk.bf16.gmra.mxu0 %vm872_vm4, %v2750_v45 }
 0x745   : > { %v2718_v47 = vadd.f32 %v3217_v18, %v2717_v35  ;;  %v2744_v63 = vmax.f32 %v2726_v29, 0.0 }
 0x747   : > { %v2742_v24 = vmax.f32 %v2718_v47, 0.0  ;;  %v2752_v11 = vpack.c.bf16 %v2744_v63, %v2743_v10 }
 0x749   : > { %v2751_v58 = vpack.c.bf16 %v2742_v24, %v2741_v21  ;;  %v2464_v24 = vlaneseq }
 0x74b   : > { %3551 = vmatprep.mubr.msk.bf16.mxu0 %vm872_vm4, %v2751_v58 }
 0x74c   : > { %3552 = vmatmul.mubr.msk.bf16.gmra.mxu0 %vm872_vm4, %v2752_v11  ;;  %vm2573_vm4 = vcmask 1048512  }
 0x767   : > { %v2424_v48 = vpop.permute.xlu0 %2423 }
 0x776   : > { %v4768_v17 = vpop.permute.xlu0 %2447 }
 0x77a   : > { %v4764_v45 = vpop.permute.xlu1 %2441  ;;  %v2418_v47 = vpop.permute.xlu0 %2417 }
 0x77e   : > { %v2427_v31 = vpop.permute.xlu1 %2426 }
 0x782   : > { %v4766_v29 = vpop.permute.xlu1 %2450 }
 0x786   : > { %v2421_v35 = vpop.permute.xlu1 %2420 }
 0x78a   : > { %v4770_v63 = vpop.permute.xlu1 %2444  ;;  %v2430_v21 = vpop.permute.xlu0 %2429 }
 0x78e   : > { %v4772_v10 = vpop.permute.xlu1 %2435  ;;  %v4774_v58 = vpop.permute.xlu0 %2453 }
 0x792   : > { %v2433_v11 = vpop.permute.xlu1 %2432 }
 0x7f4   : > { %v3541_v3 = vpop.f32.mrf.mxu0 }
 0x7f5   : > { %v4698_v23 = vadd.f32 %v3541_v3, %v3228_v46  ;;  %v4781_v3 = vshrl.u32 %v2464_v24, 7 }
 0x7f6   : > { %v2834_v33 = vpop.f32.mrf.mxu0 }
 0x7f7   : > { %v4700_v7 = vadd.f32 %v3228_v46, %v2834_v33  ;;  %v2899_v37 = vmul.f32 %v4698_v23, %v4698_v23 }
 0x7f8   : > { %v3542_v14 = vpop.f32.mrf.mxu0 }
 0x7f9   : > { %2917 = vadd.xlane.f32.xlu0 %v2899_v37  ;;  %v4704_v16 = vadd.f32 %v3542_v14, %v3228_v46  ;;  %v2897_v57 = vmul.f32 %v4700_v7, %v4700_v7 }
 0x7fa   : > { %v2837_v18 = vpop.f32.mrf.mxu0 }
 0x7fb   : > { %v4706_v38 = vadd.f32 %v3228_v46, %v2837_v18  ;;  %v2900_v56 = vmul.f32 %v4704_v16, %v4704_v16 }
 0x7fc   : > { %v3545_v54 = vpop.f32.mrf.mxu0 }
 0x7fd   : > { %v4710_v9 = vadd.f32 %v3545_v54, %v3228_v46  ;;  %2913 = vadd.xlane.f32.xlu0 %v2897_v57  ;;  %v2898_v28 = vmul.f32 %v4706_v38, %v4706_v38 }
 0x7fe   : > { %v2850_v55 = vpop.f32.mrf.mxu0 }
 0x7ff   : > { %2915 = vadd.xlane.f32.xlu1 %v2898_v28  ;;  %v4716_v59 = vadd.f32 %v3228_v46, %v2850_v55  ;;  %v2903_v27 = vmul.f32 %v4710_v9, %v4710_v9  ;;  %v4788_v28 = vpop.permute.xlu1 %2456 }
 0x800   : > { %v3546_v13 = vpop.f32.mrf.mxu0 }
 0x801   : > { %v4718_v60 = vadd.f32 %v3546_v13, %v3228_v46  ;;  %2919 = vadd.xlane.f32.xlu0 %v2900_v56  ;;  %v2901_v50 = vmul.f32 %v4716_v59, %v4716_v59 }
 0x802   : > { %v2853_v51 = vpop.f32.mrf.mxu0 }
 0x803   : > { %v4722_v61 = vadd.f32 %v3228_v46, %v2853_v51  ;;  %2925 = vadd.xlane.f32.xlu1 %v2903_v27  ;;  %v2904_v25 = vmul.f32 %v4718_v60, %v4718_v60 }
 0x804   : > { %v3549_v44 = vpop.f32.mrf.mxu0 }
 0x805   : > { %v4726_v32 = vadd.f32 %v3549_v44, %v3228_v46  ;;  %2927 = vadd.xlane.f32.xlu0 %v2904_v25  ;;  %v2902_v53 = vmul.f32 %v4722_v61, %v4722_v61 }
 0x806   : > { %v2866_v43 = vpop.f32.mrf.mxu0 }
 0x807   : > { %2921 = vadd.xlane.f32.xlu1 %v2901_v50  ;;  %v4732_v0 = vadd.f32 %v3228_v46, %v2866_v43  ;;  %v2907_v2 = vmul.f32 %v4726_v32, %v4726_v32 }
 0x808   : > { %v3550_v52 = vpop.f32.mrf.mxu0 }
 0x809   : > { %v4734_v30 = vadd.f32 %v3550_v52, %v3228_v46  ;;  %2923 = vadd.xlane.f32.xlu0 %v2902_v53  ;;  %v2905_v22 = vmul.f32 %v4732_v0, %v4732_v0 }
 0x80a   : > { %v2869_v26 = vpop.f32.mrf.mxu0 }
 0x80b   : > { %v4738_v41 = vadd.f32 %v3228_v46, %v2869_v26  ;;  %2933 = vadd.xlane.f32.xlu1 %v2907_v2  ;;  %v2908_v34 = vmul.f32 %v4734_v30, %v4734_v30 }
 0x80c   : > { %v3553_v4 = vpop.f32.mrf.mxu0 }
 0x80d   : > { %v4742_v49 = vadd.f32 %v3553_v4, %v3228_v46  ;;  %2935 = vadd.xlane.f32.xlu0 %v2908_v34  ;;  %v2906_v5 = vmul.f32 %v4738_v41, %v4738_v41 }
 0x80e   : > { %v2882_v40 = vpop.f32.mrf.mxu0 }
 0x80f   : > { %2929 = vadd.xlane.f32.xlu1 %v2905_v22  ;;  %v4748_v20 = vadd.f32 %v3228_v46, %v2882_v40  ;;  %v2911_v42 = vmul.f32 %v4742_v49, %v4742_v49 }
 0x810   : > { %v3554_v15 = vpop.f32.mrf.mxu0 }
 0x811   : > { %v4750_v1 = vadd.f32 %v3554_v15, %v3228_v46  ;;  %2931 = vadd.xlane.f32.xlu0 %v2906_v5  ;;  %v2909_v12 = vmul.f32 %v4748_v20, %v4748_v20 }
 0x812   : > { %v2885_v6 = vpop.f32.mrf.mxu0 }
 0x813   : > { %v4754_v39 = vadd.f32 %v3228_v46, %v2885_v6  ;;  %2941 = vadd.xlane.f32.xlu1 %v2911_v42  ;;  %v2912_v19 = vmul.f32 %v4750_v1, %v4750_v1  ;;  %v4779_v46 = vpop.permute.xlu0 %2438 }
 0x815   : > { %2943 = vadd.xlane.f32.xlu0 %v2912_v19  ;;  %v2910_v8 = vmul.f32 %v4754_v39, %v4754_v39 }
 0x817   : > { %2937 = vadd.xlane.f32.xlu1 %v2909_v12 }
 0x819   : > { %2939 = vadd.xlane.f32.xlu0 %v2910_v8 }
 0x828   : > { %2462 = vperm.xlu1 %3730, %v4682_v36   ;;  %v4776_v36 = vand.u32 127, %v2464_v24 }
 0x82a   : > { %v2477_v37 = vadd.s32 4294967280, %v4776_v36  ;;  %v2468_v18 = vsub.s32 %v4776_v36, %v4781_v3  ;;  %v2484_v54 = vadd.s32 4294967272, %v4776_v36  ;;  %v2491_v13 = vadd.s32 4294967264, %v4776_v36 }
 0x82b   : > { %v2498_v25 = vadd.s32 4294967256, %v4776_v36  ;;  %v2505_v5 = vadd.s32 4294967248, %v4776_v36  ;;  %v2512_v12 = vadd.s32 4294967240, %v4776_v36 }
 0x82c   : > { %v2480_v56 = vsub.s32 %v2477_v37, %v4781_v3  ;;  %v2469_v51 = vrot.slane %v2418_v47, %v2468_v18  ;;  %v2487_v50 = vsub.s32 %v2484_v54, %v4781_v3  ;;  %v2494_v26 = vsub.s32 %v2491_v13, %v4781_v3 }
 0x82d   : > { %v2501_v4 = vsub.s32 %v2498_v25, %v4781_v3  ;;  %v2508_v24 = vsub.s32 %v2505_v5, %v4781_v3 }
 0x82e   : > { %v2481_v2 = vrot.slane %v2424_v48, %v2480_v56  ;;  %v2488_v42 = vrot.slane %v2427_v31, %v2487_v50  ;;  %v2495_v19 = vrot.slane %v2430_v21, %v2494_v26  ;;  %v2519_v31 = vadd.s32 4294967232, %v4776_v36 }
 0x82f   : > { %2459 = vperm.xlu0 %3729, %v4680_v62   ;;  %v2470_v62 = vadd.s32 4294967288, %v4776_v36  ;;  %v2515_v21 = vsub.s32 %v2512_v12, %v4781_v3  ;;  %v2509_v56 = vrot.slane %v4772_v10, %v2508_v24  ;;  %v2533_v10 = vadd.s32 4294967216, %v4776_v36 }
 0x830   : > { %v2522_v25 = vsub.s32 %v2519_v31, %v4781_v3 }
 0x831   : > { %v2473_v33 = vsub.s32 %v2470_v62, %v4781_v3 }
 0x833   : > { %v2474_v55 = vrot.slane %v2421_v35, %v2473_v33  ;;  %v2502_v35 = vrot.slane %v2433_v11, %v2501_v4 }
 0x835   : > { %v2476_v53 = vsel %vm2475_vm6, %v2474_v55, %v2469_v51  ;;  %v2526_v55 = vadd.s32 4294967224, %v4776_v36 }
 0x836   : > { %v2483_v40 = vsel %vm2482_vm7, %v2481_v2, %v2476_v53 }
 0x837   : > { %v2490_v48 = vsel %vm2489_vm8, %v2488_v42, %v2483_v40  ;;  %v2529_v2 = vsub.s32 %v2526_v55, %v4781_v3 }
 0x882   : > { %v2918_v14 = vpop.xlane.xlu0 %2917 }
 0x883   : > { %v2947_v57 = vmax.f32 %v2918_v14, 1e-24  ;;  %v2497_v14 = vsel %vm2496_vm9, %v2495_v19, %v2490_v48  ;;  %v2540_v19 = vadd.s32 4294967208, %v4776_v36 }
 0x885   : > { %3769 = vrsqrt.f32 %v2947_v57  ;;  %v2504_v57 = vsel %vm2503_vm10, %v2502_v35, %v2497_v14  ;;  %v2547_v35 = vadd.s32 4294967200, %v4776_v36 }
 0x886   : > { %v2914_v27 = vpop.xlane.xlu0 %2913 }
 0x887   : > { %v2945_v44 = vmax.f32 %v2914_v27, 1e-24 }
 0x888   : > { %v2916_v43 = vpop.xlane.xlu1 %2915 }
 0x889   : > { %3771 = vrsqrt.f32 %v2945_v44  ;;  %v2946_v52 = vmax.f32 %v2916_v43, 1e-24  ;;  %v2511_v44 = vsel %vm2510_vm11, %v2509_v56, %v2504_v57  ;;  %v2516_v43 = vrot.slane %v4779_v46, %v2515_v21 }
 0x88a   : > { %v2920_v34 = vpop.xlane.xlu0 %2919  ;;  %v2550_v57 = vsub.s32 %v2547_v35, %v4781_v3 }
 0x88b   : > { %3773 = vrsqrt.f32 %v2946_v52  ;;  %v2948_v22 = vmax.f32 %v2920_v34, 1e-24  ;;  %v2518_v34 = vsel %vm2517_vm12, %v2516_v43, %v2511_v44 }
 0x88c   : > { %v2926_v15 = vpop.xlane.xlu1 %2925 }
 0x88d   : > { %3775 = vrsqrt.f32 %v2948_v22  ;;  %v2951_v6 = vmax.f32 %v2926_v15, 1e-24 }
 0x88e   : > { %v2928_v8 = vpop.xlane.xlu0 %2927 }
 0x88f   : > { %3777 = vrsqrt.f32 %v2951_v6  ;;  %v2952_v47 = vmax.f32 %v2928_v8, 1e-24  ;;  %v2536_v6 = vsub.s32 %v2533_v10, %v4781_v3  ;;  %v2530_v8 = vrot.slane %v4770_v63, %v2529_v2 }
 0x890   : > { %v2922_v62 = vpop.xlane.xlu1 %2921 }
 0x891   : > { %3779 = vrsqrt.f32 %v2952_v47  ;;  %v2949_v33 = vmax.f32 %v2922_v62, 1e-24  ;;  %v2537_v63 = vrot.slane %v4768_v17, %v2536_v6 }
 0x892   : > { %v3770_v37 = vpop.eup %3769  ;;  %v2924_v18 = vpop.xlane.xlu0 %2923 }
 0x893   : > { %v2979_v11 = vmul.f32 %v3770_v37, %v4698_v23  ;;  %3781 = vrsqrt.f32 %v2949_v33  ;;  %v2950_v54 = vmax.f32 %v2924_v18, 1e-24 }
 0x894   : > { %v2934_v13 = vpop.xlane.xlu1 %2933 }
 0x895   : > { %2995 = vst [vmem:[%s4066_s22 + $0x10] sm:$0xff] %v2979_v11  ;;  %3783 = vrsqrt.f32 %v2950_v54  ;;  %v2955_v27 = vmax.f32 %v2934_v13, 1e-24 }
 0x896   : > { %v3772_v51 = vpop.eup %3771  ;;  %v2936_v50 = vpop.xlane.xlu0 %2935 }
 0x897   : > { %v2977_v23 = vmul.f32 %v3772_v51, %v4700_v7  ;;  %3785 = vrsqrt.f32 %v2955_v27  ;;  %v2956_v53 = vmax.f32 %v2936_v50, 1e-24  ;;  %v2523_v7 = vrot.slane %v4764_v45, %v2522_v25 }
 0x898   : > { %v3774_v52 = vpop.eup %3773  ;;  %v2930_v26 = vpop.xlane.xlu1 %2929  ;;  %v2568_v27 = vadd.s32 4294967176, %v4776_v36  ;;  %v2551_v50 = vrot.slane %v4774_v58, %v2550_v57 }
 0x899   : > { %2993 = vst [vmem:[%s4066_s22] sm:$0xff] %v2977_v23  ;;  %v2978_v4 = vmul.f32 %v3774_v52, %v4706_v38  ;;  %3787 = vrsqrt.f32 %v2956_v53  ;;  %v2953_v22 = vmax.f32 %v2930_v26, 1e-24  ;;  %v2525_v38 = vsel %vm2524_vm13, %v2523_v7, %v2518_v34 }
 0x89a   : > { %v3776_v46 = vpop.eup %3775  ;;  %v2932_v40 = vpop.xlane.xlu0 %2931  ;;  %v2532_v24 = vsel %vm2531_vm14, %v2530_v8, %v2525_v38  ;;  %v2571_v23 = vsub.s32 %v2568_v27, %v4781_v3 }
 0x89b   : > { %2994 = vst [vmem:[%s4066_s22 + $0x8] sm:$0xff] %v2978_v4  ;;  %v2980_v5 = vmul.f32 %v3776_v46, %v4704_v16  ;;  %3789 = vrsqrt.f32 %v2953_v22  ;;  %v2954_v15 = vmax.f32 %v2932_v40, 1e-24  ;;  %v2539_v11 = vsel %vm2538_vm15, %v2537_v63, %v2532_v24 }
 0x89c   : > { %v3778_v42 = vpop.eup %3777  ;;  %v2942_v12 = vpop.xlane.xlu1 %2941 }
 0x89d   : > { %2996 = vst [vmem:[%s4066_s22 + $0x18] sm:$0xff] %v2980_v5  ;;  %v2983_v45 = vmul.f32 %v3778_v42, %v4710_v9  ;;  %3791 = vrsqrt.f32 %v2954_v15  ;;  %v2959_v16 = vmax.f32 %v2942_v12, 1e-24  ;;  %v2543_v9 = vsub.s32 %v2540_v19, %v4781_v3 }
 0x89e   : > { %v3780_v48 = vpop.eup %3779  ;;  %v2944_v47 = vpop.xlane.xlu0 %2943 }
 0x89f   : > { %2999 = vst [vmem:[%s4066_s22 + $0x30] sm:$0xff] %v2983_v45  ;;  %v2984_v62 = vmul.f32 %v3780_v48, %v4718_v60  ;;  %3793 = vrsqrt.f32 %v2959_v16  ;;  %v2960_v33 = vmax.f32 %v2944_v47, 1e-24  ;;  %v2554_v60 = vadd.s32 4294967192, %v4776_v36 }
 0x8a0   : > { %v3782_v37 = vpop.eup %3781  ;;  %v2938_v31 = vpop.xlane.xlu1 %2937  ;;  %v2544_v13 = vrot.slane %v4766_v29, %v2543_v9 }
 0x8a1   : > { %3000 = vst [vmem:[%s4066_s22 + $0x38] sm:$0xff] %v2984_v62  ;;  %v2981_v14 = vmul.f32 %v3782_v37, %v4716_v59  ;;  %3795 = vrsqrt.f32 %v2960_v33  ;;  %v2957_v21 = vmax.f32 %v2938_v31, 1e-24  ;;  %v2561_v59 = vadd.s32 4294967184, %v4776_v36 }
 0x8a2   : > { %v3784_v18 = vpop.eup %3783  ;;  %v2940_v54 = vpop.xlane.xlu0 %2939  ;;  %v2557_v44 = vsub.s32 %v2554_v60, %v4781_v3 }
 0x8a3   : > { %2997 = vst [vmem:[%s4066_s22 + $0x20] sm:$0xff] %v2981_v14  ;;  %v2982_v17 = vmul.f32 %v3784_v18, %v4722_v61  ;;  %3797 = vrsqrt.f32 %v2957_v21  ;;  %v2958_v55 = vmax.f32 %v2940_v54, 1e-24  ;;  %v2546_v61 = vsel %vm2545_vm0, %v2544_v13, %v2539_v11 }
 0x8a4   : > { %v3786_v56 = vpop.eup %3785  ;;  %v2564_v29 = vsub.s32 %v2561_v59, %v4781_v3  ;;  %v2463_v52 = vpop.permute.xlu1 %2462  ;;  %v2558_v2 = vrot.slane %v4788_v28, %v2557_v44 }
 0x8a5   : > { %2998 = vst [vmem:[%s4066_s22 + $0x28] sm:$0xff] %v2982_v17  ;;  %v2987_v51 = vmul.f32 %v3786_v56, %v4726_v32  ;;  %3799 = vrsqrt.f32 %v2958_v55  ;;  %v2553_v32 = vsel %vm2552_vm1, %v2551_v50, %v2546_v61  ;;  %v2572_v4 = vrot.slane %v2463_v52, %v2571_v23 }
 0x8a6   : > { %v3788_v25 = vpop.eup %3787  ;;  %v2560_v34 = vsel %vm2559_vm2, %v2558_v2, %v2553_v32 }
 0x8a7   : > { %3003 = vst [vmem:[%s4066_s22 + $0x50] sm:$0xff] %v2987_v51  ;;  %v2988_v43 = vmul.f32 %v3788_v25, %v4734_v30 }
 0x8a8   : > { %v3790_v36 = vpop.eup %3789 }
 0x8a9   : > { %3004 = vst [vmem:[%s4066_s22 + $0x58] sm:$0xff] %v2988_v43  ;;  %v2985_v53 = vmul.f32 %v3790_v36, %v4732_v0 }
 0x8aa   : > { %v3792_v10 = vpop.eup %3791  ;;  %v2460_v58 = vpop.permute.xlu0 %2459 }
 0x8ab   : > { %3001 = vst [vmem:[%s4066_s22 + $0x40] sm:$0xff] %v2985_v53  ;;  %v2986_v30 = vmul.f32 %v3792_v10, %v4738_v41  ;;  %v2565_v3 = vrot.slane %v2460_v58, %v2564_v29 }
 0x8ac   : > { %v3794_v26 = vpop.eup %3793 }
 0x8ad   : > { %3002 = vst [vmem:[%s4066_s22 + $0x48] sm:$0xff] %v2986_v30  ;;  %v2991_v0 = vmul.f32 %v3794_v26, %v4742_v49  ;;  %v2567_v22 = vsel %vm2566_vm3, %v2565_v3, %v2560_v34 }
 0x8ae   : > { %v3796_v46 = vpop.eup %3795  ;;  %v2574_v28 = vsel %vm2573_vm4, %v2572_v4, %v2567_v22 }
 0x8af   : > { %3007 = vst [vmem:[%s4066_s22 + $0x70] sm:$0xff] %v2991_v0  ;;  %v2992_v7 = vmul.f32 %v3796_v46, %v4750_v1  ;;  %2576 = vst [vmem:[%s4070_s18] sm:$0x1] %v2574_v28 }
 0x8b0   : > { %v3798_v40 = vpop.eup %3797 }
 0x8b1   : > { %3008 = vst [vmem:[%s4066_s22 + $0x78] sm:$0xff] %v2992_v7  ;;  %v2989_v41 = vmul.f32 %v3798_v40, %v4748_v20 }
 0x8b2   : > { %v3800_v5 = vpop.eup %3799 }
 0x8b3   : > { %3005 = vst [vmem:[%s4066_s22 + $0x60] sm:$0xff] %v2989_v41  ;;  %v2990_v15 = vmul.f32 %v3800_v5, %v4754_v39 }
 0x8b5   : > { %3006 = vst [vmem:[%s4066_s22 + $0x68] sm:$0xff] %v2990_v15 }
 0x8b6 PF: > { %s4957_s14 = sld [smem:[#allocation10_spill]]  ;;  %s3027_s16 = sshll.u32 %s4070_s18, 4  ;;  %s3028_s16 = int_to_ptr.vmem [resolvable:$true] %s3027_s16 }
 0x8b7   : > { %s4959_s29 = sld [smem:[#allocation22_spill]]  ;;  %s4960_s27 = sand.u32 1, %s3869_s19  }
 0x8b8   : > { %s3010_s28 = scalar_lea.sflag [#allocation6], %s4960_s27  ;;  %s3801_s21 = scalar_lea.vmem %s3028_s16, 16 }
 0x8b9   : > { %p3802_p2 = scmp.ne.s32.totalorder %s3028_s16, %s3801_s21  ;;  %s3899_s22 = smov [#allocation5]  }
 0x8ba   : > { %s3805_s17 = sshll.u32 %s3899_s22, 4  ;;  %s3806_s17 = int_to_ptr.vmem [resolvable:$false] %s3805_s17 }
 0x8bb   : > { %p3803_p4 = pnand %p3802_p2, %p4029_p3  ;;  %s3807_s26 = scalar_lea.vmem %s3806_s17, 32 }
 0x8bc   : > { %s3239_s23 = sshll.u32 %s4957_s14, 4  ;;  %p3808_p6 = scmp.lt.s32.totalorder %s3028_s16, %s3806_s17 }
 0x8bd   : > { %s3025_s13 = scalar_lea.hbm %s4959_s29, %s3239_s23  ;;  %p3804_p5 = pneg %p3803_p4 }
 0x8be   : > { %p3809_p7 = scmp.lt.s32.totalorder %s3807_s26, %s3801_s21 }
 0x8c0   : > { %p3810_p8 = por %p3809_p7, %p3808_p6 }
 0x8c2   : > { %p3811_p10 = pnand %p3810_p8, %p3804_p5 }
 0x8c4   : > { %3814 = shalt.err (!%p3811_p10)
}
 0x8c5   : > { %s3815_s11 = scalar_lea.hbm %s3025_s13, 16  ;;  %s3819_s14 = scalar_lea.hbm %s4959_s29, 32 }
 0x8c6   : > { %p3816_p11 = scmp.ne.s32.totalorder %s3025_s13, %s3815_s11  ;;  %p3820_p0 = scmp.lt.s32.totalorder %s3025_s13, %s4959_s29 }
 0x8c7   : > { %p3821_p1 = scmp.lt.s32.totalorder %s3819_s14, %s3815_s11 }
 0x8c8   : > { %p3817_p12 = pnand %p3816_p11, %p4029_p3 }
 0x8c9   : > { %p3822_p2 = por %p3821_p1, %p3820_p0 }
 0x8ca   : > { %p3818_p13 = pneg %p3817_p12 }
 0x8cc   : > { %p3823_p4 = pnand %p3822_p2, %p3818_p13 }
 0x8ce   : > { %3826 = shalt.err (!%p3823_p4)
}
 0x8cf   : > { %3568 = dma.vmem_to_hbm [thread:$0]  (%p4029_p3), %s3028_s16, 16, %s3025_s13, %s3010_s28  }
 0x8d0 PF: > { %s4961_s25 = sld [smem:[#allocation13_spill]] }
 0x8d1   : > { %s4962_s27 = sld [smem:[#allocation8_spill]] }
 0x8d6   : > { %p3574_p5 = scmp.ge.s32.totalorder %s4961_s25, 2 }
 0x8d7   : > { %s3042_s22 = sand.u32 1, %s4962_s27  }
 0x8d8   : > { %p3571_p6 = pnand %p3574_p5, %p4039_p9  ;;  %s3043_s17 = scalar_lea.sflag [#allocation6], %s3042_s22 }
 0x8da   : > { %p3572_p7 = pneg %p3571_p6 }
 0x8dc   : > { %3860 = dma.done.wait (%p3572_p7), %s3043_s17, 16  }
 0x8dd   : > { %3862 = vsyncadd (%p3572_p7), %s3043_s17, 4294967280  ;;  %s29_s25 = sadd.s32 1, %s4961_s25   ;;  %s4964_s26 = sld [smem:[#allocation9_spill]] }
 0x8de   : > { %p26_p8 = scmp.ge.s32.totalorder %s29_s25, 6   ;;  %s4965_s20 = sld [smem:[#allocation18_spill]] }
 0x8df   : > { %s4966_s21 = sld [smem:[#allocation11_spill]]  ;;  %s4970_s18 = smov %s3869_s19 }
 0x8e0   : > { %s4967_s22 = sld [smem:[#allocation12_spill]]  ;;  %28 = sbr.rel (!%p26_p8) target bundleno = 10 (0xa), region = 134 }
 0x8e1   : > { %s4968_s23 = sld [smem:[#allocation14_spill]] }
 0x8e2   : > { %s4969_s24 = sld [smem:[#allocation16_spill]] }
 0x8e3   : > { %s4971_s19 = smov %s4964_s26 }
 0x8e5   :  { %3055 = vsyncpa [#allocation6], 1 }
 0x8e6   :  { %3057 = vsyncpa [#allocation6 + $0x1], 1 }

// kernel: le_model_forward.1
= control target key start
LH: loop header
LB: loop body
LE: loop exit
PB: predicated region body
PF: predicated region fallthrough
CT: control target
= control target key end

     0   :  { %s4907_s0 = inlined_call_operand.vmem [shape: bf16[2,256,4], index: 0, kind: input, shape index: {}]   ;;  %s4908_s1 = inlined_call_operand.vmem [shape: bf16[256,32], index: 1, kind: input, shape index: {}]   ;;  %s4909_s2 = inlined_call_operand.vmem [shape: bf16[4,32], index: 2, kind: input, shape index: {}]   ;;  %s4910_s3 = inlined_call_operand.vmem [shape: f32[1,32], index: 3, kind: input, shape index: {}]   ;;  %s4911_s4 = inlined_call_operand.vmem [shape: bf16[128,32], index: 4, kind: input, shape index: {}]   ;;  %s4912_s5 = inlined_call_operand.vmem [shape: bf16[32,32], index: 5, kind: input, shape index: {}]   ;;  %s4913_s6 = inlined_call_operand.vmem [shape: bf16[32,32], index: 6, kind: input, shape index: {}]   ;;  %s4914_s7 = inlined_call_operand.vmem [shape: bf16[32,32], index: 7, kind: input, shape index: {}]   ;;  %s4915_s8 = inlined_call_operand.vmem [shape: f32[128,32], index: 8, kind: input, shape index: {}]   ;;  %s4916_s9 = inlined_call_operand.vmem [shape: f32[1,128], index: 9, kind: input, shape index: {}]   ;;  %s4917_s10 = inlined_call_operand.vmem [shape: bf16[32,32], index: 10, kind: input, shape index: {}]   ;;  %s4918_s11 = inlined_call_operand.vmem [shape: f32[1,32], index: 11, kind: input, shape index: {}]   ;;  %s4919_s12 = inlined_call_operand.vmem [shape: bf16[32,128], index: 12, kind: input, shape index: {}]   ;;  %s4920_s13 = inlined_call_operand.vmem [shape: f32[1,128], index: 13, kind: input, shape index: {}]   ;;  %s4921_s14 = inlined_call_operand.hbm [shape: f32[2,1,128], index: 14, kind: output, shape index: {0}]   ;;  %s4922_s15 = inlined_call_operand.vmem [shape: f32[2,128,128], index: 15, kind: output, shape index: {1}]  }
   0x1   :  { %4936 = sst [smem:[#allocation19_spill]] %s4918_s11 }
   0x2   :  { %4937 = sst [smem:[#allocation20_spill]] %s4919_s12 }
   0x3   :  { %4938 = sst [smem:[#allocation21_spill]] %s4920_s13 }
   0x4   :  { %4939 = sst [smem:[#allocation22_spill]] %s4921_s14 }
   0x5   :  { %21 = vsyncpa [#allocation6], 0 }
   0x6   :  { %23 = vsyncpa [#allocation6 + $0x1], 0  ;;  %s3980_s18 = smov 0   ;;  %s3982_s19 = smov 0  }
   0x7   :  { %s3984_s20 = smov 0   ;;  %s3986_s21 = smov 0  }
   0x8   :  { %s3988_s22 = smov 0   ;;  %s3990_s23 = smov 0  }
   0x9   :  { %s3992_s24 = smov 0   ;;  %s3994_s25 = smov 0  }
   0xa LB: > { %4940 = sst [smem:[#allocation8_spill]] %s3865_s18  ;;  %s3139_s26 = sadd.s32 4294967295, %s3893_s25   ;;  %s3893_s25 = sphi %s3994_s25, %s29_s25   ;;  %s3889_s24 = sphi %s3992_s24, %s4969_s24   ;;  %s3885_s23 = sphi %s3990_s23, %s4968_s23   ;;  %s3881_s22 = sphi %s3988_s22, %s4967_s22   ;;  %s3877_s21 = sphi %s3986_s21, %s4966_s21   ;;  %s3873_s20 = sphi %s3984_s20, %s4965_s20   ;;  %s3869_s19 = sphi %s3982_s19, %s4971_s19   ;;  %s3865_s18 = sphi %s3980_s18, %s4970_s18  }
   0xb   : > { %4941 = sst [smem:[#allocation9_spill]] %s3873_s20  ;;  %s3140_s27 = sadd.s32 4294967294, %s3893_s25  }
   0xc   : > { %4942 = sst [smem:[#allocation10_spill]] %s3881_s22  ;;  %s38_s28 = sadd.s32 1, %s3885_s23 }
   0xd   : > { %4943 = sst [smem:[#allocation11_spill]] %s3885_s23  ;;  %p39_p0 = scmp.ge.s32.totalorder %s38_s28, 2 }
   0xe   : > { %4944 = sst [smem:[#allocation12_spill]] %s3889_s24  ;;  %s41_s29 = sadd.s32 1, %s3889_s24 }
   0xf   : > { %4945 = sst [smem:[#allocation13_spill]] %s3893_s25  ;;  %p364_p1 = scmp.ne.s32.totalorder %s3873_s20, %s3869_s19 }
  0x10   : > { %p365_p2 = scmp.eq.s32.totalorder %s3139_s26, 3  ;;  %s4973_s28 = smov (%p39_p0, %s38_s28), 0 }
  0x11   : > { %4946 = sst [smem:[#allocation14_spill]] %s4973_s28  ;;  %s4975_s29 = smov (!%p39_p0, %s41_s29), %s3889_s24 }
  0x12   : > { %p4029_p3 = por %p365_p2, %p364_p1  ;;  %p370_p4 = scmp.ne.s32.totalorder %s3869_s19, %s3865_s18 }
  0x13   : > { %p43_p5 = scmp.ge.s32.totalorder %s4975_s29, 2  ;;  %p371_p6 = scmp.eq.s32.totalorder %s3140_s27, 3 }
  0x14   : > { %s4947_s30 = scalar_select %p4029_p3, 1, 0 }
  0x15   : > { %p3143_p7 = scmp.ge.s32.totalorder %s3893_s25, 1  ;;  %p473_p8 = scmp.lt.s32.totalorder %s3893_s25, 5 }
  0x16   : > { %4948 = sst [smem:[#allocation15_spill]] %s4947_s30  ;;  %s4977_s29 = smov (%p43_p5, %s4975_s29), 0 }
  0x17   : > { %4949 = sst [smem:[#allocation16_spill]] %s4977_s29  ;;  %p4039_p9 = por %p371_p6, %p370_p4 }
  0x18   : > { %p474_p10 = pnand %p3143_p7, %p473_p8  ;;  %s351_s17 = ssub.s32 %s3889_s24, %s4977_s29 }
  0x19   : > { %s4950_s16 = scalar_select %p4039_p9, 1, 0 }
  0x1a   : > { %s354_s26 = sadd.s32 1, %s3873_s20  ;;  %p352_p11 = scmp.eq.s32.totalorder %s351_s17, 0 }
  0x1b   : > { %4951 = sst [smem:[#allocation17_spill]] %s4950_s16  ;;  %477 = sbr.rel (%p474_p10) target bundleno = 2256 (0x8d0), region = 76 }
  0x1c   : > { %s4047_s28 = scalar_select %p352_p11, %s3873_s20, %s354_s26  }
  0x1d   : > { %s3144_s23 = sshll.u32 (!%p474_p10), %s3877_s21, 4  ;;  %p535_p12 = scmp.lt.s32.totalorder (!%p474_p10), %s3881_s22, 1 }
  0x1e   : > { %4952 = sst [smem:[#allocation18_spill]] %s4047_s28  ;;  %p537_p13 = scmp.lt.s32.totalorder (!%p474_p10), %s3144_s23, 31 }
  0x1f   : > { %s4953_s12 = sand.u32 (!%p474_p10), 1, %s3869_s19   ;;  %p3151_p0 = scmp.ne.s32.totalorder (!%p474_p10), %s3877_s21, 0 }
  0x20   : > { %s536_s18 = scalar_select %p535_p12, %s3881_s22, 1 }
  0x21   : > { %s4979_s23 = smov (!%p537_p13, %s3144_s23), 31 }
  0x22   : > { %s3145_s25 = sshll.u32 %s536_s18, 5  ;;  %s3242_s16 = sshll.u32 %s536_s18, 7 }
  0x23   : > { %s540_s14 = sadd.s32 %s3145_s25, %s4979_s23  ;;  %s3148_s29 = sshll.u32 %s4979_s23, 2 }
  0x24   : > { %s3146_s24 = sshll.u32 %s540_s14, 2  ;;  %s4056_s28 = scalar_lea.vmem %s4908_s1, %s3148_s29 }
  0x25   : > { %s4061_s13 = scalar_lea.vmem %s4907_s0, %s3146_s24  ;;  %s4066_s22 = scalar_lea.vmem %s4922_s15, %s3242_s16 }
  0x26   : > { %s4070_s18 = scalar_lea.vmem [#allocation5], %s4953_s12  ;;  %559 = sbr.rel (%p3151_p0) target bundleno = 68 (0x44), region = 80 }
  0x2b   : > { %vm560_vm0 = vcmask 7168   ;;  %vm593_vm1 = vcmask 261120   ;;  %v3895_v0 = vmov -inf   ;;  %v3896_v1 = vmov 0.0  }
  0x2c   : > { %561 = vst.msk [vmem:[#allocation2] sm:$0xff] %vm560_vm0, %v3895_v0  ;;  %562 = vst.msk [vmem:[#allocation2 + $0x8] sm:$0xff] %vm560_vm0, %v3895_v0 }
  0x2d   : > { %563 = vst.msk [vmem:[#allocation2 + $0x10] sm:$0xff] %vm560_vm0, %v3895_v0  ;;  %564 = vst.msk [vmem:[#allocation2 + $0x18] sm:$0xff] %vm560_vm0, %v3895_v0 }
  0x2e   : > { %565 = vst.msk [vmem:[#allocation2 + $0x20] sm:$0xff] %vm560_vm0, %v3895_v0  ;;  %566 = vst.msk [vmem:[#allocation2 + $0x28] sm:$0xff] %vm560_vm0, %v3895_v0 }
  0x2f   : > { %567 = vst.msk [vmem:[#allocation2 + $0x30] sm:$0xff] %vm560_vm0, %v3895_v0  ;;  %568 = vst.msk [vmem:[#allocation2 + $0x38] sm:$0xff] %vm560_vm0, %v3895_v0 }
  0x30   : > { %569 = vst.msk [vmem:[#allocation2 + $0x40] sm:$0xff] %vm560_vm0, %v3895_v0  ;;  %570 = vst.msk [vmem:[#allocation2 + $0x48] sm:$0xff] %vm560_vm0, %v3895_v0 }
  0x31   : > { %571 = vst.msk [vmem:[#allocation2 + $0x50] sm:$0xff] %vm560_vm0, %v3895_v0  ;;  %572 = vst.msk [vmem:[#allocation2 + $0x58] sm:$0xff] %vm560_vm0, %v3895_v0 }
  0x32   : > { %573 = vst.msk [vmem:[#allocation2 + $0x60] sm:$0xff] %vm560_vm0, %v3895_v0  ;;  %574 = vst.msk [vmem:[#allocation2 + $0x68] sm:$0xff] %vm560_vm0, %v3895_v0 }
  0x33   : > { %575 = vst.msk [vmem:[#allocation2 + $0x70] sm:$0xff] %vm560_vm0, %v3895_v0  ;;  %576 = vst.msk [vmem:[#allocation2 + $0x78] sm:$0xff] %vm560_vm0, %v3895_v0 }
  0x34   : > { %577 = vst.msk [vmem:[#allocation3] sm:$0xff] %vm560_vm0, %v3896_v1  ;;  %578 = vst.msk [vmem:[#allocation3 + $0x8] sm:$0xff] %vm560_vm0, %v3896_v1 }
  0x35   : > { %579 = vst.msk [vmem:[#allocation3 + $0x10] sm:$0xff] %vm560_vm0, %v3896_v1  ;;  %580 = vst.msk [vmem:[#allocation3 + $0x18] sm:$0xff] %vm560_vm0, %v3896_v1 }
  0x36   : > { %581 = vst.msk [vmem:[#allocation3 + $0x20] sm:$0xff] %vm560_vm0, %v3896_v1  ;;  %582 = vst.msk [vmem:[#allocation3 + $0x28] sm:$0xff] %vm560_vm0, %v3896_v1 }
  0x37   : > { %583 = vst.msk [vmem:[#allocation3 + $0x30] sm:$0xff] %vm560_vm0, %v3896_v1  ;;  %584 = vst.msk [vmem:[#allocation3 + $0x38] sm:$0xff] %vm560_vm0, %v3896_v1 }
  0x38   : > { %585 = vst.msk [vmem:[#allocation3 + $0x40] sm:$0xff] %vm560_vm0, %v3896_v1  ;;  %586 = vst.msk [vmem:[#allocation3 + $0x48] sm:$0xff] %vm560_vm0, %v3896_v1 }
  0x39   : > { %587 = vst.msk [vmem:[#allocation3 + $0x50] sm:$0xff] %vm560_vm0, %v3896_v1  ;;  %588 = vst.msk [vmem:[#allocation3 + $0x58] sm:$0xff] %vm560_vm0, %v3896_v1 }
  0x3a   : > { %589 = vst.msk [vmem:[#allocation3 + $0x60] sm:$0xff] %vm560_vm0, %v3896_v1  ;;  %590 = vst.msk [vmem:[#allocation3 + $0x68] sm:$0xff] %vm560_vm0, %v3896_v1 }
  0x3b   : > { %591 = vst.msk [vmem:[#allocation3 + $0x70] sm:$0xff] %vm560_vm0, %v3896_v1  ;;  %592 = vst.msk [vmem:[#allocation3 + $0x78] sm:$0xff] %vm560_vm0, %v3896_v1 }
  0x3c   : > { %594 = vst.msk [vmem:[#allocation4] sm:$0xff] %vm593_vm1, %v3896_v1  ;;  %595 = vst.msk [vmem:[#allocation4 + $0x8] sm:$0xff] %vm593_vm1, %v3896_v1 }
  0x3d   : > { %596 = vst.msk [vmem:[#allocation4 + $0x10] sm:$0xff] %vm593_vm1, %v3896_v1  ;;  %597 = vst.msk [vmem:[#allocation4 + $0x18] sm:$0xff] %vm593_vm1, %v3896_v1 }
  0x3e   : > { %598 = vst.msk [vmem:[#allocation4 + $0x20] sm:$0xff] %vm593_vm1, %v3896_v1  ;;  %599 = vst.msk [vmem:[#allocation4 + $0x28] sm:$0xff] %vm593_vm1, %v3896_v1 }
  0x3f   : > { %600 = vst.msk [vmem:[#allocation4 + $0x30] sm:$0xff] %vm593_vm1, %v3896_v1  ;;  %601 = vst.msk [vmem:[#allocation4 + $0x38] sm:$0xff] %vm593_vm1, %v3896_v1 }
  0x40   : > { %602 = vst.msk [vmem:[#allocation4 + $0x40] sm:$0xff] %vm593_vm1, %v3896_v1  ;;  %603 = vst.msk [vmem:[#allocation4 + $0x48] sm:$0xff] %vm593_vm1, %v3896_v1 }
  0x41   : > { %604 = vst.msk [vmem:[#allocation4 + $0x50] sm:$0xff] %vm593_vm1, %v3896_v1  ;;  %605 = vst.msk [vmem:[#allocation4 + $0x58] sm:$0xff] %vm593_vm1, %v3896_v1 }
  0x42   : > { %606 = vst.msk [vmem:[#allocation4 + $0x60] sm:$0xff] %vm593_vm1, %v3896_v1  ;;  %607 = vst.msk [vmem:[#allocation4 + $0x68] sm:$0xff] %vm593_vm1, %v3896_v1 }
  0x43   : > { %608 = vst.msk [vmem:[#allocation4 + $0x70] sm:$0xff] %vm593_vm1, %v3896_v1  ;;  %609 = vst.msk [vmem:[#allocation4 + $0x78] sm:$0xff] %vm593_vm1, %v3896_v1 }
  0x44 PF: > { %v626_v2 = vld [vmem:[%s4909_s2] sm:$0x3]  ;;  %vm699_vm2 = vcmask 1041408   ;;  %vm674_vm3 = vcmask 31744   ;;  %v3646_v5 = vld [vmem:[%s4061_s13 + $0x8] sm:$0xff]   ;;  %v3647_v6 = vld [vmem:[%s4061_s13 + $0x10] sm:$0xff]  }
  0x45   : > { %v3645_v3 = vld [vmem:[%s4061_s13] sm:$0xff]   ;;  %3559 = vmatprep.subr.msk.bf16.mxu0 %vm699_vm2, %v626_v2  ;;  %v701_v4 = vsel %vm699_vm2, %v626_v2, 0  ;;  %v3648_v7 = vld [vmem:[%s4061_s13 + $0x18] sm:$0xff]   ;;  %v3650_v9 = vld [vmem:[%s4061_s13 + $0x28] sm:$0xff]   ;;  %vm872_vm4 = vcmask 261120   ;;  %vm1644_vm5 = vcmask 7168  }
  0x46   : > { %3374 = vmatpush3.bf16.msra.mxu0 %v701_v4  ;;  %3375 = vmatprep.mubr.msk.bf16.mxu0 %vm674_vm3, %v3645_v3  ;;  %v3649_v8 = vld [vmem:[%s4061_s13 + $0x20] sm:$0xff]   ;;  %v3651_v10 = vld [vmem:[%s4061_s13 + $0x30] sm:$0xff]   ;;  %v3652_v11 = vld [vmem:[%s4061_s13 + $0x38] sm:$0xff]   ;;  %p3205_p1 = scmp.ne.s32.totalorder %s3877_s21, 1 }
  0x47   : > { %v3653_v12 = vld [vmem:[%s4912_s5 + $0x8] sm:$0xff]   ;;  %v3655_v14 = vld [vmem:[%s4912_s5] sm:$0xff]   ;;  %v3276_v37 = vld [vmem:[%s4056_s28 + $0x10] sm:$0xff]   ;;  %s4954_s30 = sld [smem:[#allocation20_spill]] (!%p3205_p1) }
  0x48   : > { %v3654_v13 = vld [vmem:[%s4913_s6 + $0x8] sm:$0xff]   ;;  %3391 = vmatprep.subr.bf16.mxu1 %v3653_v12  ;;  %v3656_v15 = vld [vmem:[%s4913_s6] sm:$0xff]   ;;  %v3277_v38 = vld [vmem:[%s4056_s28 + $0x18] sm:$0xff]   ;;  %v3253_v44 = vunpack.c.l.bf16 %v3276_v37  ;;  %v3254_v46 = vunpack.c.h.bf16 %v3276_v37  ;;  %s4955_s17 = sld [smem:[#allocation19_spill]] (!%p3205_p1) }
  0x49   : > { %3376 = vmatmul.mubr.msk.bf16.vlgmr.msra.gmra.mxu0 %vm674_vm3, %v3646_v5  ;;  %3411 = vmatprep.subr.bf16.mxu0 %v3654_v13  ;;  %v3244_v18 = vld [vmem:[%s4056_s28] sm:$0xff]   ;;  %v3275_v20 = vld [vmem:[%s4056_s28 + $0x8] sm:$0xff]   ;;  %v3258_v42 = vunpack.c.h.bf16 %v3277_v38  ;;  %v3257_v48 = vunpack.c.l.bf16 %v3277_v38  ;;  %s4956_s12 = sld [smem:[#allocation21_spill]] (!%p3205_p1) }
  0x4a   : > { %3379 = vmatprep.mubr.msk.bf16.mxu0 %vm674_vm3, %v3647_v6  ;;  %3392 = vmatpush3.bf16.msra.mxu1 %v3653_v12  ;;  %v4156_v19 = vld [vmem:[%s4910_s3] ss:$0 sm:$0xff]  ;;  %v3250_v22 = vunpack.c.h.bf16 %v3275_v20  ;;  %v3245_v24 = vunpack.c.l.bf16 %v3244_v18  ;;  %v3246_v26 = vunpack.c.h.bf16 %v3244_v18  ;;  %v3249_v28 = vunpack.c.l.bf16 %v3275_v20  ;;  %v3279_v59 = vld [vmem:[%s4056_s28 + $0x28] sm:$0xff]  }
  0x4b   : > { %3412 = vmatpush3.bf16.msra.mxu0 %v3654_v13  ;;  %3393 = vmatprep.subr.bf16.mxu1 %v3655_v14  ;;  %v3278_v57 = vld [vmem:[%s4056_s28 + $0x20] sm:$0xff]   ;;  %v3266_v62 = vunpack.c.h.bf16 %v3279_v59  ;;  %v3265_v4 = vunpack.c.l.bf16 %v3279_v59  ;;  %v3280_v13 = vld [vmem:[%s4056_s28 + $0x30] sm:$0xff]  }
  0x4c   : > { %3413 = vmatprep.subr.bf16.mxu0 %v3656_v15  ;;  %v3261_v0 = vunpack.c.l.bf16 %v3278_v57  ;;  %v3262_v2 = vunpack.c.h.bf16 %v3278_v57 }
  0x4e   : > { %3394 = vmatpush3.bf16.msra.mxu1 %v3655_v14 }
  0x4f   : > { %3414 = vmatpush3.bf16.msra.mxu0 %v3656_v15  ;;  %v3281_v15 = vld [vmem:[%s4056_s28 + $0x38] sm:$0xff]  }
  0x50   : > { %v3274_v18 = vunpack.c.h.bf16 %v3281_v15 }
  0x51   : > { %3380 = vmatmul.mubr.msk.bf16.gmra.mxu0 %vm674_vm3, %v3648_v7 }
  0x52   : > { %3383 = vmatprep.mubr.msk.bf16.mxu0 %vm674_vm3, %v3649_v8 }
  0x59   : > { %3384 = vmatmul.mubr.msk.bf16.gmra.mxu0 %vm674_vm3, %v3650_v9 }
  0x5a   : > { %3387 = vmatprep.mubr.msk.bf16.mxu0 %vm674_vm3, %v3651_v10 }
  0x61   : > { %3388 = vmatmul.mubr.msk.bf16.gmra.mxu0 %vm674_vm3, %v3652_v11 }
 0x109   : > { %v3377_v16 = vpop.f32.mrf.mxu0 }
 0x10a   : > { %v746_v27 = vadd.f32 %v3377_v16, %v4156_v19 }
 0x10b   : > { %v737_v17 = vpop.f32.mrf.mxu0 }
 0x10c   : > { %v738_v23 = vadd.f32 %v4156_v19, %v737_v17  ;;  %v834_v35 = vadd.f32 %v3249_v28, %v746_v27 }
 0x10d   : > { %v3378_v21 = vpop.f32.mrf.mxu0 }
 0x10e   : > { %v749_v25 = vadd.f32 %v3378_v21, %v4156_v19  ;;  %v832_v33 = vadd.f32 %v3245_v24, %v738_v23  ;;  %v3269_v21 = vunpack.c.l.bf16 %v3280_v13  ;;  %v3270_v23 = vunpack.c.h.bf16 %v3280_v13 }
 0x10f   : > { %v740_v29 = vpop.f32.mrf.mxu0 }
 0x110   : > { %v741_v30 = vadd.f32 %v4156_v19, %v740_v29  ;;  %v835_v31 = vadd.f32 %v3250_v22, %v749_v25  ;;  %v3273_v25 = vunpack.c.l.bf16 %v3281_v15 }
 0x111   : > { %v3381_v32 = vpop.f32.mrf.mxu0 }
 0x112   : > { %v833_v34 = vadd.f32 %v3246_v26, %v741_v30  ;;  %v849_v40 = vpack.c.bf16 %v835_v31, %v834_v35  ;;  %v762_v47 = vadd.f32 %v3381_v32, %v4156_v19 }
 0x113   : > { %v753_v36 = vpop.f32.mrf.mxu0 }
 0x114   : > { %v848_v39 = vpack.c.bf16 %v833_v34, %v832_v33  ;;  %v754_v43 = vadd.f32 %v4156_v19, %v753_v36  ;;  %v838_v55 = vadd.f32 %v3257_v48, %v762_v47  ;;  %v3657_v34 = vld [vmem:[%s4911_s4] sm:$0xff]  }
 0x115   : > { %v3382_v41 = vpop.f32.mrf.mxu0 }
 0x116   : > { %v765_v45 = vadd.f32 %v3382_v41, %v4156_v19  ;;  %3395 = vmatprep.mubr.msk.bf16.mxu1 %vm872_vm4, %v848_v39  ;;  %3415 = vmatprep.mubr.msk.bf16.mxu0 %vm872_vm4, %v848_v39  ;;  %v836_v53 = vadd.f32 %v3253_v44, %v754_v43 }
 0x117   : > { %v756_v49 = vpop.f32.mrf.mxu0  ;;  %3396 = vmatmul.mubr.msk.bf16.vlgmr.msra.gmra.mxu1 %vm872_vm4, %v849_v40  ;;  %3416 = vmatmul.mubr.msk.bf16.vlgmr.msra.gmra.mxu0 %vm872_vm4, %v849_v40 }
 0x118   : > { %v757_v50 = vadd.f32 %v4156_v19, %v756_v49  ;;  %v839_v51 = vadd.f32 %v3258_v42, %v765_v45 }
 0x119   : > { %v3385_v52 = vpop.f32.mrf.mxu0 }
 0x11a   : > { %v837_v54 = vadd.f32 %v3254_v46, %v757_v50  ;;  %v851_v60 = vpack.c.bf16 %v839_v51, %v838_v55  ;;  %v778_v3 = vadd.f32 %v3385_v52, %v4156_v19 }
 0x11b   : > { %v769_v56 = vpop.f32.mrf.mxu0 }
 0x11c   : > { %v850_v58 = vpack.c.bf16 %v837_v54, %v836_v53  ;;  %v770_v63 = vadd.f32 %v4156_v19, %v769_v56  ;;  %v842_v11 = vadd.f32 %v3265_v4, %v778_v3 }
 0x11d   : > { %v3386_v61 = vpop.f32.mrf.mxu0 }
 0x11e   : > { %v781_v1 = vadd.f32 %v3386_v61, %v4156_v19  ;;  %3399 = vmatprep.mubr.msk.bf16.mxu1 %vm872_vm4, %v850_v58  ;;  %3419 = vmatprep.mubr.msk.bf16.mxu0 %vm872_vm4, %v850_v58  ;;  %v840_v9 = vadd.f32 %v3261_v0, %v770_v63 }
 0x11f   : > { %v772_v5 = vpop.f32.mrf.mxu0  ;;  %3400 = vmatmul.mubr.msk.bf16.gmra.mxu1 %vm872_vm4, %v851_v60  ;;  %3420 = vmatmul.mubr.msk.bf16.gmra.mxu0 %vm872_vm4, %v851_v60 }
 0x120   : > { %v773_v6 = vadd.f32 %v4156_v19, %v772_v5  ;;  %v843_v7 = vadd.f32 %v3266_v62, %v781_v1 }
 0x121   : > { %v3389_v8 = vpop.f32.mrf.mxu0 }
 0x122   : > { %v841_v10 = vadd.f32 %v3262_v2, %v773_v6  ;;  %v853_v16 = vpack.c.bf16 %v843_v7, %v842_v11  ;;  %v794_v24 = vadd.f32 %v3389_v8, %v4156_v19 }
 0x123   : > { %v785_v12 = vpop.f32.mrf.mxu0 }
 0x124   : > { %v852_v14 = vpack.c.bf16 %v841_v10, %v840_v9  ;;  %v786_v20 = vadd.f32 %v4156_v19, %v785_v12  ;;  %v846_v31 = vadd.f32 %v3273_v25, %v794_v24 }
 0x125   : > { %v3390_v17 = vpop.f32.mrf.mxu0 }
 0x126   : > { %v797_v22 = vadd.f32 %v3390_v17, %v4156_v19  ;;  %3403 = vmatprep.mubr.msk.bf16.mxu1 %vm872_vm4, %v852_v14  ;;  %3423 = vmatprep.mubr.msk.bf16.mxu0 %vm872_vm4, %v852_v14  ;;  %v844_v29 = vadd.f32 %v3269_v21, %v786_v20 }
 0x127   : > { %v788_v26 = vpop.f32.mrf.mxu0  ;;  %3404 = vmatmul.mubr.msk.bf16.gmra.mxu1 %vm872_vm4, %v853_v16  ;;  %3424 = vmatmul.mubr.msk.bf16.gmra.mxu0 %vm872_vm4, %v853_v16 }
 0x128   : > { %v789_v27 = vadd.f32 %v4156_v19, %v788_v26  ;;  %v847_v28 = vadd.f32 %v3274_v18, %v797_v22 }
 0x12a   : > { %v845_v30 = vadd.f32 %v3270_v23, %v789_v27  ;;  %v855_v33 = vpack.c.bf16 %v847_v28, %v846_v31  ;;  %v3658_v27 = vld [vmem:[%s4911_s4 + $0x8] sm:$0xff]   ;;  %v3659_v28 = vld [vmem:[%s4911_s4 + $0x10] sm:$0xff]  }
 0x12b   : > { %v3662_v31 = vld [vmem:[%s4911_s4 + $0x28] sm:$0xff]  }
 0x12c   : > { %v854_v32 = vpack.c.bf16 %v845_v30, %v844_v29  ;;  %v3660_v29 = vld [vmem:[%s4911_s4 + $0x18] sm:$0xff]   ;;  %v3661_v30 = vld [vmem:[%s4911_s4 + $0x20] sm:$0xff]  }
 0x12e   : > { %3407 = vmatprep.mubr.msk.bf16.mxu1 %vm872_vm4, %v854_v32  ;;  %3427 = vmatprep.mubr.msk.bf16.mxu0 %vm872_vm4, %v854_v32  ;;  %v3663_v32 = vld [vmem:[%s4911_s4 + $0x30] sm:$0xff]  }
 0x12f   : > { %3408 = vmatmul.mubr.msk.bf16.gmra.mxu1 %vm872_vm4, %v855_v33  ;;  %3428 = vmatmul.mubr.msk.bf16.gmra.mxu0 %vm872_vm4, %v855_v33  ;;  %v3664_v33 = vld [vmem:[%s4911_s4 + $0x38] sm:$0xff]  }
 0x130   : > { %3447 = vmatprep.mubr.msk.bf16.mxu1 %vm872_vm4, %v3657_v34 }
 0x1d7   : > { %v3397_v19 = vpop.f32.mrf.mxu1  ;;  %v4201_v35 = vpop.f32.mrf.mxu0 }
 0x1d9   : > { %v931_v36 = vpop.f32.mrf.mxu1  ;;  %v4203_v37 = vpop.f32.mrf.mxu0 }
 0x1db   : > { %v3398_v38 = vpop.f32.mrf.mxu1  ;;  %v3418_v39 = vpop.f32.mrf.mxu0 }
 0x1dc   : > { %v4205_v40 = vpack.c.bf16 %v3398_v38, %v3397_v19  ;;  %v1116_v17 = vpack.c.bf16 %v3418_v39, %v4201_v35 }
 0x1dd   : > { %v934_v41 = vpop.f32.mrf.mxu1  ;;  %v1055_v42 = vpop.f32.mrf.mxu0 }
 0x1de   : > { %v4207_v43 = vpack.c.bf16 %v934_v41, %v931_v36  ;;  %v1115_v18 = vpack.c.bf16 %v1055_v42, %v4203_v37  ;;  %v1207_v25 = vsel %vm872_vm4, %v4205_v40, 0 }
 0x1df   : > { %v3401_v44 = vpop.f32.mrf.mxu1  ;;  %v3421_v45 = vpop.f32.mrf.mxu0 }
 0x1e0   : > { %v1204_v26 = vsel %vm872_vm4, %v4207_v43, 0 }
 0x1e1   : > { %v4209_v46 = vpop.f32.mrf.mxu1  ;;  %v1068_v47 = vpop.f32.mrf.mxu0 }
 0x1e3   : > { %v3402_v48 = vpop.f32.mrf.mxu1  ;;  %v3422_v49 = vpop.f32.mrf.mxu0 }
 0x1e4   : > { %v1118_v13 = vpack.c.bf16 %v3422_v49, %v3421_v45  ;;  %v997_v20 = vpack.c.bf16 %v3402_v48, %v3401_v44 }
 0x1e5   : > { %v950_v50 = vpop.f32.mrf.mxu1  ;;  %v1071_v51 = vpop.f32.mrf.mxu0 }
 0x1e6   : > { %v1117_v14 = vpack.c.bf16 %v1071_v51, %v1068_v47  ;;  %v1213_v22 = vsel %vm872_vm4, %v997_v20, 0  ;;  %v996_v23 = vpack.c.bf16 %v950_v50, %v4209_v46  ;;  %v4310_v50 = vld [vmem:[#allocation2 + $0x10] sm:$0xff] }
 0x1e7   : > { %v3405_v52 = vpop.f32.mrf.mxu1  ;;  %v3425_v53 = vpop.f32.mrf.mxu0 }
 0x1e8   : > { %v1210_v24 = vsel %vm872_vm4, %v996_v23, 0 }
 0x1e9   : > { %v963_v54 = vpop.f32.mrf.mxu1  ;;  %v1084_v55 = vpop.f32.mrf.mxu0 }
 0x1eb   : > { %v3406_v56 = vpop.f32.mrf.mxu1  ;;  %v3426_v57 = vpop.f32.mrf.mxu0 }
 0x1ec   : > { %v1120_v9 = vpack.c.bf16 %v3426_v57, %v3425_v53  ;;  %v999_v10 = vpack.c.bf16 %v3406_v56, %v3405_v52  ;;  %v1324_v52 = vld [vmem:[#allocation2] sm:$0xff] }
 0x1ed   : > { %v966_v58 = vpop.f32.mrf.mxu1  ;;  %v1087_v59 = vpop.f32.mrf.mxu0 }
 0x1ee   : > { %v1119_v11 = vpack.c.bf16 %v1087_v59, %v1084_v55  ;;  %v1219_v15 = vsel %vm872_vm4, %v999_v10, 0  ;;  %v998_v16 = vpack.c.bf16 %v966_v58, %v963_v54  ;;  %v1327_v55 = vld [vmem:[#allocation2 + $0x18] sm:$0xff]  ;;  %v4318_v58 = vld [vmem:[#allocation2 + $0x8] sm:$0xff] }
 0x1ef   : > { %v3409_v60 = vpop.f32.mrf.mxu1  ;;  %v3429_v61 = vpop.f32.mrf.mxu0 }
 0x1f0   : > { %v1216_v21 = vsel %vm872_vm4, %v998_v16, 0 }
 0x1f1   : > { %v979_v62 = vpop.f32.mrf.mxu1  ;;  %v1100_v63 = vpop.f32.mrf.mxu0 }
 0x1f3   : > { %v3410_v0 = vpop.f32.mrf.mxu1  ;;  %v3430_v1 = vpop.f32.mrf.mxu0 }
 0x1f4   : > { %v1001_v2 = vpack.c.bf16 %v3410_v0, %v3409_v60  ;;  %v1122_v3 = vpack.c.bf16 %v3430_v1, %v3429_v61  ;;  %v1331_v0 = vld [vmem:[#allocation2 + $0x38] sm:$0xff] }
 0x1f5   : > { %v982_v4 = vpop.f32.mrf.mxu1  ;;  %v1103_v5 = vpop.f32.mrf.mxu0 }
 0x1f6   : > { %v1225_v6 = vsel %vm872_vm4, %v1001_v2, 0  ;;  %v1000_v7 = vpack.c.bf16 %v982_v4, %v979_v62  ;;  %v1121_v8 = vpack.c.bf16 %v1103_v5, %v1100_v63  ;;  %3560 = vmatprep.subr.msk.bf16.mxu1 %vm872_vm4, %v1001_v2  ;;  %3463 = vmatprep.subr.bf16.mxu0 %v1122_v3  ;;  %v4323_v62 = vld [vmem:[#allocation2 + $0x20] sm:$0xff] }
 0x1f7   : > { %3432 = vmatpush3.bf16.xpose.msra.mxu1 %v1225_v6  ;;  %3464 = vmatpush3.bf16.msra.mxu0 %v1122_v3  ;;  %v4329_v3 = vld [vmem:[#allocation2 + $0x30] sm:$0xff]  ;;  %v4333_v6 = vld [vmem:[#allocation2 + $0x28] sm:$0xff] }
 0x1f8   : > { %3561 = vmatprep.subr.msk.bf16.mxu1 %vm872_vm4, %v1000_v7  ;;  %3465 = vmatprep.subr.bf16.mxu0 %v1121_v8  ;;  %v1222_v12 = vsel %vm872_vm4, %v1000_v7, 0 }
 0x1fb   : > { %3466 = vmatpush3.bf16.msra.mxu0 %v1121_v8 }
 0x1fc   : > { %3467 = vmatprep.subr.bf16.mxu0 %v1120_v9 }
 0x1ff   : > { %3434 = vmatpush3.bf16.xpose.msra.mxu1 %v1222_v12  ;;  %3468 = vmatpush3.bf16.msra.mxu0 %v1120_v9  ;;  %v4339_v9 = vld [vmem:[#allocation2 + $0x40] sm:$0xff]  ;;  %v4345_v12 = vld [vmem:[#allocation2 + $0x58] sm:$0xff] }
 0x200   : > { %3562 = vmatprep.subr.msk.bf16.mxu1 %vm872_vm4, %v999_v10  ;;  %3469 = vmatprep.subr.bf16.mxu0 %v1119_v11 }
 0x203   : > { %3470 = vmatpush3.bf16.msra.mxu0 %v1119_v11 }
 0x204   : > { %3471 = vmatprep.subr.bf16.mxu0 %v1118_v13 }
 0x207   : > { %3436 = vmatpush3.bf16.xpose.msra.mxu1 %v1219_v15  ;;  %3472 = vmatpush3.bf16.msra.mxu0 %v1118_v13  ;;  %v4351_v15 = vld [vmem:[#allocation2 + $0x50] sm:$0xff] }
 0x208   : > { %3563 = vmatprep.subr.msk.bf16.mxu1 %vm872_vm4, %v998_v16  ;;  %3473 = vmatprep.subr.bf16.mxu0 %v1117_v14 }
 0x20b   : > { %3474 = vmatpush3.bf16.msra.mxu0 %v1117_v14 }
 0x20c   : > { %3475 = vmatprep.subr.bf16.mxu0 %v1116_v17 }
 0x20f   : > { %3438 = vmatpush3.bf16.xpose.msra.mxu1 %v1216_v21  ;;  %3476 = vmatpush3.bf16.msra.mxu0 %v1116_v17 }
 0x210   : > { %3564 = vmatprep.subr.msk.bf16.mxu1 %vm872_vm4, %v997_v20  ;;  %3477 = vmatprep.subr.bf16.mxu0 %v1115_v18  ;;  %v4357_v20 = vld [vmem:[#allocation2 + $0x48] sm:$0xff] }
 0x213   : > { %3478 = vmatpush3.bf16.msra.mxu0 %v1115_v18 }
 0x217   : > { %3440 = vmatpush3.bf16.xpose.msra.mxu1 %v1213_v22 }
 0x218   : > { %3565 = vmatprep.subr.msk.bf16.mxu1 %vm872_vm4, %v996_v23 }
 0x21f   : > { %3442 = vmatpush3.bf16.xpose.msra.mxu1 %v1210_v24  ;;  %v4363_v24 = vld [vmem:[#allocation2 + $0x60] sm:$0xff] }
 0x220   : > { %3566 = vmatprep.subr.msk.bf16.mxu1 %vm872_vm4, %v4205_v40  ;;  %v3897_v40 = vmov 0  }
 0x221   : > { %3644 = vset.pattern.permute.xlu1 %v3897_v40  ;;  %3643 = vset.pattern.permute.xlu0 %v3897_v40 }
 0x227   : > { %3444 = vmatpush3.bf16.xpose.msra.mxu1 %v1207_v25 }
 0x228   : > { %3567 = vmatprep.subr.msk.bf16.mxu1 %vm872_vm4, %v4207_v43 }
 0x22f   : > { %3446 = vmatpush3.bf16.xpose.msra.mxu1 %v1204_v26 }
 0x236   : > { %3448 = vmatmul.mubr.msk.bf16.vlgmr.msra.gmra.mxu1 %vm872_vm4, %v3658_v27 }
 0x237   : > { %3451 = vmatprep.mubr.msk.bf16.mxu1 %vm872_vm4, %v3659_v28  ;;  %v4368_v28 = vld [vmem:[#allocation2 + $0x78] sm:$0xff] }
 0x23e   : > { %3452 = vmatmul.mubr.msk.bf16.gmra.mxu1 %vm872_vm4, %v3660_v29 }
 0x23f   : > { %3455 = vmatprep.mubr.msk.bf16.mxu1 %vm872_vm4, %v3661_v30 }
 0x246   : > { %3456 = vmatmul.mubr.msk.bf16.gmra.mxu1 %vm872_vm4, %v3662_v31 }
 0x247   : > { %3459 = vmatprep.mubr.msk.bf16.mxu1 %vm872_vm4, %v3663_v32 }
 0x24e   : > { %3460 = vmatmul.mubr.msk.bf16.gmra.mxu1 %vm872_vm4, %v3664_v33  ;;  %v4375_v33 = vld [vmem:[#allocation2 + $0x70] sm:$0xff] }
 0x2f6   : > { %v4262_v34 = vpop.f32.mrf.mxu1 }
 0x2f7   : > { %1344 = vmax.xlane.f32.xlu1 %v4262_v34 }
 0x2f8   : > { %v4265_v19 = vpop.f32.mrf.mxu1 }
 0x2f9   : > { %1340 = vmax.xlane.f32.xlu0 %v4265_v19 }
 0x2fa   : > { %v4268_v35 = vpop.f32.mrf.mxu1 }
 0x2fb   : > { %1346 = vmax.xlane.f32.xlu1 %v4268_v35 }
 0x2fc   : > { %v4271_v36 = vpop.f32.mrf.mxu1 }
 0x2fd   : > { %1342 = vmax.xlane.f32.xlu0 %v4271_v36 }
 0x2fe   : > { %v4274_v37 = vpop.f32.mrf.mxu1 }
 0x300   : > { %v4276_v38 = vpop.f32.mrf.mxu1 }
 0x301   : > { %1348 = vmax.xlane.f32.xlu0 %v4276_v38 }
 0x302   : > { %v4279_v39 = vpop.f32.mrf.mxu1 }
 0x303   : > { %1354 = vmax.xlane.f32.xlu1 %v4279_v39 }
 0x304   : > { %v4282_v41 = vpop.f32.mrf.mxu1 }
 0x305   : > { %1352 = vmax.xlane.f32.xlu0 %v4274_v37 }
 0x306   : > { %v4285_v42 = vpop.f32.mrf.mxu1 }
 0x307   : > { %1350 = vmax.xlane.f32.xlu1 %v4282_v41 }
 0x308   : > { %v4288_v43 = vpop.f32.mrf.mxu1 }
 0x309   : > { %1356 = vmax.xlane.f32.xlu0 %v4288_v43 }
 0x30a   : > { %v4291_v44 = vpop.f32.mrf.mxu1 }
 0x30b   : > { %1362 = vmax.xlane.f32.xlu1 %v4291_v44 }
 0x30c   : > { %v4294_v45 = vpop.f32.mrf.mxu1 }
 0x30d   : > { %1360 = vmax.xlane.f32.xlu0 %v4285_v42 }
 0x30e   : > { %v4297_v46 = vpop.f32.mrf.mxu1 }
 0x30f   : > { %1358 = vmax.xlane.f32.xlu1 %v4294_v45 }
 0x310   : > { %v4300_v47 = vpop.f32.mrf.mxu1 }
 0x311   : > { %1364 = vmax.xlane.f32.xlu0 %v4300_v47 }
 0x312   : > { %v4303_v48 = vpop.f32.mrf.mxu1 }
 0x313   : > { %1370 = vmax.xlane.f32.xlu1 %v4303_v48 }
 0x314   : > { %v4307_v49 = vpop.f32.mrf.mxu1 }
 0x315   : > { %1368 = vmax.xlane.f32.xlu0 %v4297_v46 }
 0x317   : > { %1366 = vmax.xlane.f32.xlu1 %v4307_v49 }
 0x380   : > { %v1345_v51 = vpop.xlane.xlu1 %1344 }
 0x381   : > { %v4313_v53 = vmax.f32 %v4310_v50, %v1345_v51 }
 0x382   : > { %v1341_v54 = vpop.xlane.xlu0 %1340 }
 0x383   : > { %1912 = vst.msk [vmem:[#allocation2 + $0x10] sm:$0xff] %vm1644_vm5, %v4313_v53  ;;  %v1372_v56 = vmax.f32 %v1324_v52, %v1341_v54  ;;  %1448 = vperm.xlu1 %3644, %v4313_v53   ;;  %v1337_v54 = vld [vmem:[#allocation2 + $0x68] sm:$0xff] }
 0x384   : > { %v1347_v57 = vpop.xlane.xlu1 %1346 }
 0x385   : > { %1910 = vst.msk [vmem:[#allocation2] sm:$0xff] %vm1644_vm5, %v1372_v56  ;;  %v1375_v59 = vmax.f32 %v1327_v55, %v1347_v57  ;;  %1438 = vperm.xlu0 %3643, %v1372_v56   ;;  %v1388_v16 = vsub.f32 %v1324_v52, %v1372_v56 }
 0x386   : > { %v1343_v60 = vpop.xlane.xlu0 %1342 }
 0x387   : > { %1913 = vst.msk [vmem:[#allocation2 + $0x18] sm:$0xff] %vm1644_vm5, %v1375_v59  ;;  %v1373_v61 = vmax.f32 %v4318_v58, %v1343_v60  ;;  %1453 = vperm.xlu1 %3644, %v1375_v59   ;;  %v1391_v22 = vsub.f32 %v1327_v55, %v1375_v59  ;;  %v1404_v25 = vmul.f32 1.442695, %v1388_v16  ;;  %v1390_v55 = vsub.f32 %v4310_v50, %v4313_v53 }
 0x389   : > { %1911 = vst.msk [vmem:[#allocation2 + $0x8] sm:$0xff] %vm1644_vm5, %v1373_v61  ;;  %v1389_v29 = vsub.f32 %v4318_v58, %v1373_v61  ;;  %v1410_v31 = vmul.f32 1.442695, %v1391_v22  ;;  %3665 = vpow2.f32 %v1404_v25  ;;  %v1408_v53 = vmul.f32 1.442695, %v1390_v55 }
 0x38a   : > { %v1349_v63 = vpop.xlane.xlu0 %1348 }
 0x38b   : > { %v4327_v1 = vmax.f32 %v4323_v62, %v1349_v63  ;;  %1443 = vperm.xlu1 %3644, %v1373_v61   ;;  %v1406_v56 = vmul.f32 1.442695, %v1389_v29  ;;  %3667 = vpow2.f32 %v1410_v31 }
 0x38c   : > { %v1355_v2 = vpop.xlane.xlu1 %1354 }
 0x38d   : > { %1914 = vst.msk [vmem:[#allocation2 + $0x20] sm:$0xff] %vm1644_vm5, %v4327_v1  ;;  %v1379_v4 = vmax.f32 %v1331_v0, %v1355_v2  ;;  %3669 = vpow2.f32 %v1406_v56 }
 0x38e   : > { %v1353_v5 = vpop.xlane.xlu0 %1352 }
 0x38f   : > { %1917 = vst.msk [vmem:[#allocation2 + $0x38] sm:$0xff] %vm1644_vm5, %v1379_v4  ;;  %v4337_v7 = vmax.f32 %v4329_v3, %v1353_v5  ;;  %v1395_v40 = vsub.f32 %v1331_v0, %v1379_v4  ;;  %v1392_v0 = vsub.f32 %v4323_v62, %v4327_v1 }
 0x390   : > { %v1351_v8 = vpop.xlane.xlu1 %1350 }
 0x391   : > { %1916 = vst.msk [vmem:[#allocation2 + $0x30] sm:$0xff] %vm1644_vm5, %v4337_v7  ;;  %v1377_v10 = vmax.f32 %v4333_v6, %v1351_v8  ;;  %1468 = vperm.xlu1 %3644, %v4337_v7   ;;  %v1418_v60 = vmul.f32 1.442695, %v1395_v40  ;;  %v1412_v5 = vmul.f32 1.442695, %v1392_v0 }
 0x392   : > { %v1357_v11 = vpop.xlane.xlu0 %1356 }
 0x393   : > { %1915 = vst.msk [vmem:[#allocation2 + $0x28] sm:$0xff] %vm1644_vm5, %v1377_v10  ;;  %v4349_v13 = vmax.f32 %v4339_v9, %v1357_v11  ;;  %v1393_v61 = vsub.f32 %v4333_v6, %v1377_v10  ;;  %3671 = vpow2.f32 %v1418_v60  ;;  %v1394_v6 = vsub.f32 %v4329_v3, %v4337_v7 }
 0x394   : > { %v1363_v14 = vpop.xlane.xlu1 %1362  ;;  %3673 = vpow2.f32 %v1408_v53 }
 0x395   : > { %1918 = vst.msk [vmem:[#allocation2 + $0x40] sm:$0xff] %vm1644_vm5, %v4349_v13  ;;  %v1383_v17 = vmax.f32 %v4345_v12, %v1363_v14  ;;  %1458 = vperm.xlu1 %3644, %v4327_v1   ;;  %v1414_v2 = vmul.f32 1.442695, %v1393_v61  ;;  %v1396_v14 = vsub.f32 %v4339_v9, %v4349_v13 }
 0x396   : > { %v1361_v18 = vpop.xlane.xlu0 %1360  ;;  %v4407_v1 = vpop.eup %3665 }
 0x397   : > { %1921 = vst.msk [vmem:[#allocation2 + $0x58] sm:$0xff] %vm1644_vm5, %v1383_v17  ;;  %v4361_v21 = vmax.f32 %v4351_v15, %v1361_v18  ;;  %3675 = vpow2.f32 %v1414_v2 }
 0x398   : > { %v1359_v23 = vpop.xlane.xlu1 %1358  ;;  %3677 = vpow2.f32 %v1412_v5 }
 0x399   : > { %1920 = vst.msk [vmem:[#allocation2 + $0x50] sm:$0xff] %vm1644_vm5, %v4361_v21  ;;  %v1381_v26 = vmax.f32 %v4357_v20, %v1359_v23  ;;  %1463 = vperm.xlu1 %3644, %v1377_v10   ;;  %v1416_v10 = vmul.f32 1.442695, %v1394_v6  ;;  %v1398_v11 = vsub.f32 %v4351_v15, %v4361_v21 }
 0x39a   : > { %v1365_v27 = vpop.xlane.xlu0 %1364 }
 0x39b   : > { %1919 = vst.msk [vmem:[#allocation2 + $0x48] sm:$0xff] %vm1644_vm5, %v1381_v26  ;;  %v4373_v30 = vmax.f32 %v4363_v24, %v1365_v27  ;;  %1483 = vperm.xlu0 %3643, %v1381_v26   ;;  %v1397_v62 = vsub.f32 %v4357_v20, %v1381_v26  ;;  %v1424_v16 = vmul.f32 1.442695, %v1398_v11  ;;  %v1420_v20 = vmul.f32 1.442695, %v1396_v14 }
 0x39c   : > { %v1371_v32 = vpop.xlane.xlu1 %1370 }
 0x39d   : > { %1922 = vst.msk [vmem:[#allocation2 + $0x60] sm:$0xff] %vm1644_vm5, %v4373_v30  ;;  %v4380_v51 = vmax.f32 %v4368_v28, %v1371_v32  ;;  %1473 = vperm.xlu1 %3644, %v1379_v4   ;;  %v1399_v4 = vsub.f32 %v4345_v12, %v1383_v17  ;;  %v4412_v12 = vpop.eup %3667  ;;  %v1422_v3 = vmul.f32 1.442695, %v1397_v62 }
 0x39e   : > { %v1369_v52 = vpop.xlane.xlu0 %1368 }
 0x39f   : > { %v1403_v57 = vsub.f32 %v4368_v28, %v4380_v51  ;;  %1925 = vst.msk [vmem:[#allocation2 + $0x78] sm:$0xff] %vm1644_vm5, %v4380_v51  ;;  %v4389_v58 = vmax.f32 %v4375_v33, %v1369_v52  ;;  %1493 = vperm.xlu0 %3643, %v1383_v17   ;;  %v1426_v8 = vmul.f32 1.442695, %v1399_v4  ;;  %v4418_v17 = vpop.eup %3669 }
 0x3a0   : > { %v1367_v59 = vpop.xlane.xlu1 %1366  ;;  %v4421_v18 = vpop.eup %3671 }
 0x3a1   : > { %v1402_v63 = vsub.f32 %v4375_v33, %v4389_v58  ;;  %1924 = vst.msk [vmem:[#allocation2 + $0x70] sm:$0xff] %vm1644_vm5, %v4389_v58  ;;  %v1385_v50 = vmax.f32 %v1337_v54, %v1367_v59  ;;  %1478 = vperm.xlu1 %3644, %v4349_v13   ;;  %3679 = vpow2.f32 %v1426_v8  ;;  %v4426_v22 = vpop.eup %3673 }
 0x3a2   : > { %3681 = vpow2.f32 %v1416_v10 }
 0x3a3   : > { %1923 = vst.msk [vmem:[#allocation2 + $0x68] sm:$0xff] %vm1644_vm5, %v1385_v50  ;;  %1503 = vperm.xlu0 %3643, %v1385_v50   ;;  %v1401_v7 = vsub.f32 %v1337_v54, %v1385_v50  ;;  %3683 = vpow2.f32 %v1422_v3 }
 0x3a4   : > { %3685 = vpow2.f32 %v1424_v16  ;;  %v4429_v9 = vpop.eup %3675 }
 0x3a5   : > { %1488 = vperm.xlu1 %3644, %v4361_v21   ;;  %v1430_v15 = vmul.f32 1.442695, %v1401_v7  ;;  %v1400_v21 = vsub.f32 %v4363_v24, %v4373_v30  ;;  %v4432_v23 = vpop.eup %3677 }
 0x3a7   : > { %1513 = vperm.xlu0 %3643, %v4380_v51   ;;  %3687 = vpow2.f32 %v1430_v15  ;;  %v1428_v13 = vmul.f32 1.442695, %v1400_v21 }
 0x3a8   : > { %3689 = vpow2.f32 %v1420_v20 }
 0x3a9   : > { %1498 = vperm.xlu1 %3644, %v4373_v30   ;;  %3691 = vpow2.f32 %v1428_v13 }
 0x3ab   : > { %1679 = vperm.xlu0 %3643, %v4407_v1  }
 0x3ad   : > { %1508 = vperm.xlu1 %3644, %v4389_v58  }
 0x3ae   : > { %v4435_v25 = vpop.eup %3679 }
 0x3af   : > { %1694 = vperm.xlu0 %3643, %v4412_v12   ;;  %v4438_v24 = vpop.eup %3681 }
 0x3b0   : > { %v4441_v26 = vpop.eup %3683 }
 0x3b1   : > { %1684 = vperm.xlu1 %3644, %v4418_v17   ;;  %v4444_v27 = vpop.eup %3685 }
 0x3b3   : > { %1714 = vperm.xlu0 %3643, %v4421_v18  }
 0x3b4   : > { %v4447_v29 = vpop.eup %3687 }
 0x3b5   : > { %1689 = vperm.xlu1 %3644, %v4426_v22   ;;  %v4450_v30 = vpop.eup %3689 }
 0x3b6   : > { %v4453_v31 = vpop.eup %3691 }
 0x3b7   : > { %1704 = vperm.xlu0 %3643, %v4429_v9  }
 0x3b9   : > { %1699 = vperm.xlu1 %3644, %v4432_v23  }
 0x3bb   : > { %1734 = vperm.xlu0 %3643, %v4435_v25  }
 0x3bd   : > { %1709 = vperm.xlu1 %3644, %v4438_v24  }
 0x3bf   : > { %1724 = vperm.xlu0 %3643, %v4441_v26  }
 0x3c1   : > { %1729 = vperm.xlu1 %3644, %v4444_v27  }
 0x3c3   : > { %1744 = vperm.xlu0 %3643, %v4447_v29  }
 0x3c5   : > { %1719 = vperm.xlu1 %3644, %v4450_v30  }
 0x3c9   : > { %1739 = vperm.xlu1 %3644, %v4453_v31  }
 0x3fe   : > { %v1449_v32 = vpop.permute.xlu1 %1448 }
 0x3ff   : > { %v1518_v40 = vsub.f32 %v4262_v34, %v1449_v32 }
 0x400   : > { %v1439_v52 = vpop.permute.xlu0 %1438 }
 0x401   : > { %v1536_v54 = vmul.f32 1.442695, %v1518_v40  ;;  %v1516_v55 = vsub.f32 %v4265_v19, %v1439_v52 }
 0x402   : > { %v1454_v56 = vpop.permute.xlu1 %1453 }
 0x403   : > { %3693 = vpow2.f32 %v1536_v54  ;;  %v1532_v59 = vmul.f32 1.442695, %v1516_v55  ;;  %v1519_v60 = vsub.f32 %v4268_v35, %v1454_v56 }
 0x405   : > { %3695 = vpow2.f32 %v1532_v59  ;;  %v1538_v61 = vmul.f32 1.442695, %v1519_v60 }
 0x406   : > { %v1444_v50 = vpop.permute.xlu1 %1443 }
 0x407   : > { %v1517_v53 = vsub.f32 %v4271_v36, %v1444_v50  ;;  %3697 = vpow2.f32 %v1538_v61 }
 0x409   : > { %v1534_v0 = vmul.f32 1.442695, %v1517_v53 }
 0x40b   : > { %3699 = vpow2.f32 %v1534_v0 }
 0x40c   : > { %v1469_v2 = vpop.permute.xlu1 %1468 }
 0x40d   : > { %v1522_v34 = vsub.f32 %v4274_v37, %v1469_v2 }
 0x40f   : > { %v1544_v4 = vmul.f32 1.442695, %v1522_v34 }
 0x410   : > { %v3694_v5 = vpop.eup %3693  ;;  %v1459_v6 = vpop.permute.xlu1 %1458 }
 0x411   : > { %3701 = vpow2.f32 %v1544_v4  ;;  %v1520_v19 = vsub.f32 %v4276_v38, %v1459_v6  ;;  %1600 = vadd.xlane.f32.xlu0 %v3694_v5 }
 0x412   : > { %v3696_v8 = vpop.eup %3695 }
 0x413   : > { %v1540_v35 = vmul.f32 1.442695, %v1520_v19  ;;  %1596 = vadd.xlane.f32.xlu1 %v3696_v8 }
 0x414   : > { %v1464_v62 = vpop.permute.xlu1 %1463  ;;  %v3698_v10 = vpop.eup %3697 }
 0x415   : > { %3703 = vpow2.f32 %v1540_v35  ;;  %v1521_v36 = vsub.f32 %v4282_v41, %v1464_v62  ;;  %v1774_v20 = vpack.c.bf16 %v3698_v10, %v3694_v5 }
 0x416   : > { %v1484_v11 = vpop.permute.xlu0 %1483 }
 0x417   : > { %v1542_v3 = vmul.f32 1.442695, %v1521_v36  ;;  %1602 = vadd.xlane.f32.xlu1 %v3698_v10  ;;  %v1525_v37 = vsub.f32 %v4294_v45, %v1484_v11 }
 0x418   : > { %v3700_v7 = vpop.eup %3699  ;;  %v1474_v14 = vpop.permute.xlu1 %1473 }
 0x419   : > { %3705 = vpow2.f32 %v1542_v3  ;;  %v1523_v16 = vsub.f32 %v4279_v39, %v1474_v14  ;;  %1598 = vadd.xlane.f32.xlu0 %v3700_v7  ;;  %v1773_v38 = vpack.c.bf16 %v3700_v7, %v3696_v8  ;;  %v1550_v13 = vmul.f32 1.442695, %v1525_v37 }
 0x41a   : > { %v1494_v15 = vpop.permute.xlu0 %1493 }
 0x41b   : > { %v1546_v21 = vmul.f32 1.442695, %v1523_v16  ;;  %3479 = vmatprep.mubr.bf16.mxu0 %v1773_v38  ;;  %v1527_v41 = vsub.f32 %v4291_v44, %v1494_v15  ;;  %v1432_v16 = vmul.f32 1.442695, %v1402_v63  ;;  %v1434_v38 = vmul.f32 1.442695, %v1403_v57 }
 0x41c   : > { %3480 = vmatmul.mubr.bf16.vlgmr.msra.gmra.mxu0 %v1774_v20  ;;  %v1479_v32 = vpop.permute.xlu1 %1478 }
 0x41d   : > { %3707 = vpow2.f32 %v1546_v21  ;;  %v1524_v40 = vsub.f32 %v4288_v43, %v1479_v32  ;;  %v1554_v39 = vmul.f32 1.442695, %v1527_v41 }
 0x41e   : > { %v3702_v52 = vpop.eup %3701  ;;  %v1504_v45 = vpop.permute.xlu0 %1503  ;;  %3709 = vpow2.f32 %v1550_v13 }
 0x41f   : > { %v1548_v54 = vmul.f32 1.442695, %v1524_v40  ;;  %1608 = vadd.xlane.f32.xlu0 %v3702_v52  ;;  %v1529_v55 = vsub.f32 %v4307_v49, %v1504_v45 }
 0x420   : > { %v1489_v56 = vpop.permute.xlu1 %1488 }
 0x421   : > { %3711 = vpow2.f32 %v1548_v54  ;;  %v1526_v59 = vsub.f32 %v4285_v42, %v1489_v56  ;;  %v1558_v50 = vmul.f32 1.442695, %v1529_v55  ;;  %v1566_v54 = vld [vmem:[#allocation3 + $0x10] sm:$0xff]  ;;  %v1564_v55 = vld [vmem:[#allocation3] sm:$0xff] }
 0x422   : > { %v3704_v60 = vpop.eup %3703  ;;  %v1514_v61 = vpop.permute.xlu0 %1513  ;;  %3713 = vpow2.f32 %v1554_v39  ;;  %v1582_v56 = vmul.f32 %v4426_v22, %v1566_v54 }
 0x423   : > { %v1552_v44 = vmul.f32 1.442695, %v1526_v59  ;;  %1604 = vadd.xlane.f32.xlu0 %v3704_v60  ;;  %v1531_v43 = vsub.f32 %v4303_v48, %v1514_v61  ;;  %v1580_v61 = vmul.f32 %v4407_v1, %v1564_v55 }
 0x424   : > { %v1499_v53 = vpop.permute.xlu1 %1498 }
 0x425   : > { %3715 = vpow2.f32 %v1552_v44  ;;  %v1528_v0 = vsub.f32 %v4300_v47, %v1499_v53  ;;  %v1562_v49 = vmul.f32 1.442695, %v1531_v43  ;;  %v1565_v53 = vld [vmem:[#allocation3 + $0x8] sm:$0xff] }
 0x426   : > { %v3706_v2 = vpop.eup %3705  ;;  %3717 = vpow2.f32 %v1558_v50  ;;  %v4484_v21 = vpop.permute.xlu0 %1679  ;;  %v1567_v50 = vld [vmem:[#allocation3 + $0x18] sm:$0xff] }
 0x427   : > { %v1556_v34 = vmul.f32 1.442695, %v1528_v0  ;;  %v1775_v4 = vpack.c.bf16 %v3706_v2, %v3704_v60  ;;  %v1583_v0 = vmul.f32 %v4412_v12, %v1567_v50 }
 0x428   : > { %v1509_v5 = vpop.permute.xlu1 %1508 }
 0x429   : > { %3719 = vpow2.f32 %v1556_v34  ;;  %v1530_v42 = vsub.f32 %v4297_v46, %v1509_v5  ;;  %3483 = vmatprep.mubr.bf16.mxu0 %v1775_v4  ;;  %v1581_v4 = vmul.f32 %v4418_v17, %v1565_v53  ;;  %v1570_v5 = vld [vmem:[#allocation3 + $0x30] sm:$0xff]  ;;  %v1571_v17 = vld [vmem:[#allocation3 + $0x38] sm:$0xff] }
 0x42a   : > { %v3708_v6 = vpop.eup %3707  ;;  %3721 = vpow2.f32 %v1562_v49  ;;  %v4488_v58 = vpop.permute.xlu0 %1694  ;;  %v1586_v1 = vmul.f32 %v4438_v24, %v1570_v5 }
 0x42b   : > { %v1560_v19 = vmul.f32 1.442695, %v1530_v42  ;;  %1610 = vadd.xlane.f32.xlu1 %v3708_v6  ;;  %v1776_v8 = vpack.c.bf16 %v3708_v6, %v3702_v52  ;;  %v3710_v48 = vpop.eup %3709  ;;  %v1568_v6 = vld [vmem:[#allocation3 + $0x20] sm:$0xff] }
 0x42c   : > { %v4486_v33 = vpop.permute.xlu1 %1684  ;;  %v1584_v12 = vmul.f32 %v4432_v23, %v1568_v6  ;;  %v1664_v6 = vld [vmem:[#allocation4 + $0x18] sm:$0xff] }
 0x42d   : > { %3723 = vpow2.f32 %v1560_v19  ;;  %3484 = vmatmul.mubr.bf16.gmra.mxu0 %v1776_v8 }
 0x42e   : > { %v3712_v35 = vpop.eup %3711  ;;  %3725 = vpow2.f32 %v1432_v16  ;;  %v4492_v13 = vpop.permute.xlu0 %1714  ;;  %v1573_v16 = vld [vmem:[#allocation3 + $0x48] sm:$0xff] }
 0x42f   : > { %1606 = vadd.xlane.f32.xlu1 %v3706_v2  ;;  %v1777_v47 = vpack.c.bf16 %v3710_v48, %v3712_v35  ;;  %v3714_v62 = vpop.eup %3713  ;;  %3727 = vpow2.f32 %v1434_v38  ;;  %v1589_v55 = vmul.f32 %v4441_v26, %v1573_v16 }
 0x430   : > { %v4490_v63 = vpop.permute.xlu1 %1689 }
 0x431   : > { %3487 = vmatprep.mubr.bf16.mxu0 %v1777_v47 }
 0x432   : > { %v3716_v36 = vpop.eup %3715  ;;  %v4496_v51 = vpop.permute.xlu0 %1704 }
 0x433   : > { %1618 = vadd.xlane.f32.xlu1 %v3714_v62  ;;  %1616 = vadd.xlane.f32.xlu0 %v3716_v36  ;;  %v1778_v10 = vpack.c.bf16 %v3714_v62, %v3716_v36  ;;  %v3718_v11 = vpop.eup %3717  ;;  %v1569_v62 = vld [vmem:[#allocation3 + $0x28] sm:$0xff] }
 0x434   : > { %v4494_v28 = vpop.permute.xlu1 %1699  ;;  %v1585_v24 = vmul.f32 %v4429_v9, %v1569_v62 }
 0x435   : > { %3488 = vmatmul.mubr.bf16.gmra.mxu0 %v1778_v10 }
 0x436   : > { %v3720_v46 = vpop.eup %3719  ;;  %v4500_v41 = vpop.permute.xlu0 %1734 }
 0x437   : > { %1614 = vadd.xlane.f32.xlu1 %v3710_v48  ;;  %1612 = vadd.xlane.f32.xlu0 %v3712_v35  ;;  %v1779_v3 = vpack.c.bf16 %v3718_v11, %v3720_v46  ;;  %v3722_v7 = vpop.eup %3721  ;;  %v1587_v35 = vmul.f32 %v4421_v18, %v1571_v17  ;;  %v1572_v18 = vld [vmem:[#allocation3 + $0x40] sm:$0xff] }
 0x438   : > { %v4498_v57 = vpop.permute.xlu1 %1709  ;;  %v1588_v9 = vmul.f32 %v4450_v30, %v1572_v18  ;;  %v1577_v30 = vld [vmem:[#allocation3 + $0x68] sm:$0xff] }
 0x439   : > { %3491 = vmatprep.mubr.bf16.mxu0 %v1779_v3 }
 0x43a   : > { %v3724_v37 = vpop.eup %3723  ;;  %v4504_v40 = vpop.permute.xlu0 %1724 }
 0x43b   : > { %1626 = vadd.xlane.f32.xlu1 %v3722_v7  ;;  %1624 = vadd.xlane.f32.xlu0 %v3724_v37  ;;  %v1780_v14 = vpack.c.bf16 %v3722_v7, %v3724_v37  ;;  %v4478_v15 = vpop.eup %3725 }
 0x43c   : > { %v4481_v20 = vpop.eup %3727  ;;  %v4502_v32 = vpop.permute.xlu1 %1729 }
 0x43d   : > { %3492 = vmatmul.mubr.bf16.gmra.mxu0 %v1780_v14 }
 0x43e   : > { %v4508_v45 = vpop.permute.xlu0 %1744 }
 0x43f   : > { %1622 = vadd.xlane.f32.xlu1 %v3718_v11  ;;  %1620 = vadd.xlane.f32.xlu0 %v3720_v46  ;;  %v1574_v11 = vld [vmem:[#allocation3 + $0x50] sm:$0xff]  ;;  %v1575_v46 = vld [vmem:[#allocation3 + $0x58] sm:$0xff] }
 0x440   : > { %v4506_v52 = vpop.permute.xlu1 %1719  ;;  %v1590_v23 = vmul.f32 %v4444_v27, %v1574_v11  ;;  %v1591_v7 = vmul.f32 %v4435_v25, %v1575_v46  ;;  %v1579_v27 = vld [vmem:[#allocation3 + $0x78] sm:$0xff] }
 0x441   : > { %v1595_v50 = vmul.f32 %v4481_v20, %v1579_v27 }
 0x444   : > { %v4510_v39 = vpop.permute.xlu1 %1739 }
 0x450   : > { %1749 = vperm.xlu1 %3644, %v4478_v15  }
 0x455   : > { %1754 = vperm.xlu0 %3643, %v4481_v20   ;;  %v1663_v20 = vld [vmem:[#allocation4 + $0x10] sm:$0xff] }
 0x49a   : > { %v1601_v59 = vpop.xlane.xlu0 %1600 }
 0x49b   : > { %v1630_v60 = vadd.f32 %v1601_v59, %v1582_v56 }
 0x49c   : > { %v1597_v44 = vpop.xlane.xlu1 %1596 }
 0x49d   : > { %1647 = vst.msk [vmem:[#allocation3 + $0x10] sm:$0xff] %vm1644_vm5, %v1630_v60  ;;  %v1628_v43 = vadd.f32 %v1597_v44, %v1580_v61  ;;  %v1578_v60 = vld [vmem:[#allocation3 + $0x70] sm:$0xff] }
 0x49e   : > { %v1594_v44 = vmul.f32 %v4478_v15, %v1578_v60  ;;  %v1670_v60 = vld [vmem:[#allocation4 + $0x48] sm:$0xff] }
 0x49f   : > { %1645 = vst.msk [vmem:[#allocation3] sm:$0xff] %vm1644_vm5, %v1628_v43 }
 0x4a0   : > { %v1603_v2 = vpop.xlane.xlu1 %1602 }
 0x4a1   : > { %v1631_v34 = vadd.f32 %v1603_v2, %v1583_v0  ;;  %v1576_v0 = vld [vmem:[#allocation3 + $0x60] sm:$0xff] }
 0x4a2   : > { %v1599_v49 = vpop.xlane.xlu0 %1598 }
 0x4a3   : > { %1648 = vst.msk [vmem:[#allocation3 + $0x18] sm:$0xff] %vm1644_vm5, %v1631_v34  ;;  %v1629_v22 = vadd.f32 %v1599_v49, %v1581_v4  ;;  %v1592_v34 = vmul.f32 %v4453_v31, %v1576_v0  ;;  %v1593_v4 = vmul.f32 %v4447_v29, %v1577_v30  ;;  %v1662_v31 = vld [vmem:[#allocation4 + $0x8] sm:$0xff]  ;;  %v1760_v29 = vmul.f32 %v4488_v58, %v1664_v6  ;;  %v1668_v58 = vld [vmem:[#allocation4 + $0x38] sm:$0xff] }
 0x4a5   : > { %1646 = vst.msk [vmem:[#allocation3 + $0x8] sm:$0xff] %vm1644_vm5, %v1629_v22 }
 0x4a8   : > { %v1609_v42 = vpop.xlane.xlu0 %1608 }
 0x4a9   : > { %v1634_v19 = vadd.f32 %v1609_v42, %v1586_v1  ;;  %v1661_v1 = vld [vmem:[#allocation4] sm:$0xff]  ;;  %v1759_v42 = vmul.f32 %v4490_v63, %v1663_v20 }
 0x4ab   : > { %1651 = vst.msk [vmem:[#allocation3 + $0x30] sm:$0xff] %vm1644_vm5, %v1634_v19 }
 0x4ac   : > { %v1605_v8 = vpop.xlane.xlu0 %1604 }
 0x4ad   : > { %v1632_v48 = vadd.f32 %v1605_v8, %v1584_v12  ;;  %v1757_v12 = vmul.f32 %v4484_v21, %v1661_v1  ;;  %v1667_v21 = vld [vmem:[#allocation4 + $0x30] sm:$0xff] }
 0x4af   : > { %1649 = vst.msk [vmem:[#allocation3 + $0x20] sm:$0xff] %vm1644_vm5, %v1632_v48 }
 0x4b4   : > { %v1611_v47 = vpop.xlane.xlu1 %1610 }
 0x4b5   : > { %v1635_v36 = vadd.f32 %v1611_v47, %v1587_v35  ;;  %v1758_v47 = vmul.f32 %v4486_v33, %v1662_v31 }
 0x4b7   : > { %1652 = vst.msk [vmem:[#allocation3 + $0x38] sm:$0xff] %vm1644_vm5, %v1635_v36 }
 0x4b8   : > { %v1607_v10 = vpop.xlane.xlu1 %1606 }
 0x4b9   : > { %v1633_v3 = vadd.f32 %v1607_v10, %v1585_v24  ;;  %v1665_v24 = vld [vmem:[#allocation4 + $0x20] sm:$0xff]  ;;  %v1763_v10 = vmul.f32 %v4498_v57, %v1667_v21 }
 0x4ba   : > { %v1761_v46 = vmul.f32 %v4494_v28, %v1665_v24  ;;  %v1669_v57 = vld [vmem:[#allocation4 + $0x40] sm:$0xff] }
 0x4bb   : > { %1650 = vst.msk [vmem:[#allocation3 + $0x28] sm:$0xff] %vm1644_vm5, %v1633_v3 }
 0x4bc   : > { %v1617_v37 = vpop.xlane.xlu0 %1616  ;;  %v1619_v14 = vpop.xlane.xlu1 %1618 }
 0x4bd   : > { %v1638_v38 = vadd.f32 %v1617_v37, %v1590_v23  ;;  %v1639_v54 = vadd.f32 %v1619_v14, %v1591_v7  ;;  %v1666_v23 = vld [vmem:[#allocation4 + $0x28] sm:$0xff]  ;;  %v1764_v7 = vmul.f32 %v4492_v13, %v1668_v58  ;;  %v1671_v14 = vld [vmem:[#allocation4 + $0x50] sm:$0xff]  ;;  %v1765_v13 = vmul.f32 %v4506_v52, %v1669_v57 }
 0x4be   : > { %v1762_v16 = vmul.f32 %v4496_v51, %v1666_v23 }
 0x4bf   : > { %1655 = vst.msk [vmem:[#allocation3 + $0x50] sm:$0xff] %vm1644_vm5, %v1638_v38  ;;  %1656 = vst.msk [vmem:[#allocation3 + $0x58] sm:$0xff] %vm1644_vm5, %v1639_v54 }
 0x4c0   : > { %v1613_v56 = vpop.xlane.xlu0 %1612  ;;  %v1615_v59 = vpop.xlane.xlu1 %1614 }
 0x4c1   : > { %v1636_v61 = vadd.f32 %v1613_v56, %v1588_v9  ;;  %v1637_v25 = vadd.f32 %v1615_v59, %v1589_v55  ;;  %v1767_v9 = vmul.f32 %v4502_v32, %v1671_v14  ;;  %v1672_v55 = vld [vmem:[#allocation4 + $0x58] sm:$0xff] }
 0x4c2   : > { %v1768_v51 = vmul.f32 %v4500_v41, %v1672_v55 }
 0x4c3   : > { %1653 = vst.msk [vmem:[#allocation3 + $0x40] sm:$0xff] %vm1644_vm5, %v1636_v61  ;;  %1654 = vst.msk [vmem:[#allocation3 + $0x48] sm:$0xff] %vm1644_vm5, %v1637_v25  ;;  %v1675_v25 = vld [vmem:[#allocation4 + $0x70] sm:$0xff] }
 0x4c4   : > { %v1625_v43 = vpop.xlane.xlu0 %1624  ;;  %v1627_v53 = vpop.xlane.xlu1 %1626 }
 0x4c5   : > { %v1642_v2 = vadd.f32 %v1625_v43, %v1594_v44  ;;  %v1643_v26 = vadd.f32 %v1627_v53, %v1595_v50  ;;  %v1766_v50 = vmul.f32 %v4504_v40, %v1670_v60  ;;  %v1673_v53 = vld [vmem:[#allocation4 + $0x60] sm:$0xff] }
 0x4c7   : > { %1659 = vst.msk [vmem:[#allocation3 + $0x70] sm:$0xff] %vm1644_vm5, %v1642_v2  ;;  %1660 = vst.msk [vmem:[#allocation3 + $0x78] sm:$0xff] %vm1644_vm5, %v1643_v26  ;;  %v1676_v2 = vld [vmem:[#allocation4 + $0x78] sm:$0xff] }
 0x4c8   : > { %v1621_v49 = vpop.xlane.xlu0 %1620  ;;  %v1623_v22 = vpop.xlane.xlu1 %1622 }
 0x4c9   : > { %v1640_v5 = vadd.f32 %v1621_v49, %v1592_v34  ;;  %v1641_v15 = vadd.f32 %v1623_v22, %v1593_v4  ;;  %v1769_v34 = vmul.f32 %v4510_v39, %v1673_v53  ;;  %v1674_v49 = vld [vmem:[#allocation4 + $0x68] sm:$0xff] }
 0x4ca   : > { %v1770_v20 = vmul.f32 %v4508_v45, %v1674_v49 }
 0x4cb   : > { %1657 = vst.msk [vmem:[#allocation3 + $0x60] sm:$0xff] %vm1644_vm5, %v1640_v5  ;;  %1658 = vst.msk [vmem:[#allocation3 + $0x68] sm:$0xff] %vm1644_vm5, %v1641_v15 }
 0x4cc   : > { %v1750_v44 = vpop.permute.xlu1 %1749 }
 0x4cd   : > { %v1771_v0 = vmul.f32 %v1750_v44, %v1675_v25 }
 0x4d0   : > { %v1755_v26 = vpop.permute.xlu0 %1754 }
 0x4d1   : > { %v1772_v40 = vmul.f32 %v1755_v26, %v1676_v2 }
 0x4dc   : > { %v3481_v19 = vpop.f32.mrf.mxu0 }
 0x4dd   : > { %v1880_v8 = vadd.f32 %v3481_v19, %v1759_v42 }
 0x4de   : > { %v1815_v48 = vpop.f32.mrf.mxu0 }
 0x4df   : > { %1896 = vst.msk [vmem:[#allocation4 + $0x10] sm:$0xff] %vm872_vm4, %v1880_v8  ;;  %v1878_v17 = vadd.f32 %v1815_v48, %v1757_v12 }
 0x4e0   : > { %v3482_v35 = vpop.f32.mrf.mxu0 }
 0x4e1   : > { %1894 = vst.msk [vmem:[#allocation4] sm:$0xff] %vm872_vm4, %v1878_v17  ;;  %v1881_v62 = vadd.f32 %v3482_v35, %v1760_v29 }
 0x4e2   : > { %v1818_v36 = vpop.f32.mrf.mxu0 }
 0x4e3   : > { %1897 = vst.msk [vmem:[#allocation4 + $0x18] sm:$0xff] %vm872_vm4, %v1881_v62  ;;  %v1879_v63 = vadd.f32 %v1818_v36, %v1758_v47 }
 0x4e5   : > { %1895 = vst.msk [vmem:[#allocation4 + $0x8] sm:$0xff] %vm872_vm4, %v1879_v63 }
 0x4ed   : > { %v3485_v11 = vpop.f32.mrf.mxu0 }
 0x4ee   : > { %v1884_v3 = vadd.f32 %v3485_v11, %v1763_v10 }
 0x4ef   : > { %v1831_v33 = vpop.f32.mrf.mxu0 }
 0x4f0   : > { %1900 = vst.msk [vmem:[#allocation4 + $0x30] sm:$0xff] %vm872_vm4, %v1884_v3  ;;  %v1882_v37 = vadd.f32 %v1831_v33, %v1761_v46 }
 0x4f1   : > { %v3486_v18 = vpop.f32.mrf.mxu0 }
 0x4f2   : > { %1898 = vst.msk [vmem:[#allocation4 + $0x20] sm:$0xff] %vm872_vm4, %v1882_v37  ;;  %v1885_v38 = vadd.f32 %v3486_v18, %v1764_v7 }
 0x4f3   : > { %v1834_v54 = vpop.f32.mrf.mxu0 }
 0x4f4   : > { %1901 = vst.msk [vmem:[#allocation4 + $0x38] sm:$0xff] %vm872_vm4, %v1885_v38  ;;  %v1883_v28 = vadd.f32 %v1834_v54, %v1762_v16 }
 0x4f5   : > { %v3489_v56 = vpop.f32.mrf.mxu0 }
 0x4f6   : > { %1899 = vst.msk [vmem:[#allocation4 + $0x28] sm:$0xff] %vm872_vm4, %v1883_v28  ;;  %v1888_v59 = vadd.f32 %v3489_v56, %v1767_v9 }
 0x4f7   : > { %v1847_v27 = vpop.f32.mrf.mxu0 }
 0x4f8   : > { %1904 = vst.msk [vmem:[#allocation4 + $0x50] sm:$0xff] %vm872_vm4, %v1888_v59  ;;  %v1886_v61 = vadd.f32 %v1847_v27, %v1765_v13 }
 0x4f9   : > { %v3490_v32 = vpop.f32.mrf.mxu0 }
 0x4fa   : > { %1902 = vst.msk [vmem:[#allocation4 + $0x40] sm:$0xff] %vm872_vm4, %v1886_v61  ;;  %v1889_v43 = vadd.f32 %v3490_v32, %v1768_v51 }
 0x4fb   : > { %v1850_v52 = vpop.f32.mrf.mxu0 }
 0x4fc   : > { %1905 = vst.msk [vmem:[#allocation4 + $0x58] sm:$0xff] %vm872_vm4, %v1889_v43  ;;  %v1887_v30 = vadd.f32 %v1850_v52, %v1766_v50 }
 0x4fd   : > { %v3493_v41 = vpop.f32.mrf.mxu0 }
 0x4fe   : > { %1903 = vst.msk [vmem:[#allocation4 + $0x48] sm:$0xff] %vm872_vm4, %v1887_v30  ;;  %v1892_v4 = vadd.f32 %v3493_v41, %v1771_v0 }
 0x4ff   : > { %v1863_v22 = vpop.f32.mrf.mxu0 }
 0x500   : > { %1908 = vst.msk [vmem:[#allocation4 + $0x70] sm:$0xff] %vm872_vm4, %v1892_v4  ;;  %v1890_v5 = vadd.f32 %v1863_v22, %v1769_v34 }
 0x501   : > { %v3494_v15 = vpop.f32.mrf.mxu0 }
 0x502   : > { %1906 = vst.msk [vmem:[#allocation4 + $0x60] sm:$0xff] %vm872_vm4, %v1890_v5  ;;  %v1893_v1 = vadd.f32 %v3494_v15, %v1772_v40  ;;  %1929 = sbr.rel (%p3205_p1) target bundleno = 2230 (0x8b6), region = 84 }
 0x503   : > { %v1866_v42 = vpop.f32.mrf.mxu0 }
 0x504   : > { %1909 = vst.msk [vmem:[#allocation4 + $0x78] sm:$0xff] %vm872_vm4, %v1893_v1  ;;  %v1891_v6 = vadd.f32 %v1866_v42, %v1770_v20 }
 0x506   : > { %1907 = vst.msk [vmem:[#allocation4 + $0x68] sm:$0xff] %vm872_vm4, %v1891_v6 }
 0x507   : > { %v1932_v39 = vld [vmem:[#allocation3 + $0x10] sm:$0xff]  ;;  %v1930_v19 = vld [vmem:[#allocation3] sm:$0xff]  ;;  %v1933_v12 = vld [vmem:[#allocation3 + $0x18] sm:$0xff]  ;;  %v3898_v8 = vmov 0   ;;  %vm2475_vm6 = vcmask 130112   ;;  %vm2482_vm7 = vcmask 195712  }
 0x508   : > { %3730 = vset.pattern.permute.xlu1 %v3898_v8  ;;  %3729 = vset.pattern.permute.xlu0 %v3898_v8  ;;  %3737 = vrcp.f32 %v1932_v39  ;;  %v1931_v45 = vld [vmem:[#allocation3 + $0x8] sm:$0xff]  ;;  %v1934_v48 = vld [vmem:[#allocation3 + $0x20] sm:$0xff]  ;;  %v1937_v29 = vld [vmem:[#allocation3 + $0x38] sm:$0xff]  ;;  %vm2489_vm8 = vcmask 261312   ;;  %vm2496_vm9 = vcmask 326912   ;;  %vm2503_vm10 = vcmask 392512  }
 0x509   : > { %3739 = vrcp.f32 %v1930_v19  ;;  %v1935_v31 = vld [vmem:[#allocation3 + $0x28] sm:$0xff]  ;;  %v1936_v17 = vld [vmem:[#allocation3 + $0x30] sm:$0xff]  ;;  %v1938_v62 = vld [vmem:[#allocation3 + $0x40] sm:$0xff]  ;;  %vm2510_vm11 = vcmask 458112   ;;  %vm2517_vm12 = vcmask 523712   ;;  %vm2524_vm13 = vcmask 589312  }
 0x50a   : > { %3741 = vrcp.f32 %v1933_v12  ;;  %v3731_v35 = vld [vmem:[%s4914_s7 + $0x8] sm:$0xff]   ;;  %v3732_v21 = vld [vmem:[%s4914_s7] sm:$0xff]   ;;  %v1941_v10 = vld [vmem:[#allocation3 + $0x58] sm:$0xff]  ;;  %vm2531_vm14 = vcmask 654912   ;;  %vm2538_vm15 = vcmask 720512   ;;  %vm2545_vm0 = vcmask 786112  }
 0x50b   : > { %3743 = vrcp.f32 %v1931_v45  ;;  %v1939_v47 = vld [vmem:[#allocation3 + $0x48] sm:$0xff]  ;;  %3495 = vmatprep.subr.bf16.mxu0 %v3731_v35  ;;  %3555 = vmatprep.subr.bf16.mxu1 %v3731_v35  ;;  %v1940_v11 = vld [vmem:[#allocation3 + $0x50] sm:$0xff]  ;;  %v1942_v33 = vld [vmem:[#allocation3 + $0x60] sm:$0xff]  ;;  %vm2552_vm1 = vcmask 851712   ;;  %vm2559_vm2 = vcmask 917312   ;;  %vm2566_vm3 = vcmask 982912  }
 0x50c   : > { %3745 = vrcp.f32 %v1935_v31  ;;  %3496 = vmatpush3.bf16.msra.mxu0 %v3731_v35  ;;  %3557 = vmatpush3.bf16.msra.mxu1 %v3731_v35  ;;  %v1943_v3 = vld [vmem:[#allocation3 + $0x68] sm:$0xff]  ;;  %v1945_v37 = vld [vmem:[#allocation3 + $0x78] sm:$0xff]  ;;  %v1944_v18 = vld [vmem:[#allocation3 + $0x70] sm:$0xff] }
 0x50d   : > { %3747 = vrcp.f32 %v1934_v48  ;;  %3497 = vmatprep.subr.bf16.mxu0 %v3732_v21  ;;  %3556 = vmatprep.subr.bf16.mxu1 %v3732_v21  ;;  %v4584_v13 = vld [vmem:[%s4917_s10 + $0x8] sm:$0xff]   ;;  %v3216_v59 = vld [vmem:[%s4916_s9] ss:$0 sm:$0xff]  ;;  %v1964_v51 = vld [vmem:[#allocation4 + $0x10] sm:$0xff] }
 0x50e   : > { %3749 = vrcp.f32 %v1937_v29  ;;  %v1965_v61 = vld [vmem:[#allocation4 + $0x18] sm:$0xff]  ;;  %v1962_v25 = vld [vmem:[#allocation4] sm:$0xff]  ;;  %v1963_v44 = vld [vmem:[#allocation4 + $0x8] sm:$0xff] }
 0x50f   : > { %3751 = vrcp.f32 %v1936_v17  ;;  %v1967_v30 = vld [vmem:[#allocation4 + $0x28] sm:$0xff]  ;;  %v1966_v26 = vld [vmem:[#allocation4 + $0x20] sm:$0xff]  ;;  %v1969_v40 = vld [vmem:[#allocation4 + $0x38] sm:$0xff] }
 0x510   : > { %3753 = vrcp.f32 %v1939_v47  ;;  %3498 = vmatpush3.bf16.msra.mxu0 %v3732_v21  ;;  %3558 = vmatpush3.bf16.msra.mxu1 %v3732_v21  ;;  %v1968_v5 = vld [vmem:[#allocation4 + $0x30] sm:$0xff]  ;;  %v1971_v39 = vld [vmem:[#allocation4 + $0x48] sm:$0xff]  ;;  %v1970_v19 = vld [vmem:[#allocation4 + $0x40] sm:$0xff] }
 0x511   : > { %3755 = vrcp.f32 %v1938_v62  ;;  %3515 = vmatprep.subr.bf16.mxu1 %v4584_v13  ;;  %v1973_v29 = vld [vmem:[#allocation4 + $0x58] sm:$0xff]  ;;  %v1972_v17 = vld [vmem:[#allocation4 + $0x50] sm:$0xff]  ;;  %v1975_v21 = vld [vmem:[#allocation4 + $0x68] sm:$0xff] }
 0x512   : > { %3757 = vrcp.f32 %v1941_v10 }
 0x513   : > { %3759 = vrcp.f32 %v1940_v11 }
 0x514   : > { %3761 = vrcp.f32 %v1943_v3 }
 0x515   : > { %v3738_v36 = vpop.eup %3737  ;;  %3763 = vrcp.f32 %v1942_v33  ;;  %v1976_v33 = vld [vmem:[#allocation4 + $0x70] sm:$0xff] }
 0x516   : > { %v3740_v63 = vpop.eup %3739  ;;  %1990 = vperm.xlu1 %3730, %v3738_v36   ;;  %3765 = vrcp.f32 %v1945_v37 }
 0x517   : > { %v3742_v24 = vpop.eup %3741  ;;  %1980 = vperm.xlu0 %3729, %v3740_v63   ;;  %3767 = vrcp.f32 %v1944_v18 }
 0x518   : > { %v3744_v58 = vpop.eup %3743 }
 0x519   : > { %v3746_v46 = vpop.eup %3745 }
 0x51a   : > { %1995 = vperm.xlu1 %3730, %v3742_v24   ;;  %v3748_v23 = vpop.eup %3747  ;;  %v1974_v24 = vld [vmem:[#allocation4 + $0x60] sm:$0xff] }
 0x51b   : > { %1985 = vperm.xlu0 %3729, %v3744_v58   ;;  %v3750_v7 = vpop.eup %3749 }
 0x51c   : > { %v3752_v14 = vpop.eup %3751 }
 0x51d   : > { %v3754_v16 = vpop.eup %3753 }
 0x51e   : > { %2005 = vperm.xlu1 %3730, %v3746_v46   ;;  %v3756_v38 = vpop.eup %3755 }
 0x51f   : > { %2000 = vperm.xlu0 %3729, %v3748_v23   ;;  %v3758_v57 = vpop.eup %3757  ;;  %v1977_v23 = vld [vmem:[#allocation4 + $0x78] sm:$0xff] }
 0x520   : > { %v3760_v54 = vpop.eup %3759 }
 0x521   : > { %v3762_v9 = vpop.eup %3761 }
 0x522   : > { %2015 = vperm.xlu1 %3730, %v3750_v7   ;;  %v3764_v28 = vpop.eup %3763 }
 0x523   : > { %2010 = vperm.xlu0 %3729, %v3752_v14   ;;  %v3766_v55 = vpop.eup %3765 }
 0x524   : > { %v3768_v56 = vpop.eup %3767 }
 0x526   : > { %2025 = vperm.xlu1 %3730, %v3754_v16  }
 0x527   : > { %2020 = vperm.xlu0 %3729, %v3756_v38  }
 0x52a   : > { %2035 = vperm.xlu1 %3730, %v3758_v57   ;;  %v3734_v57 = vld [vmem:[%s4917_s10] sm:$0xff]  }
 0x52b   : > { %2030 = vperm.xlu0 %3729, %v3760_v54   ;;  %v2221_v54 = vld [vmem:[%s4915_s8 + $0x10] sm:$0xff] }
 0x52e   : > { %2045 = vperm.xlu1 %3730, %v3762_v9  }
 0x52f   : > { %2040 = vperm.xlu0 %3729, %v3764_v28   ;;  %v2219_v28 = vld [vmem:[%s4915_s8] sm:$0xff] }
 0x532   : > { %2055 = vperm.xlu1 %3730, %v3766_v55  }
 0x533   : > { %2050 = vperm.xlu0 %3729, %v3768_v56  }
 0x536   : > { %2306 = vbcast.lane.b32.xlu1 %v3216_v59, 256 }
 0x537   : > { %2310 = vbcast.lane.b32.xlu0 %v3216_v59, 264 }
 0x53a   : > { %2314 = vbcast.lane.b32.xlu1 %v3216_v59, 272 }
 0x53b   : > { %2322 = vbcast.lane.b32.xlu0 %v3216_v59, 288 }
 0x53e   : > { %2318 = vbcast.lane.b32.xlu1 %v3216_v59, 280 }
 0x53f   : > { %2330 = vbcast.lane.b32.xlu0 %v3216_v59, 304 }
 0x542   : > { %2326 = vbcast.lane.b32.xlu1 %v3216_v59, 296 }
 0x543   : > { %2338 = vbcast.lane.b32.xlu0 %v3216_v59, 320 }
 0x546   : > { %2334 = vbcast.lane.b32.xlu1 %v3216_v59, 312 }
 0x547   : > { %2346 = vbcast.lane.b32.xlu0 %v3216_v59, 336 }
 0x54a   : > { %2342 = vbcast.lane.b32.xlu1 %v3216_v59, 328 }
 0x54b   : > { %2354 = vbcast.lane.b32.xlu0 %v3216_v59, 352 }
 0x54e   : > { %2350 = vbcast.lane.b32.xlu1 %v3216_v59, 344 }
 0x54f   : > { %2362 = vbcast.lane.b32.xlu0 %v3216_v59, 368 }
 0x552   : > { %2358 = vbcast.lane.b32.xlu1 %v3216_v59, 360 }
 0x556   : > { %2366 = vbcast.lane.b32.xlu1 %v3216_v59, 376 }
 0x591   : > { %v1991_v60 = vpop.permute.xlu1 %1990 }
 0x592   : > { %v1981_v27 = vpop.permute.xlu0 %1980  ;;  %v2060_v50 = vmul.f32 %v1991_v60, %v1964_v51 }
 0x593   : > { %v2058_v52 = vmul.f32 %v1981_v27, %v1962_v25  ;;  %v2222_v27 = vld [vmem:[%s4915_s8 + $0x18] sm:$0xff] }
 0x595   : > { %v1996_v32 = vpop.permute.xlu1 %1995 }
 0x596   : > { %v2061_v43 = vmul.f32 %v1996_v32, %v1965_v61  ;;  %v1986_v53 = vpop.permute.xlu0 %1985 }
 0x597   : > { %v2059_v0 = vmul.f32 %v1986_v53, %v1963_v44 }
 0x598   : > { %v2075_v2 = vpack.c.bf16 %v2061_v43, %v2060_v50 }
 0x599   : > { %v2006_v41 = vpop.permute.xlu1 %2005  ;;  %v2074_v34 = vpack.c.bf16 %v2059_v0, %v2058_v52  ;;  %v2229_v0 = vld [vmem:[%s4915_s8 + $0x50] sm:$0xff] }
 0x59a   : > { %v2063_v4 = vmul.f32 %v2006_v41, %v1967_v30  ;;  %v2001_v49 = vpop.permute.xlu0 %2000  ;;  %v2227_v41 = vld [vmem:[%s4915_s8 + $0x40] sm:$0xff] }
 0x59b   : > { %v2062_v22 = vmul.f32 %v2001_v49, %v1966_v26  ;;  %3499 = vmatprep.mubr.msk.bf16.mxu0 %vm872_vm4, %v2074_v34 }
 0x59c   : > { %3500 = vmatmul.mubr.msk.bf16.vlgmr.msra.gmra.mxu0 %vm872_vm4, %v2075_v2 }
 0x59d   : > { %v2076_v15 = vpack.c.bf16 %v2063_v4, %v2062_v22  ;;  %v2016_v20 = vpop.permute.xlu1 %2015  ;;  %v2230_v22 = vld [vmem:[%s4915_s8 + $0x58] sm:$0xff] }
 0x59e   : > { %v2065_v1 = vmul.f32 %v2016_v20, %v1969_v40  ;;  %v2011_v42 = vpop.permute.xlu0 %2010 }
 0x59f   : > { %v2064_v6 = vmul.f32 %v2011_v42, %v1968_v5  ;;  %3503 = vmatprep.mubr.msk.bf16.mxu0 %vm872_vm4, %v2076_v15  ;;  %v2220_v15 = vld [vmem:[%s4915_s8 + $0x8] sm:$0xff] }
 0x5a1   : > { %v2077_v12 = vpack.c.bf16 %v2065_v1, %v2064_v6  ;;  %v2026_v8 = vpop.permute.xlu1 %2025  ;;  %v2228_v1 = vld [vmem:[%s4915_s8 + $0x48] sm:$0xff] }
 0x5a2   : > { %v2067_v45 = vmul.f32 %v2026_v8, %v1971_v39  ;;  %v2021_v31 = vpop.permute.xlu0 %2020 }
 0x5a3   : > { %v2066_v48 = vmul.f32 %v2021_v31, %v1970_v19  ;;  %v2225_v31 = vld [vmem:[%s4915_s8 + $0x30] sm:$0xff] }
 0x5a4   : > { %3504 = vmatmul.mubr.msk.bf16.gmra.mxu0 %vm872_vm4, %v2077_v12 }
 0x5a5   : > { %v2036_v35 = vpop.permute.xlu1 %2035  ;;  %v2078_v47 = vpack.c.bf16 %v2067_v45, %v2066_v48 }
 0x5a6   : > { %v2069_v62 = vmul.f32 %v2036_v35, %v1973_v29  ;;  %v2031_v36 = vpop.permute.xlu0 %2030  ;;  %v2226_v29 = vld [vmem:[%s4915_s8 + $0x38] sm:$0xff] }
 0x5a7   : > { %v2068_v63 = vmul.f32 %v2031_v36, %v1972_v17  ;;  %3507 = vmatprep.mubr.msk.bf16.mxu1 %vm872_vm4, %v2078_v47 }
 0x5a9   : > { %v2079_v10 = vpack.c.bf16 %v2069_v62, %v2068_v63  ;;  %v2046_v58 = vpop.permute.xlu1 %2045 }
 0x5aa   : > { %v2071_v11 = vmul.f32 %v2046_v58, %v1975_v21  ;;  %v2041_v46 = vpop.permute.xlu0 %2040 }
 0x5ab   : > { %v2070_v3 = vmul.f32 %v2041_v46, %v1974_v24  ;;  %3508 = vmatmul.mubr.msk.bf16.vlgmr.msra.gmra.mxu1 %vm872_vm4, %v2079_v10  ;;  %v2233_v24 = vld [vmem:[%s4915_s8 + $0x70] sm:$0xff]  ;;  %v2234_v10 = vld [vmem:[%s4915_s8 + $0x78] sm:$0xff] }
 0x5ac   : > { %3516 = vmatpush3.bf16.msra.mxu1 %v4584_v13 }
 0x5ad   : > { %v2080_v7 = vpack.c.bf16 %v2071_v11, %v2070_v3  ;;  %v2056_v37 = vpop.permute.xlu1 %2055  ;;  %3517 = vmatprep.subr.bf16.mxu1 %v3734_v57 }
 0x5ae   : > { %v2073_v14 = vmul.f32 %v2056_v37, %v1977_v23  ;;  %v2051_v18 = vpop.permute.xlu0 %2050  ;;  %v2224_v37 = vld [vmem:[%s4915_s8 + $0x28] sm:$0xff] }
 0x5af   : > { %v2072_v16 = vmul.f32 %v2051_v18, %v1976_v33  ;;  %3511 = vmatprep.mubr.msk.bf16.mxu1 %vm872_vm4, %v2080_v7  ;;  %v2223_v7 = vld [vmem:[%s4915_s8 + $0x20] sm:$0xff] }
 0x5b0   : > { %3518 = vmatpush3.bf16.msra.mxu1 %v3734_v57 }
 0x5b1   : > { %v2081_v38 = vpack.c.bf16 %v2073_v14, %v2072_v16 }
 0x5b3   : > { %3512 = vmatmul.mubr.msk.bf16.gmra.mxu1 %vm872_vm4, %v2081_v38 }
 0x65c   : > { %v3501_v9 = vpop.f32.mrf.mxu0 }
 0x65d   : > { %v2237_v55 = vmul.f32 %v3501_v9, %v2221_v54  ;;  %v2231_v54 = vld [vmem:[%s4915_s8 + $0x60] sm:$0xff] }
 0x65e   : > { %v2156_v56 = vpop.f32.mrf.mxu0 }
 0x65f   : > { %v2257_v13 = vsel %vm872_vm4, %v2237_v55, 0.0  ;;  %v2235_v59 = vmul.f32 %v2219_v28, %v2156_v56 }
 0x660   : > { %2258 = vadd.xlane.f32.xlu0 %v2257_v13  ;;  %v3502_v60 = vpop.f32.mrf.mxu0 }
 0x661   : > { %v2251_v25 = vsel %vm872_vm4, %v2235_v59, 0.0  ;;  %v2238_v44 = vmul.f32 %v3502_v60, %v2222_v27  ;;  %v2578_v32 = vpack.c.bf16 %v3502_v60, %v3501_v9  ;;  %v2232_v9 = vld [vmem:[%s4915_s8 + $0x68] sm:$0xff] }
 0x662   : > { %v2159_v51 = vpop.f32.mrf.mxu0  ;;  %v3735_v27 = vld [vmem:[%s4954_s30 + $0x8] sm:$0xff]  }
 0x663   : > { %v2577_v61 = vpack.c.bf16 %v2159_v51, %v2156_v56  ;;  %v2260_v53 = vsel %vm872_vm4, %v2238_v44, 0.0  ;;  %v2236_v39 = vmul.f32 %v2220_v15, %v2159_v51  ;;  %3535 = vmatprep.subr.bf16.mxu0 %v3735_v27  ;;  %v3736_v51 = vld [vmem:[%s4954_s30] sm:$0xff]  }
 0x664   : > { %2252 = vadd.xlane.f32.xlu0 %v2251_v25  ;;  %v3505_v50 = vpop.f32.mrf.mxu0  ;;  %3536 = vmatpush3.bf16.msra.mxu0 %v3735_v27  ;;  %v2307_v25 = vpop.permute.xlu1 %2306 }
 0x665   : > { %3519 = vmatprep.mubr.msk.bf16.mxu1 %vm872_vm4, %v2577_v61  ;;  %v2241_v47 = vmul.f32 %v3505_v50, %v2225_v31  ;;  %v2254_v62 = vsel %vm872_vm4, %v2236_v39, 0.0  ;;  %3537 = vmatprep.subr.bf16.mxu0 %v3736_v51  ;;  %v2311_v61 = vpop.permute.xlu0 %2310 }
 0x666   : > { %v2172_v43 = vpop.f32.mrf.mxu0  ;;  %3520 = vmatmul.mubr.msk.bf16.vlgmr.msra.gmra.mxu1 %vm872_vm4, %v2578_v32 }
 0x667   : > { %v2269_v11 = vsel %vm872_vm4, %v2241_v47, 0.0  ;;  %v2239_v38 = vmul.f32 %v2223_v7, %v2172_v43 }
 0x668   : > { %2261 = vadd.xlane.f32.xlu0 %v2260_v53  ;;  %v3506_v52 = vpop.f32.mrf.mxu0  ;;  %3538 = vmatpush3.bf16.msra.mxu0 %v3736_v51  ;;  %v2315_v32 = vpop.permute.xlu1 %2314 }
 0x669   : > { %v2580_v34 = vpack.c.bf16 %v3506_v52, %v3505_v50  ;;  %v2242_v63 = vmul.f32 %v3506_v52, %v2226_v29  ;;  %v2263_v28 = vsel %vm872_vm4, %v2239_v38, 0.0  ;;  %v2323_v44 = vpop.permute.xlu0 %2322 }
 0x66a   : > { %v2175_v30 = vpop.f32.mrf.mxu0 }
 0x66b   : > { %v2579_v2 = vpack.c.bf16 %v2175_v30, %v2172_v43  ;;  %v3509_v26 = vpop.f32.mrf.mxu1  ;;  %v2272_v3 = vsel %vm872_vm4, %v2242_v63, 0.0  ;;  %v2240_v57 = vmul.f32 %v2224_v37, %v2175_v30 }
 0x66c   : > { %v2245_v4 = vmul.f32 %v3509_v26, %v2229_v0  ;;  %v2319_v43 = vpop.permute.xlu1 %2318 }
 0x66d   : > { %v2188_v49 = vpop.f32.mrf.mxu1  ;;  %3523 = vmatprep.mubr.msk.bf16.mxu1 %vm872_vm4, %v2579_v2  ;;  %v2266_v55 = vsel %vm872_vm4, %v2240_v57, 0.0  ;;  %v2331_v50 = vpop.permute.xlu0 %2330 }
 0x66e   : > { %3524 = vmatmul.mubr.msk.bf16.gmra.mxu1 %vm872_vm4, %v2580_v34  ;;  %v2281_v40 = vsel %vm872_vm4, %v2245_v4, 0.0  ;;  %v2243_v5 = vmul.f32 %v2227_v41, %v2188_v49 }
 0x66f   : > { %2282 = vadd.xlane.f32.xlu1 %v2281_v40  ;;  %v3510_v20 = vpop.f32.mrf.mxu1 }
 0x670   : > { %v2246_v42 = vmul.f32 %v3510_v20, %v2230_v22  ;;  %v2275_v12 = vsel %vm872_vm4, %v2243_v5, 0.0  ;;  %v2582_v17 = vpack.c.bf16 %v3510_v20, %v3509_v26  ;;  %v2327_v52 = vpop.permute.xlu1 %2326 }
 0x671   : > { %v2191_v6 = vpop.f32.mrf.mxu1  ;;  %v2339_v53 = vpop.permute.xlu0 %2338 }
 0x672   : > { %v2581_v19 = vpack.c.bf16 %v2191_v6, %v2188_v49  ;;  %v2284_v8 = vsel %vm872_vm4, %v2246_v42, 0.0  ;;  %v2244_v45 = vmul.f32 %v2228_v1, %v2191_v6 }
 0x673   : > { %2276 = vadd.xlane.f32.xlu1 %v2275_v12  ;;  %2285 = vadd.xlane.f32.xlu0 %v2284_v8  ;;  %v3513_v48 = vpop.f32.mrf.mxu1 }
 0x674   : > { %3527 = vmatprep.mubr.msk.bf16.mxu1 %vm872_vm4, %v2581_v19  ;;  %v2278_v36 = vsel %vm872_vm4, %v2244_v45, 0.0  ;;  %v2249_v23 = vmul.f32 %v3513_v48, %v2233_v24  ;;  %v2335_v30 = vpop.permute.xlu1 %2334 }
 0x675   : > { %v2204_v35 = vpop.f32.mrf.mxu1  ;;  %v2347_v0 = vpop.permute.xlu0 %2346 }
 0x676   : > { %3528 = vmatmul.mubr.msk.bf16.gmra.mxu1 %vm872_vm4, %v2582_v17  ;;  %v2293_v18 = vsel %vm872_vm4, %v2249_v23, 0.0  ;;  %v2247_v56 = vmul.f32 %v2231_v54, %v2204_v35 }
 0x677   : > { %2255 = vadd.xlane.f32.xlu1 %v2254_v62  ;;  %2279 = vadd.xlane.f32.xlu0 %v2278_v36  ;;  %v3514_v21 = vpop.f32.mrf.mxu1 }
 0x678   : > { %v2250_v33 = vmul.f32 %v3514_v21, %v2234_v10  ;;  %v2584_v14 = vpack.c.bf16 %v3514_v21, %v3513_v48  ;;  %v2287_v59 = vsel %vm872_vm4, %v2247_v56, 0.0  ;;  %v2343_v26 = vpop.permute.xlu1 %2342 }
 0x679   : > { %v2207_v58 = vpop.f32.mrf.mxu1  ;;  %v2355_v2 = vpop.permute.xlu0 %2354 }
 0x67a   : > { %v2583_v46 = vpack.c.bf16 %v2207_v58, %v2204_v35  ;;  %v2296_v16 = vsel %vm872_vm4, %v2250_v33, 0.0  ;;  %v2248_v13 = vmul.f32 %v2232_v9, %v2207_v58 }
 0x67b   : > { %2270 = vadd.xlane.f32.xlu1 %v2269_v11  ;;  %2273 = vadd.xlane.f32.xlu0 %v2272_v3 }
 0x67c   : > { %3531 = vmatprep.mubr.msk.bf16.mxu1 %vm872_vm4, %v2583_v46  ;;  %v2290_v60 = vsel %vm872_vm4, %v2248_v13, 0.0  ;;  %v2351_v34 = vpop.permute.xlu1 %2350 }
 0x67d   : > { %v2363_v41 = vpop.permute.xlu0 %2362 }
 0x67e   : > { %3532 = vmatmul.mubr.msk.bf16.gmra.mxu1 %vm872_vm4, %v2584_v14 }
 0x67f   : > { %2294 = vadd.xlane.f32.xlu1 %v2293_v18  ;;  %2297 = vadd.xlane.f32.xlu0 %v2296_v16  ;;  %v3217_v18 = vld [vmem:[%s4955_s17] ss:$0 sm:$0xff] }
 0x680   : > { %v2359_v22 = vpop.permute.xlu1 %2358 }
 0x683   : > { %2264 = vadd.xlane.f32.xlu1 %v2263_v28  ;;  %2267 = vadd.xlane.f32.xlu0 %v2266_v55 }
 0x684   : > { %v2367_v5 = vpop.permute.xlu1 %2366 }
 0x687   : > { %2288 = vadd.xlane.f32.xlu1 %v2287_v59  ;;  %2291 = vadd.xlane.f32.xlu0 %v2290_v60 }
 0x6e9   : > { %v2259_v4 = vpop.xlane.xlu0 %2258 }
 0x6ea   : > { %v2386_v49 = vadd.f32 %v2315_v32, %v2259_v4 }
 0x6ec   : > { %2423 = vperm.xlu0 %3729, %v2386_v49  }
 0x6ed   : > { %v2253_v40 = vpop.xlane.xlu0 %2252 }
 0x6ee   : > { %v2384_v39 = vadd.f32 %v2307_v25, %v2253_v40 }
 0x6f1   : > { %v2262_v15 = vpop.xlane.xlu0 %2261 }
 0x6f2   : > { %v2387_v45 = vadd.f32 %v2319_v43, %v2262_v15 }
 0x6f8   : > { %v2283_v20 = vpop.xlane.xlu1 %2282 }
 0x6f9   : > { %v2394_v1 = vadd.f32 %v2347_v0, %v2283_v20 }
 0x6fb   : > { %2447 = vperm.xlu0 %3729, %v2394_v1  }
 0x6fc   : > { %v2277_v42 = vpop.xlane.xlu1 %2276  ;;  %v2286_v6 = vpop.xlane.xlu0 %2285 }
 0x6fd   : > { %v2392_v19 = vadd.f32 %v2339_v53, %v2277_v42  ;;  %v2395_v29 = vadd.f32 %v2351_v34, %v2286_v6 }
 0x6ff   : > { %2441 = vperm.xlu1 %3730, %v2392_v19   ;;  %2417 = vperm.xlu0 %3729, %v2384_v39  }
 0x700   : > { %v2256_v12 = vpop.xlane.xlu1 %2255  ;;  %v2280_v8 = vpop.xlane.xlu0 %2279 }
 0x701   : > { %v2385_v47 = vadd.f32 %v2311_v61, %v2256_v12  ;;  %v2393_v21 = vadd.f32 %v2343_v26, %v2280_v8 }
 0x703   : > { %2426 = vperm.xlu1 %3730, %v2387_v45  }
 0x704   : > { %v2271_v31 = vpop.xlane.xlu1 %2270  ;;  %v2274_v48 = vpop.xlane.xlu0 %2273 }
 0x705   : > { %v2390_v11 = vadd.f32 %v2331_v50, %v2271_v31  ;;  %v2391_v3 = vadd.f32 %v2335_v30, %v2274_v48 }
 0x707   : > { %2450 = vperm.xlu1 %3730, %v2395_v29  }
 0x708   : > { %v2295_v17 = vpop.xlane.xlu1 %2294  ;;  %v2298_v35 = vpop.xlane.xlu0 %2297 }
 0x709   : > { %v4680_v62 = vadd.f32 %v2363_v41, %v2295_v17  ;;  %v4682_v36 = vadd.f32 %v2367_v5, %v2298_v35 }
 0x70b   : > { %2420 = vperm.xlu1 %3730, %v2385_v47  }
 0x70c   : > { %v2265_v63 = vpop.xlane.xlu1 %2264  ;;  %v2268_v10 = vpop.xlane.xlu0 %2267 }
 0x70d   : > { %v2388_v24 = vadd.f32 %v2323_v44, %v2265_v63  ;;  %v2389_v23 = vadd.f32 %v2327_v52, %v2268_v10 }
 0x70f   : > { %2429 = vperm.xlu0 %3729, %v2388_v24   ;;  %2444 = vperm.xlu1 %3730, %v2393_v21  }
 0x710   : > { %v2289_v58 = vpop.xlane.xlu1 %2288  ;;  %v2292_v33 = vpop.xlane.xlu0 %2291 }
 0x711   : > { %v2396_v46 = vadd.f32 %v2355_v2, %v2289_v58  ;;  %v2397_v7 = vadd.f32 %v2359_v22, %v2292_v33 }
 0x713   : > { %2453 = vperm.xlu0 %3729, %v2396_v46   ;;  %2435 = vperm.xlu1 %3730, %v2390_v11   ;;  %v3228_v46 = vld [vmem:[%s4956_s12] ss:$0 sm:$0xff] }
 0x717   : > { %2438 = vperm.xlu0 %3729, %v2391_v3   ;;  %2432 = vperm.xlu1 %3730, %v2389_v23  }
 0x71b   : > { %2456 = vperm.xlu1 %3730, %v2397_v7  }
 0x726   : > { %v3521_v37 = vpop.f32.mrf.mxu1 }
 0x727   : > { %v2675_v54 = vadd.f32 %v3521_v37, %v3217_v18 }
 0x728   : > { %v2666_v14 = vpop.f32.mrf.mxu1 }
 0x729   : > { %v2667_v38 = vadd.f32 %v3217_v18, %v2666_v14  ;;  %v2731_v60 = vmax.f32 %v2675_v54, 0.0 }
 0x72a   : > { %v3522_v16 = vpop.f32.mrf.mxu1 }
 0x72b   : > { %v2678_v57 = vadd.f32 %v3522_v16, %v3217_v18  ;;  %v2729_v13 = vmax.f32 %v2667_v38, 0.0 }
 0x72c   : > { %v2669_v9 = vpop.f32.mrf.mxu1 }
 0x72d   : > { %v2670_v28 = vadd.f32 %v3217_v18, %v2669_v9  ;;  %v2732_v55 = vmax.f32 %v2678_v57, 0.0 }
 0x72e   : > { %v3525_v56 = vpop.f32.mrf.mxu1 }
 0x72f   : > { %v2730_v59 = vmax.f32 %v2670_v28, 0.0  ;;  %v2746_v61 = vpack.c.bf16 %v2732_v55, %v2731_v60  ;;  %v2691_v50 = vadd.f32 %v3525_v56, %v3217_v18 }
 0x730   : > { %v2682_v27 = vpop.f32.mrf.mxu1 }
 0x731   : > { %v2745_v51 = vpack.c.bf16 %v2730_v59, %v2729_v13  ;;  %v2683_v44 = vadd.f32 %v3217_v18, %v2682_v27  ;;  %v2735_v26 = vmax.f32 %v2691_v50, 0.0 }
 0x732   : > { %v3526_v25 = vpop.f32.mrf.mxu1 }
 0x733   : > { %v2694_v32 = vadd.f32 %v3526_v25, %v3217_v18  ;;  %3539 = vmatprep.mubr.msk.bf16.mxu0 %vm872_vm4, %v2745_v51  ;;  %v2733_v30 = vmax.f32 %v2683_v44, 0.0 }
 0x734   : > { %v2685_v43 = vpop.f32.mrf.mxu1  ;;  %3540 = vmatmul.mubr.msk.bf16.vlgmr.msra.gmra.mxu0 %vm872_vm4, %v2746_v61 }
 0x735   : > { %v2686_v53 = vadd.f32 %v3217_v18, %v2685_v43  ;;  %v2736_v52 = vmax.f32 %v2694_v32, 0.0 }
 0x736   : > { %v3529_v0 = vpop.f32.mrf.mxu1 }
 0x737   : > { %v2734_v2 = vmax.f32 %v2686_v53, 0.0  ;;  %v2748_v4 = vpack.c.bf16 %v2736_v52, %v2735_v26  ;;  %v2707_v5 = vadd.f32 %v3529_v0, %v3217_v18 }
 0x738   : > { %v2698_v41 = vpop.f32.mrf.mxu1 }
 0x739   : > { %v2747_v34 = vpack.c.bf16 %v2734_v2, %v2733_v30  ;;  %v2699_v22 = vadd.f32 %v3217_v18, %v2698_v41  ;;  %v2739_v19 = vmax.f32 %v2707_v5, 0.0 }
 0x73a   : > { %v3530_v49 = vpop.f32.mrf.mxu1 }
 0x73b   : > { %v2710_v40 = vadd.f32 %v3530_v49, %v3217_v18  ;;  %3543 = vmatprep.mubr.msk.bf16.mxu0 %vm872_vm4, %v2747_v34  ;;  %v2737_v6 = vmax.f32 %v2699_v22, 0.0 }
 0x73c   : > { %v2701_v15 = vpop.f32.mrf.mxu1  ;;  %3544 = vmatmul.mubr.msk.bf16.gmra.mxu0 %vm872_vm4, %v2748_v4 }
 0x73d   : > { %v2702_v20 = vadd.f32 %v3217_v18, %v2701_v15  ;;  %v2740_v1 = vmax.f32 %v2710_v40, 0.0 }
 0x73e   : > { %v3533_v42 = vpop.f32.mrf.mxu1 }
 0x73f   : > { %v2738_v39 = vmax.f32 %v2702_v20, 0.0  ;;  %v2750_v45 = vpack.c.bf16 %v2740_v1, %v2739_v19  ;;  %v2723_v17 = vadd.f32 %v3533_v42, %v3217_v18 }
 0x740   : > { %v2714_v12 = vpop.f32.mrf.mxu1 }
 0x741   : > { %v2749_v8 = vpack.c.bf16 %v2738_v39, %v2737_v6  ;;  %v2715_v48 = vadd.f32 %v3217_v18, %v2714_v12  ;;  %v2743_v10 = vmax.f32 %v2723_v17, 0.0 }
 0x742   : > { %v3534_v31 = vpop.f32.mrf.mxu1 }
 0x743   : > { %v2726_v29 = vadd.f32 %v3534_v31, %v3217_v18  ;;  %3547 = vmatprep.mubr.msk.bf16.mxu0 %vm872_vm4, %v2749_v8  ;;  %v2741_v21 = vmax.f32 %v2715_v48, 0.0 }
 0x744   : > { %v2717_v35 = vpop.f32.mrf.mxu1  ;;  %3548 = vmatmul.mubr.msk.bf16.gmra.mxu0 %vm872_vm4, %v2750_v45 }
 0x745   : > { %v2718_v47 = vadd.f32 %v3217_v18, %v2717_v35  ;;  %v2744_v63 = vmax.f32 %v2726_v29, 0.0 }
 0x747   : > { %v2742_v24 = vmax.f32 %v2718_v47, 0.0  ;;  %v2752_v11 = vpack.c.bf16 %v2744_v63, %v2743_v10 }
 0x749   : > { %v2751_v58 = vpack.c.bf16 %v2742_v24, %v2741_v21  ;;  %v2464_v24 = vlaneseq }
 0x74b   : > { %3551 = vmatprep.mubr.msk.bf16.mxu0 %vm872_vm4, %v2751_v58 }
 0x74c   : > { %3552 = vmatmul.mubr.msk.bf16.gmra.mxu0 %vm872_vm4, %v2752_v11  ;;  %vm2573_vm4 = vcmask 1048512  }
 0x767   : > { %v2424_v48 = vpop.permute.xlu0 %2423 }
 0x776   : > { %v4768_v17 = vpop.permute.xlu0 %2447 }
 0x77a   : > { %v4764_v45 = vpop.permute.xlu1 %2441  ;;  %v2418_v47 = vpop.permute.xlu0 %2417 }
 0x77e   : > { %v2427_v31 = vpop.permute.xlu1 %2426 }
 0x782   : > { %v4766_v29 = vpop.permute.xlu1 %2450 }
 0x786   : > { %v2421_v35 = vpop.permute.xlu1 %2420 }
 0x78a   : > { %v4770_v63 = vpop.permute.xlu1 %2444  ;;  %v2430_v21 = vpop.permute.xlu0 %2429 }
 0x78e   : > { %v4772_v10 = vpop.permute.xlu1 %2435  ;;  %v4774_v58 = vpop.permute.xlu0 %2453 }
 0x792   : > { %v2433_v11 = vpop.permute.xlu1 %2432 }
 0x7f4   : > { %v3541_v3 = vpop.f32.mrf.mxu0 }
 0x7f5   : > { %v4698_v23 = vadd.f32 %v3541_v3, %v3228_v46  ;;  %v4781_v3 = vshrl.u32 %v2464_v24, 7 }
 0x7f6   : > { %v2834_v33 = vpop.f32.mrf.mxu0 }
 0x7f7   : > { %v4700_v7 = vadd.f32 %v3228_v46, %v2834_v33  ;;  %v2899_v37 = vmul.f32 %v4698_v23, %v4698_v23 }
 0x7f8   : > { %v3542_v14 = vpop.f32.mrf.mxu0 }
 0x7f9   : > { %2917 = vadd.xlane.f32.xlu0 %v2899_v37  ;;  %v4704_v16 = vadd.f32 %v3542_v14, %v3228_v46  ;;  %v2897_v57 = vmul.f32 %v4700_v7, %v4700_v7 }
 0x7fa   : > { %v2837_v18 = vpop.f32.mrf.mxu0 }
 0x7fb   : > { %v4706_v38 = vadd.f32 %v3228_v46, %v2837_v18  ;;  %v2900_v56 = vmul.f32 %v4704_v16, %v4704_v16 }
 0x7fc   : > { %v3545_v54 = vpop.f32.mrf.mxu0 }
 0x7fd   : > { %v4710_v9 = vadd.f32 %v3545_v54, %v3228_v46  ;;  %2913 = vadd.xlane.f32.xlu0 %v2897_v57  ;;  %v2898_v28 = vmul.f32 %v4706_v38, %v4706_v38 }
 0x7fe   : > { %v2850_v55 = vpop.f32.mrf.mxu0 }
 0x7ff   : > { %2915 = vadd.xlane.f32.xlu1 %v2898_v28  ;;  %v4716_v59 = vadd.f32 %v3228_v46, %v2850_v55  ;;  %v2903_v27 = vmul.f32 %v4710_v9, %v4710_v9  ;;  %v4788_v28 = vpop.permute.xlu1 %2456 }
 0x800   : > { %v3546_v13 = vpop.f32.mrf.mxu0 }
 0x801   : > { %v4718_v60 = vadd.f32 %v3546_v13, %v3228_v46  ;;  %2919 = vadd.xlane.f32.xlu0 %v2900_v56  ;;  %v2901_v50 = vmul.f32 %v4716_v59, %v4716_v59 }
 0x802   : > { %v2853_v51 = vpop.f32.mrf.mxu0 }
 0x803   : > { %v4722_v61 = vadd.f32 %v3228_v46, %v2853_v51  ;;  %2925 = vadd.xlane.f32.xlu1 %v2903_v27  ;;  %v2904_v25 = vmul.f32 %v4718_v60, %v4718_v60 }
 0x804   : > { %v3549_v44 = vpop.f32.mrf.mxu0 }
 0x805   : > { %v4726_v32 = vadd.f32 %v3549_v44, %v3228_v46  ;;  %2927 = vadd.xlane.f32.xlu0 %v2904_v25  ;;  %v2902_v53 = vmul.f32 %v4722_v61, %v4722_v61 }
 0x806   : > { %v2866_v43 = vpop.f32.mrf.mxu0 }
 0x807   : > { %2921 = vadd.xlane.f32.xlu1 %v2901_v50  ;;  %v4732_v0 = vadd.f32 %v3228_v46, %v2866_v43  ;;  %v2907_v2 = vmul.f32 %v4726_v32, %v4726_v32 }
 0x808   : > { %v3550_v52 = vpop.f32.mrf.mxu0 }
 0x809   : > { %v4734_v30 = vadd.f32 %v3550_v52, %v3228_v46  ;;  %2923 = vadd.xlane.f32.xlu0 %v2902_v53  ;;  %v2905_v22 = vmul.f32 %v4732_v0, %v4732_v0 }
 0x80a   : > { %v2869_v26 = vpop.f32.mrf.mxu0 }
 0x80b   : > { %v4738_v41 = vadd.f32 %v3228_v46, %v2869_v26  ;;  %2933 = vadd.xlane.f32.xlu1 %v2907_v2  ;;  %v2908_v34 = vmul.f32 %v4734_v30, %v4734_v30 }
 0x80c   : > { %v3553_v4 = vpop.f32.mrf.mxu0 }
 0x80d   : > { %v4742_v49 = vadd.f32 %v3553_v4, %v3228_v46  ;;  %2935 = vadd.xlane.f32.xlu0 %v2908_v34  ;;  %v2906_v5 = vmul.f32 %v4738_v41, %v4738_v41 }
 0x80e   : > { %v2882_v40 = vpop.f32.mrf.mxu0 }
 0x80f   : > { %2929 = vadd.xlane.f32.xlu1 %v2905_v22  ;;  %v4748_v20 = vadd.f32 %v3228_v46, %v2882_v40  ;;  %v2911_v42 = vmul.f32 %v4742_v49, %v4742_v49 }
 0x810   : > { %v3554_v15 = vpop.f32.mrf.mxu0 }
 0x811   : > { %v4750_v1 = vadd.f32 %v3554_v15, %v3228_v46  ;;  %2931 = vadd.xlane.f32.xlu0 %v2906_v5  ;;  %v2909_v12 = vmul.f32 %v4748_v20, %v4748_v20 }
 0x812   : > { %v2885_v6 = vpop.f32.mrf.mxu0 }
 0x813   : > { %v4754_v39 = vadd.f32 %v3228_v46, %v2885_v6  ;;  %2941 = vadd.xlane.f32.xlu1 %v2911_v42  ;;  %v2912_v19 = vmul.f32 %v4750_v1, %v4750_v1  ;;  %v4779_v46 = vpop.permute.xlu0 %2438 }
 0x815   : > { %2943 = vadd.xlane.f32.xlu0 %v2912_v19  ;;  %v2910_v8 = vmul.f32 %v4754_v39, %v4754_v39 }
 0x817   : > { %2937 = vadd.xlane.f32.xlu1 %v2909_v12 }
 0x819   : > { %2939 = vadd.xlane.f32.xlu0 %v2910_v8 }
 0x828   : > { %2462 = vperm.xlu1 %3730, %v4682_v36   ;;  %v4776_v36 = vand.u32 127, %v2464_v24 }
 0x82a   : > { %v2477_v37 = vadd.s32 4294967280, %v4776_v36  ;;  %v2468_v18 = vsub.s32 %v4776_v36, %v4781_v3  ;;  %v2484_v54 = vadd.s32 4294967272, %v4776_v36  ;;  %v2491_v13 = vadd.s32 4294967264, %v4776_v36 }
 0x82b   : > { %v2498_v25 = vadd.s32 4294967256, %v4776_v36  ;;  %v2505_v5 = vadd.s32 4294967248, %v4776_v36  ;;  %v2512_v12 = vadd.s32 4294967240, %v4776_v36 }
 0x82c   : > { %v2480_v56 = vsub.s32 %v2477_v37, %v4781_v3  ;;  %v2469_v51 = vrot.slane %v2418_v47, %v2468_v18  ;;  %v2487_v50 = vsub.s32 %v2484_v54, %v4781_v3  ;;  %v2494_v26 = vsub.s32 %v2491_v13, %v4781_v3 }
 0x82d   : > { %v2501_v4 = vsub.s32 %v2498_v25, %v4781_v3  ;;  %v2508_v24 = vsub.s32 %v2505_v5, %v4781_v3 }
 0x82e   : > { %v2481_v2 = vrot.slane %v2424_v48, %v2480_v56  ;;  %v2488_v42 = vrot.slane %v2427_v31, %v2487_v50  ;;  %v2495_v19 = vrot.slane %v2430_v21, %v2494_v26  ;;  %v2519_v31 = vadd.s32 4294967232, %v4776_v36 }
 0x82f   : > { %2459 = vperm.xlu0 %3729, %v4680_v62   ;;  %v2470_v62 = vadd.s32 4294967288, %v4776_v36  ;;  %v2515_v21 = vsub.s32 %v2512_v12, %v4781_v3  ;;  %v2509_v56 = vrot.slane %v4772_v10, %v2508_v24  ;;  %v2533_v10 = vadd.s32 4294967216, %v4776_v36 }
 0x830   : > { %v2522_v25 = vsub.s32 %v2519_v31, %v4781_v3 }
 0x831   : > { %v2473_v33 = vsub.s32 %v2470_v62, %v4781_v3 }
 0x833   : > { %v2474_v55 = vrot.slane %v2421_v35, %v2473_v33  ;;  %v2502_v35 = vrot.slane %v2433_v11, %v2501_v4 }
 0x835   : > { %v2476_v53 = vsel %vm2475_vm6, %v2474_v55, %v2469_v51  ;;  %v2526_v55 = vadd.s32 4294967224, %v4776_v36 }
 0x836   : > { %v2483_v40 = vsel %vm2482_vm7, %v2481_v2, %v2476_v53 }
 0x837   : > { %v2490_v48 = vsel %vm2489_vm8, %v2488_v42, %v2483_v40  ;;  %v2529_v2 = vsub.s32 %v2526_v55, %v4781_v3 }
 0x882   : > { %v2918_v14 = vpop.xlane.xlu0 %2917 }
 0x883   : > { %v2947_v57 = vmax.f32 %v2918_v14, 1e-24  ;;  %v2497_v14 = vsel %vm2496_vm9, %v2495_v19, %v2490_v48  ;;  %v2540_v19 = vadd.s32 4294967208, %v4776_v36 }
 0x885   : > { %3769 = vrsqrt.f32 %v2947_v57  ;;  %v2504_v57 = vsel %vm2503_vm10, %v2502_v35, %v2497_v14  ;;  %v2547_v35 = vadd.s32 4294967200, %v4776_v36 }
 0x886   : > { %v2914_v27 = vpop.xlane.xlu0 %2913 }
 0x887   : > { %v2945_v44 = vmax.f32 %v2914_v27, 1e-24 }
 0x888   : > { %v2916_v43 = vpop.xlane.xlu1 %2915 }
 0x889   : > { %3771 = vrsqrt.f32 %v2945_v44  ;;  %v2946_v52 = vmax.f32 %v2916_v43, 1e-24  ;;  %v2511_v44 = vsel %vm2510_vm11, %v2509_v56, %v2504_v57  ;;  %v2516_v43 = vrot.slane %v4779_v46, %v2515_v21 }
 0x88a   : > { %v2920_v34 = vpop.xlane.xlu0 %2919  ;;  %v2550_v57 = vsub.s32 %v2547_v35, %v4781_v3 }
 0x88b   : > { %3773 = vrsqrt.f32 %v2946_v52  ;;  %v2948_v22 = vmax.f32 %v2920_v34, 1e-24  ;;  %v2518_v34 = vsel %vm2517_vm12, %v2516_v43, %v2511_v44 }
 0x88c   : > { %v2926_v15 = vpop.xlane.xlu1 %2925 }
 0x88d   : > { %3775 = vrsqrt.f32 %v2948_v22  ;;  %v2951_v6 = vmax.f32 %v2926_v15, 1e-24 }
 0x88e   : > { %v2928_v8 = vpop.xlane.xlu0 %2927 }
 0x88f   : > { %3777 = vrsqrt.f32 %v2951_v6  ;;  %v2952_v47 = vmax.f32 %v2928_v8, 1e-24  ;;  %v2536_v6 = vsub.s32 %v2533_v10, %v4781_v3  ;;  %v2530_v8 = vrot.slane %v4770_v63, %v2529_v2 }
 0x890   : > { %v2922_v62 = vpop.xlane.xlu1 %2921 }
 0x891   : > { %3779 = vrsqrt.f32 %v2952_v47  ;;  %v2949_v33 = vmax.f32 %v2922_v62, 1e-24  ;;  %v2537_v63 = vrot.slane %v4768_v17, %v2536_v6 }
 0x892   : > { %v3770_v37 = vpop.eup %3769  ;;  %v2924_v18 = vpop.xlane.xlu0 %2923 }
 0x893   : > { %v2979_v11 = vmul.f32 %v3770_v37, %v4698_v23  ;;  %3781 = vrsqrt.f32 %v2949_v33  ;;  %v2950_v54 = vmax.f32 %v2924_v18, 1e-24 }
 0x894   : > { %v2934_v13 = vpop.xlane.xlu1 %2933 }
 0x895   : > { %2995 = vst [vmem:[%s4066_s22 + $0x10] sm:$0xff] %v2979_v11  ;;  %3783 = vrsqrt.f32 %v2950_v54  ;;  %v2955_v27 = vmax.f32 %v2934_v13, 1e-24 }
 0x896   : > { %v3772_v51 = vpop.eup %3771  ;;  %v2936_v50 = vpop.xlane.xlu0 %2935 }
 0x897   : > { %v2977_v23 = vmul.f32 %v3772_v51, %v4700_v7  ;;  %3785 = vrsqrt.f32 %v2955_v27  ;;  %v2956_v53 = vmax.f32 %v2936_v50, 1e-24  ;;  %v2523_v7 = vrot.slane %v4764_v45, %v2522_v25 }
 0x898   : > { %v3774_v52 = vpop.eup %3773  ;;  %v2930_v26 = vpop.xlane.xlu1 %2929  ;;  %v2568_v27 = vadd.s32 4294967176, %v4776_v36  ;;  %v2551_v50 = vrot.slane %v4774_v58, %v2550_v57 }
 0x899   : > { %2993 = vst [vmem:[%s4066_s22] sm:$0xff] %v2977_v23  ;;  %v2978_v4 = vmul.f32 %v3774_v52, %v4706_v38  ;;  %3787 = vrsqrt.f32 %v2956_v53  ;;  %v2953_v22 = vmax.f32 %v2930_v26, 1e-24  ;;  %v2525_v38 = vsel %vm2524_vm13, %v2523_v7, %v2518_v34 }
 0x89a   : > { %v3776_v46 = vpop.eup %3775  ;;  %v2932_v40 = vpop.xlane.xlu0 %2931  ;;  %v2532_v24 = vsel %vm2531_vm14, %v2530_v8, %v2525_v38  ;;  %v2571_v23 = vsub.s32 %v2568_v27, %v4781_v3 }
 0x89b   : > { %2994 = vst [vmem:[%s4066_s22 + $0x8] sm:$0xff] %v2978_v4  ;;  %v2980_v5 = vmul.f32 %v3776_v46, %v4704_v16  ;;  %3789 = vrsqrt.f32 %v2953_v22  ;;  %v2954_v15 = vmax.f32 %v2932_v40, 1e-24  ;;  %v2539_v11 = vsel %vm2538_vm15, %v2537_v63, %v2532_v24 }
 0x89c   : > { %v3778_v42 = vpop.eup %3777  ;;  %v2942_v12 = vpop.xlane.xlu1 %2941 }
 0x89d   : > { %2996 = vst [vmem:[%s4066_s22 + $0x18] sm:$0xff] %v2980_v5  ;;  %v2983_v45 = vmul.f32 %v3778_v42, %v4710_v9  ;;  %3791 = vrsqrt.f32 %v2954_v15  ;;  %v2959_v16 = vmax.f32 %v2942_v12, 1e-24  ;;  %v2543_v9 = vsub.s32 %v2540_v19, %v4781_v3 }
 0x89e   : > { %v3780_v48 = vpop.eup %3779  ;;  %v2944_v47 = vpop.xlane.xlu0 %2943 }
 0x89f   : > { %2999 = vst [vmem:[%s4066_s22 + $0x30] sm:$0xff] %v2983_v45  ;;  %v2984_v62 = vmul.f32 %v3780_v48, %v4718_v60  ;;  %3793 = vrsqrt.f32 %v2959_v16  ;;  %v2960_v33 = vmax.f32 %v2944_v47, 1e-24  ;;  %v2554_v60 = vadd.s32 4294967192, %v4776_v36 }
 0x8a0   : > { %v3782_v37 = vpop.eup %3781  ;;  %v2938_v31 = vpop.xlane.xlu1 %2937  ;;  %v2544_v13 = vrot.slane %v4766_v29, %v2543_v9 }
 0x8a1   : > { %3000 = vst [vmem:[%s4066_s22 + $0x38] sm:$0xff] %v2984_v62  ;;  %v2981_v14 = vmul.f32 %v3782_v37, %v4716_v59  ;;  %3795 = vrsqrt.f32 %v2960_v33  ;;  %v2957_v21 = vmax.f32 %v2938_v31, 1e-24  ;;  %v2561_v59 = vadd.s32 4294967184, %v4776_v36 }
 0x8a2   : > { %v3784_v18 = vpop.eup %3783  ;;  %v2940_v54 = vpop.xlane.xlu0 %2939  ;;  %v2557_v44 = vsub.s32 %v2554_v60, %v4781_v3 }
 0x8a3   : > { %2997 = vst [vmem:[%s4066_s22 + $0x20] sm:$0xff] %v2981_v14  ;;  %v2982_v17 = vmul.f32 %v3784_v18, %v4722_v61  ;;  %3797 = vrsqrt.f32 %v2957_v21  ;;  %v2958_v55 = vmax.f32 %v2940_v54, 1e-24  ;;  %v2546_v61 = vsel %vm2545_vm0, %v2544_v13, %v2539_v11 }
 0x8a4   : > { %v3786_v56 = vpop.eup %3785  ;;  %v2564_v29 = vsub.s32 %v2561_v59, %v4781_v3  ;;  %v2463_v52 = vpop.permute.xlu1 %2462  ;;  %v2558_v2 = vrot.slane %v4788_v28, %v2557_v44 }
 0x8a5   : > { %2998 = vst [vmem:[%s4066_s22 + $0x28] sm:$0xff] %v2982_v17  ;;  %v2987_v51 = vmul.f32 %v3786_v56, %v4726_v32  ;;  %3799 = vrsqrt.f32 %v2958_v55  ;;  %v2553_v32 = vsel %vm2552_vm1, %v2551_v50, %v2546_v61  ;;  %v2572_v4 = vrot.slane %v2463_v52, %v2571_v23 }
 0x8a6   : > { %v3788_v25 = vpop.eup %3787  ;;  %v2560_v34 = vsel %vm2559_vm2, %v2558_v2, %v2553_v32 }
 0x8a7   : > { %3003 = vst [vmem:[%s4066_s22 + $0x50] sm:$0xff] %v2987_v51  ;;  %v2988_v43 = vmul.f32 %v3788_v25, %v4734_v30 }
 0x8a8   : > { %v3790_v36 = vpop.eup %3789 }
 0x8a9   : > { %3004 = vst [vmem:[%s4066_s22 + $0x58] sm:$0xff] %v2988_v43  ;;  %v2985_v53 = vmul.f32 %v3790_v36, %v4732_v0 }
 0x8aa   : > { %v3792_v10 = vpop.eup %3791  ;;  %v2460_v58 = vpop.permute.xlu0 %2459 }
 0x8ab   : > { %3001 = vst [vmem:[%s4066_s22 + $0x40] sm:$0xff] %v2985_v53  ;;  %v2986_v30 = vmul.f32 %v3792_v10, %v4738_v41  ;;  %v2565_v3 = vrot.slane %v2460_v58, %v2564_v29 }
 0x8ac   : > { %v3794_v26 = vpop.eup %3793 }
 0x8ad   : > { %3002 = vst [vmem:[%s4066_s22 + $0x48] sm:$0xff] %v2986_v30  ;;  %v2991_v0 = vmul.f32 %v3794_v26, %v4742_v49  ;;  %v2567_v22 = vsel %vm2566_vm3, %v2565_v3, %v2560_v34 }
 0x8ae   : > { %v3796_v46 = vpop.eup %3795  ;;  %v2574_v28 = vsel %vm2573_vm4, %v2572_v4, %v2567_v22 }
 0x8af   : > { %3007 = vst [vmem:[%s4066_s22 + $0x70] sm:$0xff] %v2991_v0  ;;  %v2992_v7 = vmul.f32 %v3796_v46, %v4750_v1  ;;  %2576 = vst [vmem:[%s4070_s18] sm:$0x1] %v2574_v28 }
 0x8b0   : > { %v3798_v40 = vpop.eup %3797 }
 0x8b1   : > { %3008 = vst [vmem:[%s4066_s22 + $0x78] sm:$0xff] %v2992_v7  ;;  %v2989_v41 = vmul.f32 %v3798_v40, %v4748_v20 }
 0x8b2   : > { %v3800_v5 = vpop.eup %3799 }
 0x8b3   : > { %3005 = vst [vmem:[%s4066_s22 + $0x60] sm:$0xff] %v2989_v41  ;;  %v2990_v15 = vmul.f32 %v3800_v5, %v4754_v39 }
 0x8b5   : > { %3006 = vst [vmem:[%s4066_s22 + $0x68] sm:$0xff] %v2990_v15 }
 0x8b6 PF: > { %s4957_s14 = sld [smem:[#allocation10_spill]]  ;;  %s3027_s16 = sshll.u32 %s4070_s18, 4  ;;  %s3028_s16 = int_to_ptr.vmem [resolvable:$true] %s3027_s16 }
 0x8b7   : > { %s4959_s29 = sld [smem:[#allocation22_spill]]  ;;  %s4960_s27 = sand.u32 1, %s3869_s19  }
 0x8b8   : > { %s3010_s28 = scalar_lea.sflag [#allocation6], %s4960_s27  ;;  %s3801_s21 = scalar_lea.vmem %s3028_s16, 16 }
 0x8b9   : > { %p3802_p2 = scmp.ne.s32.totalorder %s3028_s16, %s3801_s21  ;;  %s3899_s22 = smov [#allocation5]  }
 0x8ba   : > { %s3805_s17 = sshll.u32 %s3899_s22, 4  ;;  %s3806_s17 = int_to_ptr.vmem [resolvable:$false] %s3805_s17 }
 0x8bb   : > { %p3803_p4 = pnand %p3802_p2, %p4029_p3  ;;  %s3807_s26 = scalar_lea.vmem %s3806_s17, 32 }
 0x8bc   : > { %s3239_s23 = sshll.u32 %s4957_s14, 4  ;;  %p3808_p6 = scmp.lt.s32.totalorder %s3028_s16, %s3806_s17 }
 0x8bd   : > { %s3025_s13 = scalar_lea.hbm %s4959_s29, %s3239_s23  ;;  %p3804_p5 = pneg %p3803_p4 }
 0x8be   : > { %p3809_p7 = scmp.lt.s32.totalorder %s3807_s26, %s3801_s21 }
 0x8c0   : > { %p3810_p8 = por %p3809_p7, %p3808_p6 }
 0x8c2   : > { %p3811_p10 = pnand %p3810_p8, %p3804_p5 }
 0x8c4   : > { %3814 = shalt.err (!%p3811_p10)
}
 0x8c5   : > { %s3815_s11 = scalar_lea.hbm %s3025_s13, 16  ;;  %s3819_s14 = scalar_lea.hbm %s4959_s29, 32 }
 0x8c6   : > { %p3816_p11 = scmp.ne.s32.totalorder %s3025_s13, %s3815_s11  ;;  %p3820_p0 = scmp.lt.s32.totalorder %s3025_s13, %s4959_s29 }
 0x8c7   : > { %p3821_p1 = scmp.lt.s32.totalorder %s3819_s14, %s3815_s11 }
 0x8c8   : > { %p3817_p12 = pnand %p3816_p11, %p4029_p3 }
 0x8c9   : > { %p3822_p2 = por %p3821_p1, %p3820_p0 }
 0x8ca   : > { %p3818_p13 = pneg %p3817_p12 }
 0x8cc   : > { %p3823_p4 = pnand %p3822_p2, %p3818_p13 }
 0x8ce   : > { %3826 = shalt.err (!%p3823_p4)
}
 0x8cf   : > { %3568 = dma.vmem_to_hbm [thread:$0]  (%p4029_p3), %s3028_s16, 16, %s3025_s13, %s3010_s28  }
 0x8d0 PF: > { %s4961_s25 = sld [smem:[#allocation13_spill]] }
 0x8d1   : > { %s4962_s27 = sld [smem:[#allocation8_spill]] }
 0x8d6   : > { %p3574_p5 = scmp.ge.s32.totalorder %s4961_s25, 2 }
 0x8d7   : > { %s3042_s22 = sand.u32 1, %s4962_s27  }
 0x8d8   : > { %p3571_p6 = pnand %p3574_p5, %p4039_p9  ;;  %s3043_s17 = scalar_lea.sflag [#allocation6], %s3042_s22 }
 0x8da   : > { %p3572_p7 = pneg %p3571_p6 }
 0x8dc   : > { %3860 = dma.done.wait (%p3572_p7), %s3043_s17, 16  }
 0x8dd   : > { %3862 = vsyncadd (%p3572_p7), %s3043_s17, 4294967280  ;;  %s29_s25 = sadd.s32 1, %s4961_s25   ;;  %s4964_s26 = sld [smem:[#allocation9_spill]] }
 0x8de   : > { %p26_p8 = scmp.ge.s32.totalorder %s29_s25, 6   ;;  %s4965_s20 = sld [smem:[#allocation18_spill]] }
 0x8df   : > { %s4966_s21 = sld [smem:[#allocation11_spill]]  ;;  %s4970_s18 = smov %s3869_s19 }
 0x8e0   : > { %s4967_s22 = sld [smem:[#allocation12_spill]]  ;;  %28 = sbr.rel (!%p26_p8) target bundleno = 10 (0xa), region = 134 }
 0x8e1   : > { %s4968_s23 = sld [smem:[#allocation14_spill]] }
 0x8e2   : > { %s4969_s24 = sld [smem:[#allocation16_spill]] }
 0x8e3   : > { %s4971_s19 = smov %s4964_s26 }
 0x8e5   :  { %3055 = vsyncpa [#allocation6], 1 }
 0x8e6   :  { %3057 = vsyncpa [#allocation6 + $0x1], 1 }

</bundles_post_ra>
